<compile_context>
chip_gen: v7x
topology: tpu7x:2x2x1
jax: 0.10.0
libtpu: 0.0.40
codegen_flags: <defaults>
</compile_context>

<pallas_src>
import functools

import jax
import jax.numpy as jnp
from jax.experimental import pallas as pl
from jax.experimental.pallas import tpu as pltpu


# ----------------------------- Pallas kernels ------------------------------

def _conv1_kernel(p_ref, w_ref, b_ref, o_ref):
    """One space tower's conv1 as im2col matmul + bias + relu."""
    acc = jnp.dot(p_ref[...], w_ref[...], preferred_element_type=jnp.float32)
    o_ref[...] = jnp.maximum(acc + b_ref[...], 0.0).astype(o_ref.dtype)


def _tower_tail_kernel(p_ref, w2_ref, b2_ref, pool_ref, wf1_ref, bf1_ref,
                       wf2_ref, bf2_ref, o_ref):
    """conv2 -> relu -> AdaptiveAvgPool2d(1) -> fc1 -> relu -> fc2, fused.

    Intermediates never leave VMEM/vregs.  The spatial mean is expressed as a
    (B, B*S) @ (B*S, C) matmul so it rides the MXU instead of a lane-4 VPU
    reduction kernel.
    """
    y = jnp.dot(p_ref[...], w2_ref[...], preferred_element_type=jnp.float32)
    y = jnp.maximum(y + b2_ref[...], 0.0)                                # (B*S, 32)
    y = jnp.dot(pool_ref[...], y, preferred_element_type=jnp.float32)   # (B, 32)
    h = jnp.dot(y, wf1_ref[...], preferred_element_type=jnp.float32)
    h = jnp.maximum(h + bf1_ref[...], 0.0)                               # (B, 256)
    out = jnp.dot(h, wf2_ref[...], preferred_element_type=jnp.float32) + bf2_ref[...]
    o_ref[...] = out.astype(o_ref.dtype)


def _mlp_kernel(x_ref, w1_ref, b1_ref, w2_ref, b2_ref, o_ref):
    """Fused fc1 + relu + fc2 (the `liner` block and every output head)."""
    h = jnp.dot(x_ref[...], w1_ref[...], preferred_element_type=jnp.float32)
    h = jnp.maximum(h + b1_ref[...], 0.0)
    out = jnp.dot(h, w2_ref[...], preferred_element_type=jnp.float32) + b2_ref[...]
    o_ref[...] = out.astype(o_ref.dtype)


# --------------------------- pallas_call wrappers ----------------------------

def conv1_all_towers(p, w, b):
    """p: (S, M, K), w: (S, K, N), b: (S, 1, N) -> relu(p @ w + b): (S, M, N)."""
    S, M, K = p.shape
    N = w.shape[-1]
    return pl.pallas_call(
        _conv1_kernel,
        out_shape=jax.ShapeDtypeStruct((S, M, N), jnp.float32),
        grid=(S,),
        in_specs=[pl.BlockSpec((None, M, K), lambda s: (s, 0, 0)),
                  pl.BlockSpec((None, K, N), lambda s: (s, 0, 0)),
                  pl.BlockSpec((None, 1, N), lambda s: (s, 0, 0))],
        out_specs=pl.BlockSpec((None, M, N), lambda s: (s, 0, 0)),
        compiler_params=pltpu.CompilerParams(
            dimension_semantics=("parallel",)),
    )(p, w, b)


def tower_tail_all(p2, w2, b2, pool, wf1, bf1, wf2, bf2):
    """Per-tower conv2 + pool + fc1 + fc2; grid over towers ("parallel")."""
    S, MS, K2 = p2.shape
    B = pool.shape[0]
    N2 = w2.shape[-1]
    H1 = wf1.shape[-1]
    NO = wf2.shape[-1]
    return pl.pallas_call(
        _tower_tail_kernel,
        out_shape=jax.ShapeDtypeStruct((S, B, NO), jnp.float32),
        grid=(S,),
        in_specs=[pl.BlockSpec((None, MS, K2), lambda s: (s, 0, 0)),
                  pl.BlockSpec((None, K2, N2), lambda s: (s, 0, 0)),
                  pl.BlockSpec((None, 1, N2), lambda s: (s, 0, 0)),
                  pl.BlockSpec((B, MS), lambda s: (0, 0)),
                  pl.BlockSpec((None, N2, H1), lambda s: (s, 0, 0)),
                  pl.BlockSpec((None, 1, H1), lambda s: (s, 0, 0)),
                  pl.BlockSpec((None, H1, NO), lambda s: (s, 0, 0)),
                  pl.BlockSpec((None, 1, NO), lambda s: (s, 0, 0))],
        out_specs=pl.BlockSpec((None, B, NO), lambda s: (s, 0, 0)),
        compiler_params=pltpu.CompilerParams(
            dimension_semantics=("parallel",)),
    )(p2, w2, b2, pool, wf1, bf1, wf2, bf2)


def mlp_fused(x, w1, b1, w2, b2):
    """Single fused fc1+relu+fc2: x (M, K) -> (M, N)."""
    M, K = x.shape
    H = w1.shape[-1]
    N = w2.shape[-1]
    return pl.pallas_call(
        _mlp_kernel,
        out_shape=jax.ShapeDtypeStruct((M, N), jnp.float32),
        grid=(1,),
        in_specs=[pl.BlockSpec((M, K), lambda i: (0, 0)),
                  pl.BlockSpec((K, H), lambda i: (0, 0)),
                  pl.BlockSpec((1, H), lambda i: (0, 0)),
                  pl.BlockSpec((H, N), lambda i: (0, 0)),
                  pl.BlockSpec((1, N), lambda i: (0, 0))],
        out_specs=pl.BlockSpec((M, N), lambda i: (0, 0)),
    )(x, w1, b1, w2, b2)


def heads_fused(x, w1s, b1s, w2s, b2s):
    """All policy heads + value head in one kernel; grid over heads."""
    Hn, D, Hh = w1s.shape
    B = x.shape[0]
    P = w2s.shape[-1]
    return pl.pallas_call(
        _mlp_kernel,
        out_shape=jax.ShapeDtypeStruct((Hn, B, P), jnp.float32),
        grid=(Hn,),
        in_specs=[pl.BlockSpec((B, D), lambda h: (0, 0)),
                  pl.BlockSpec((None, D, Hh), lambda h: (h, 0, 0)),
                  pl.BlockSpec((None, 1, Hh), lambda h: (h, 0, 0)),
                  pl.BlockSpec((None, Hh, P), lambda h: (h, 0, 0)),
                  pl.BlockSpec((None, 1, P), lambda h: (h, 0, 0))],
        out_specs=pl.BlockSpec((None, B, P), lambda h: (h, 0, 0)),
        compiler_params=pltpu.CompilerParams(
            dimension_semantics=("parallel",),
            vmem_limit_bytes=32 * 1024 * 1024),
    )(x, w1s, b1s, w2s, b2s)


# ------------------------------- JAX glue ------------------------------------

def im2col(x, kh, kw, sh, sw):
    """x: (N, H, W, C) -> ((N*OH*OW, kh*kw*C), OH, OW)."""
    N, H, W, C = x.shape
    oh = (H - kh) // sh + 1
    ow = (W - kw) // sw + 1
    patches = []
    for i in range(kh):
        for j in range(kw):
            patches.append(x[:, i:i + sh * oh:sh, j:j + sw * ow:sw, :])
    p = jnp.stack(patches, axis=3)            # (N, oh, ow, kh*kw, C)
    return p.reshape(N * oh * ow, kh * kw * C), oh, ow


def conv_weight_flat(w):
    """PyTorch conv weight (O, C, kh, kw) -> im2col weight (kh*kw*C, O)."""
    O = w.shape[0]
    return jnp.transpose(w, (2, 3, 1, 0)).reshape(-1, O)


HEAD_PAD = 128  # lane-dense padded output width for the fused head kernel


def pack_params(params, space_names, action_names, action_dims, head_pad=HEAD_PAD):
    """Stack per-tower / per-head weights ONCE (outside the forward) and
    zero-pad head fc2 columns to a lane-dense width (sliced back afterwards)."""
    def stack_lin(names, key):
        w = jnp.stack([params[n + key][0] for n in names])
        b = jnp.stack([params[n + key][1].reshape(1, -1) for n in names])
        return w, b

    packed = {}
    packed['conv1_w'] = jnp.stack([conv_weight_flat(params[n + '_conv1'][0])
                                   for n in space_names])
    packed['conv1_b'] = jnp.stack([params[n + '_conv1'][1].reshape(1, -1)
                                   for n in space_names])
    packed['conv2_w'] = jnp.stack([conv_weight_flat(params[n + '_conv2'][0])
                                   for n in space_names])
    packed['conv2_b'] = jnp.stack([params[n + '_conv2'][1].reshape(1, -1)
                                   for n in space_names])
    packed['tower_fc1_w'], packed['tower_fc1_b'] = stack_lin(space_names, '_fc1')
    packed['tower_fc2_w'], packed['tower_fc2_b'] = stack_lin(space_names, '_fc2')

    packed['ns_fc1_w'] = params['nospace_feature_fc1'][0]
    packed['ns_fc1_b'] = params['nospace_feature_fc1'][1].reshape(1, -1)
    packed['ns_fc2_w'] = params['nospace_feature_fc2'][0]
    packed['ns_fc2_b'] = params['nospace_feature_fc2'][1].reshape(1, -1)

    head_names = [n + '_output' for n in action_names] + ['value_output']
    out_dims = list(action_dims) + [1]
    packed['head_fc1_w'] = jnp.stack([params[n + '_fc1'][0] for n in head_names])
    packed['head_fc1_b'] = jnp.stack([params[n + '_fc1'][1].reshape(1, -1)
                                      for n in head_names])
    packed['head_fc2_w'] = jnp.stack(
        [jnp.pad(params[n + '_fc2'][0], ((0, 0), (0, head_pad - d)))
         for n, d in zip(head_names, out_dims)])
    packed['head_fc2_b'] = jnp.stack(
        [jnp.pad(params[n + '_fc2'][1], (0, head_pad - d)).reshape(1, -1)
         for n, d in zip(head_names, out_dims)])
    return packed


def a2c_forward(s_batched, ns, packed, space_names, action_dims):
    """s_batched: dict name -> (B, H, W); ns: (B, n_nospace)."""
    B = ns.shape[0]
    n_spaces = len(space_names)

    # ---- K1: conv1 for all space towers (grid over towers) ----
    x = jnp.stack([s_batched[name] for name in space_names], axis=0)  # (S,B,H,W)
    H, W = x.shape[2], x.shape[3]
    p1, oh1, ow1 = im2col(x.reshape(n_spaces * B, H, W, 1), 8, 8, 4, 4)
    p1 = p1.reshape(n_spaces, B * oh1 * ow1, 8 * 8 * 1)
    y1 = conv1_all_towers(p1, packed['conv1_w'], packed['conv1_b'])   # (S,B*49,16)

    # ---- K2: conv2 + AdaptiveAvgPool2d(1) + fc1 + fc2, fused per tower ----
    y1 = y1.reshape(n_spaces * B, oh1, ow1, 16)
    p2, oh2, ow2 = im2col(y1, 4, 4, 2, 2)
    spatial = oh2 * ow2
    p2 = p2.reshape(n_spaces, B * spatial, 4 * 4 * 16)
    pool = jnp.repeat(jnp.eye(B, dtype=jnp.float32), spatial, axis=1) / spatial
    tower_feat = tower_tail_all(p2, packed['conv2_w'], packed['conv2_b'], pool,
                                packed['tower_fc1_w'], packed['tower_fc1_b'],
                                packed['tower_fc2_w'], packed['tower_fc2_b'])

    # ---- K3: nospace feature MLP (fused fc1+relu+fc2) ----
    nospace_feat = mlp_fused(ns, packed['ns_fc1_w'], packed['ns_fc1_b'],
                             packed['ns_fc2_w'], packed['ns_fc2_b'])

    all_tensor = jnp.concatenate(
        [tower_feat[i] for i in range(n_spaces)] + [nospace_feat], axis=-1)

    # ---- K4: all action heads + value head in one lane-dense kernel ----
    head_out = heads_fused(all_tensor,
                           packed['head_fc1_w'], packed['head_fc1_b'],
                           packed['head_fc2_w'], packed['head_fc2_b'])
    policys = [head_out[i, :, :d] for i, d in enumerate(action_dims)]
    values = head_out[len(action_dims), :, :1]
    return policys, values


# --------------------------- parameter creation ------------------------------

def init_params(key, space_names, n_nospace, action_dict):
    params = {}
    keys = iter(jax.random.split(key, 512))

    def nrm(shape, scale=0.05):
        return scale * jax.random.normal(next(keys), shape, dtype=jnp.float32)

    def lin(in_dim, out_dim):
        # stored as (in, out); equivalent to PyTorch Linear's x @ W.T + b
        return (nrm((in_dim, out_dim)), nrm((out_dim,)))

    for name in space_names:
        # the module also builds '_v' towers in __init__ (unused in forward)
        for nm in (name, name + '_v'):
            params[nm + '_conv1'] = (nrm((16, 1, 8, 8)), nrm((16,)))
            params[nm + '_conv2'] = (nrm((32, 16, 4, 4)), nrm((32,)))
            params[nm + '_fc1'] = lin(32, 256)
            params[nm + '_fc2'] = lin(256, 256)

    params['nospace_feature_fc1'] = lin(n_nospace, 1024)
    params['nospace_feature_fc2'] = lin(1024, 256)

    input_dim = (len(space_names) + 1) * 256
    for name, actions in action_dict.items():
        params[name + '_output_fc1'] = lin(input_dim, 1024)
        params[name + '_output_fc2'] = lin(1024, len(actions))
    params['value_output_fc1'] = lin(input_dim, 1024)
    params['value_output_fc2'] = lin(1024, 1)
    return params


# ---------------------------------- main -------------------------------------

if __name__ == "__main__":
    key = jax.random.PRNGKey(0)
    B, H, W = 2, 32, 32                     # H,W=32 -> conv1 7x7 -> conv2 2x2
    space_names = ['minimap', 'screen']
    n_nospace = 8
    action_dict = {'action_id': list(range(6)), 'args_1': list(range(4))}
    action_names = list(action_dict.keys())
    action_dims = [len(action_dict[n]) for n in action_names]

    kp, ks1, ks2, kns = jax.random.split(key, 4)
    params = init_params(kp, space_names, n_nospace, action_dict)
    packed = pack_params(params, space_names, action_names, action_dims)

    s_batched = {
        'minimap': jax.random.normal(ks1, (B, H, W), dtype=jnp.float32),
        'screen': jax.random.normal(ks2, (B, H, W), dtype=jnp.float32),
    }
    ns = jax.random.normal(kns, (B, n_nospace), dtype=jnp.float32)

    fwd = jax.jit(functools.partial(a2c_forward, space_names=space_names,
                                    action_dims=action_dims))
    policys, values = fwd(s_batched, ns, packed)
    jax.block_until_ready((policys, values))

    assert values.shape == (B, 1)
    assert policys[0].shape == (B, len(action_dict['action_id']))
    assert policys[1].shape == (B, len(action_dict['args_1']))
    assert all(p.dtype == jnp.float32 for p in policys) and values.dtype == jnp.float32
    print("KERNEL_OK")

    # TODO(synk): choose_action / loss_function (Categorical sampling, masking,
    # CE loss) are training/inference-policy utilities, not part of forward().
</pallas_src>

<mosaic_0001>
module attributes {stable_mosaic.version = 11 : i64} {
  func.func @_conv1_kernel(%arg0: i32, %arg1: memref<1x98x64xf32, #tpu.memory_space<vmem>>, %arg2: memref<1x64x16xf32, #tpu.memory_space<vmem>>, %arg3: memref<1x1x16xf32, #tpu.memory_space<vmem>>, %arg4: memref<1x98x16xf32, #tpu.memory_space<vmem>>) attributes {dimension_semantics = [#tpu.dimension_semantics<parallel>], iteration_bounds = array<i64: 2>, scalar_prefetch = 0 : i64, scratch_operands = 0 : i64, tpu.core_type = #tpu.core_type<tc>, window_params = [{transform_indices = @transform_0, window_bounds = array<i64: 1, 98, 64>}, {transform_indices = @transform_1, window_bounds = array<i64: 1, 64, 16>}, {transform_indices = @transform_2, window_bounds = array<i64: 1, 1, 16>}, {transform_indices = @transform_3, window_bounds = array<i64: 1, 98, 16>}]} {
    %c0 = arith.constant 0 : index
    %c0_0 = arith.constant 0 : index
    %c0_1 = arith.constant 0 : index
    %0 = vector.load %arg1[%c0, %c0_0, %c0_1] : memref<1x98x64xf32, #tpu.memory_space<vmem>>, vector<1x98x64xf32>
    %1 = vector.shape_cast %0 : vector<1x98x64xf32> to vector<98x64xf32>
    %c0_2 = arith.constant 0 : index
    %c0_3 = arith.constant 0 : index
    %c0_4 = arith.constant 0 : index
    %2 = vector.load %arg2[%c0_2, %c0_3, %c0_4] : memref<1x64x16xf32, #tpu.memory_space<vmem>>, vector<1x64x16xf32>
    %3 = vector.shape_cast %2 : vector<1x64x16xf32> to vector<64x16xf32>
    %cst = arith.constant dense<0.000000e+00> : vector<98x16xf32>
    %4 = tpu.matmul %1, %3, %cst {dimension_numbers = #tpu.dot_dimension_numbers<[1], [0], [0], [1], [0, 0, 1, 1], [], []>} : vector<98x64xf32>, vector<64x16xf32>, vector<98x16xf32> -> vector<98x16xf32>
    %c0_5 = arith.constant 0 : index
    %c0_6 = arith.constant 0 : index
    %c0_7 = arith.constant 0 : index
    %5 = vector.load %arg3[%c0_5, %c0_6, %c0_7] : memref<1x1x16xf32, #tpu.memory_space<vmem>>, vector<1x1x16xf32>
    %6 = vector.shape_cast %5 : vector<1x1x16xf32> to vector<1x16xf32>
    %7 = vector.broadcast %6 : vector<1x16xf32> to vector<98x16xf32>
    %8 = arith.addf %4, %7 : vector<98x16xf32>
    %cst_8 = arith.constant 0.000000e+00 : f32
    %9 = vector.broadcast %cst_8 : f32 to vector<98x16xf32>
    %10 = arith.maximumf %8, %9 : vector<98x16xf32>
    %c0_9 = arith.constant 0 : index
    %c0_10 = arith.constant 0 : index
    %c0_11 = arith.constant 0 : index
    %11 = vector.load %arg4[%c0_9, %c0_10, %c0_11] : memref<1x98x16xf32, #tpu.memory_space<vmem>>, vector<1x98x16xf32>
    %12 = vector.shape_cast %11 : vector<1x98x16xf32> to vector<98x16xf32>
    %13 = vector.shape_cast %10 : vector<98x16xf32> to vector<1x98x16xf32>
    tpu.vector_store %arg4[%c0_9, %c0_10, %c0_11], %13 {strides = array<i32>} : memref<1x98x16xf32, #tpu.memory_space<vmem>>, vector<1x98x16xf32>,
    return
  }
  func.func @transform_0(%arg0: i32) -> (i32, i32, i32) {
    %c0_i32 = arith.constant 0 : i32
    %c0_i32_0 = arith.constant 0 : i32
    %c0_i32_1 = arith.constant 0 : i32
    return %arg0, %c0_i32, %c0_i32_0 : i32, i32, i32
  }
  func.func @transform_1(%arg0: i32) -> (i32, i32, i32) {
    %c0_i32 = arith.constant 0 : i32
    %c0_i32_0 = arith.constant 0 : i32
    %c0_i32_1 = arith.constant 0 : i32
    return %arg0, %c0_i32, %c0_i32_0 : i32, i32, i32
  }
  func.func @transform_2(%arg0: i32) -> (i32, i32, i32) {
    %c0_i32 = arith.constant 0 : i32
    %c0_i32_0 = arith.constant 0 : i32
    %c0_i32_1 = arith.constant 0 : i32
    return %arg0, %c0_i32, %c0_i32_0 : i32, i32, i32
  }
  func.func @transform_3(%arg0: i32) -> (i32, i32, i32) {
    %c0_i32 = arith.constant 0 : i32
    %c0_i32_0 = arith.constant 0 : i32
    %c0_i32_1 = arith.constant 0 : i32
    return %arg0, %c0_i32, %c0_i32_0 : i32, i32, i32
  }
}

module attributes {stable_mosaic.version = 11 : i64} {
  func.func @_tower_tail_kernel(%arg0: i32, %arg1: memref<1x8x256xf32, #tpu.memory_space<vmem>>, %arg2: memref<1x256x32xf32, #tpu.memory_space<vmem>>, %arg3: memref<1x1x32xf32, #tpu.memory_space<vmem>>, %arg4: memref<2x8xf32, #tpu.memory_space<vmem>>, %arg5: memref<1x32x256xf32, #tpu.memory_space<vmem>>, %arg6: memref<1x1x256xf32, #tpu.memory_space<vmem>>, %arg7: memref<1x256x256xf32, #tpu.memory_space<vmem>>, %arg8: memref<1x1x256xf32, #tpu.memory_space<vmem>>, %arg9: memref<1x2x256xf32, #tpu.memory_space<vmem>>) attributes {dimension_semantics = [#tpu.dimension_semantics<parallel>], iteration_bounds = array<i64: 2>, scalar_prefetch = 0 : i64, scratch_operands = 0 : i64, tpu.core_type = #tpu.core_type<tc>, window_params = [{transform_indices = @transform_0, window_bounds = array<i64: 1, 8, 256>}, {transform_indices = @transform_1, window_bounds = array<i64: 1, 256, 32>}, {transform_indices = @transform_2, window_bounds = array<i64: 1, 1, 32>}, {pipeline_mode = #tpu.pipeline_mode<synchronous>, transform_indices = @transform_3, window_bounds = array<i64: 2, 8>}, {transform_indices = @transform_4, window_bounds = array<i64: 1, 32, 256>}, {transform_indices = @transform_5, window_bounds = array<i64: 1, 1, 256>}, {transform_indices = @transform_6, window_bounds = array<i64: 1, 256, 256>}, {transform_indices = @transform_7, window_bounds = array<i64: 1, 1, 256>}, {transform_indices = @transform_8, window_bounds = array<i64: 1, 2, 256>}]} {
    %c0 = arith.constant 0 : index
    %c0_0 = arith.constant 0 : index
    %c0_1 = arith.constant 0 : index
    %0 = vector.load %arg1[%c0, %c0_0, %c0_1] : memref<1x8x256xf32, #tpu.memory_space<vmem>>, vector<1x8x256xf32>
    %1 = vector.shape_cast %0 : vector<1x8x256xf32> to vector<8x256xf32>
    %c0_2 = arith.constant 0 : index
    %c0_3 = arith.constant 0 : index
    %c0_4 = arith.constant 0 : index
    %2 = vector.load %arg2[%c0_2, %c0_3, %c0_4] : memref<1x256x32xf32, #tpu.memory_space<vmem>>, vector<1x256x32xf32>
    %3 = vector.shape_cast %2 : vector<1x256x32xf32> to vector<256x32xf32>
    %cst = arith.constant dense<0.000000e+00> : vector<8x32xf32>
    %4 = tpu.matmul %1, %3, %cst {dimension_numbers = #tpu.dot_dimension_numbers<[1], [0], [0], [1], [0, 0, 1, 1], [], []>} : vector<8x256xf32>, vector<256x32xf32>, vector<8x32xf32> -> vector<8x32xf32>
    %c0_5 = arith.constant 0 : index
    %c0_6 = arith.constant 0 : index
    %c0_7 = arith.constant 0 : index
    %5 = vector.load %arg3[%c0_5, %c0_6, %c0_7] : memref<1x1x32xf32, #tpu.memory_space<vmem>>, vector<1x1x32xf32>
    %6 = vector.shape_cast %5 : vector<1x1x32xf32> to vector<1x32xf32>
    %7 = vector.broadcast %6 : vector<1x32xf32> to vector<8x32xf32>
    %8 = arith.addf %4, %7 : vector<8x32xf32>
    %cst_8 = arith.constant 0.000000e+00 : f32
    %9 = vector.broadcast %cst_8 : f32 to vector<8x32xf32>
    %10 = arith.maximumf %8, %9 : vector<8x32xf32>
    %c0_9 = arith.constant 0 : index
    %c0_10 = arith.constant 0 : index
    %11 = vector.load %arg4[%c0_9, %c0_10] : memref<2x8xf32, #tpu.memory_space<vmem>>, vector<2x8xf32>
    %cst_11 = arith.constant dense<0.000000e+00> : vector<2x32xf32>
    %12 = tpu.matmul %11, %10, %cst_11 {dimension_numbers = #tpu.dot_dimension_numbers<[1], [0], [0], [1], [0, 0, 1, 1], [], []>} : vector<2x8xf32>, vector<8x32xf32>, vector<2x32xf32> -> vector<2x32xf32>
    %c0_12 = arith.constant 0 : index
    %c0_13 = arith.constant 0 : index
    %c0_14 = arith.constant 0 : index
    %13 = vector.load %arg5[%c0_12, %c0_13, %c0_14] : memref<1x32x256xf32, #tpu.memory_space<vmem>>, vector<1x32x256xf32>
    %14 = vector.shape_cast %13 : vector<1x32x256xf32> to vector<32x256xf32>
    %cst_15 = arith.constant dense<0.000000e+00> : vector<2x256xf32>
    %15 = tpu.matmul %12, %14, %cst_15 {dimension_numbers = #tpu.dot_dimension_numbers<[1], [0], [0], [1], [0, 0, 1, 1], [], []>} : vector<2x32xf32>, vector<32x256xf32>, vector<2x256xf32> -> vector<2x256xf32>
    %c0_16 = arith.constant 0 : index
    %c0_17 = arith.constant 0 : index
    %c0_18 = arith.constant 0 : index
    %16 = vector.load %arg6[%c0_16, %c0_17, %c0_18] : memref<1x1x256xf32, #tpu.memory_space<vmem>>, vector<1x1x256xf32>
    %17 = vector.shape_cast %16 : vector<1x1x256xf32> to vector<1x256xf32>
    %18 = vector.broadcast %17 : vector<1x256xf32> to vector<2x256xf32>
    %19 = arith.addf %15, %18 : vector<2x256xf32>
    %cst_19 = arith.constant 0.000000e+00 : f32
    %20 = vector.broadcast %cst_19 : f32 to vector<2x256xf32>
    %21 = arith.maximumf %19, %20 : vector<2x256xf32>
    %c0_20 = arith.constant 0 : index
    %c0_21 = arith.constant 0 : index
    %c0_22 = arith.constant 0 : index
    %22 = vector.load %arg7[%c0_20, %c0_21, %c0_22] : memref<1x256x256xf32, #tpu.memory_space<vmem>>, vector<1x256x256xf32>
    %23 = vector.shape_cast %22 : vector<1x256x256xf32> to vector<256x256xf32>
    %cst_23 = arith.constant dense<0.000000e+00> : vector<2x256xf32>
    %24 = tpu.matmul %21, %23, %cst_23 {dimension_numbers = #tpu.dot_dimension_numbers<[1], [0], [0], [1], [0, 0, 1, 1], [], []>} : vector<2x256xf32>, vector<256x256xf32>, vector<2x256xf32> -> vector<2x256xf32>
    %c0_24 = arith.constant 0 : index
    %c0_25 = arith.constant 0 : index
    %c0_26 = arith.constant 0 : index
    %25 = vector.load %arg8[%c0_24, %c0_25, %c0_26] : memref<1x1x256xf32, #tpu.memory_space<vmem>>, vector<1x1x256xf32>
    %26 = vector.shape_cast %25 : vector<1x1x256xf32> to vector<1x256xf32>
    %27 = vector.broadcast %26 : vector<1x256xf32> to vector<2x256xf32>
    %28 = arith.addf %24, %27 : vector<2x256xf32>
    %c0_27 = arith.constant 0 : index
    %c0_28 = arith.constant 0 : index
    %c0_29 = arith.constant 0 : index
    %29 = vector.load %arg9[%c0_27, %c0_28, %c0_29] : memref<1x2x256xf32, #tpu.memory_space<vmem>>, vector<1x2x256xf32>
    %30 = vector.shape_cast %29 : vector<1x2x256xf32> to vector<2x256xf32>
    %31 = vector.shape_cast %28 : vector<2x256xf32> to vector<1x2x256xf32>
    tpu.vector_store %arg9[%c0_27, %c0_28, %c0_29], %31 {strides = array<i32>} : memref<1x2x256xf32, #tpu.memory_space<vmem>>, vector<1x2x256xf32>,
    return
  }
  func.func @transform_0(%arg0: i32) -> (i32, i32, i32) {
    %c0_i32 = arith.constant 0 : i32
    %c0_i32_0 = arith.constant 0 : i32
    %c0_i32_1 = arith.constant 0 : i32
    return %arg0, %c0_i32, %c0_i32_0 : i32, i32, i32
  }
  func.func @transform_1(%arg0: i32) -> (i32, i32, i32) {
    %c0_i32 = arith.constant 0 : i32
    %c0_i32_0 = arith.constant 0 : i32
    %c0_i32_1 = arith.constant 0 : i32
    return %arg0, %c0_i32, %c0_i32_0 : i32, i32, i32
  }
  func.func @transform_2(%arg0: i32) -> (i32, i32, i32) {
    %c0_i32 = arith.constant 0 : i32
    %c0_i32_0 = arith.constant 0 : i32
    %c0_i32_1 = arith.constant 0 : i32
    return %arg0, %c0_i32, %c0_i32_0 : i32, i32, i32
  }
  func.func @transform_3(%arg0: i32) -> (i32, i32) {
    %c0_i32 = arith.constant 0 : i32
    %c0_i32_0 = arith.constant 0 : i32
    %c0_i32_1 = arith.constant 0 : i32
    return %c0_i32, %c0_i32_0 : i32, i32
  }
  func.func @transform_4(%arg0: i32) -> (i32, i32, i32) {
    %c0_i32 = arith.constant 0 : i32
    %c0_i32_0 = arith.constant 0 : i32
    %c0_i32_1 = arith.constant 0 : i32
    return %arg0, %c0_i32, %c0_i32_0 : i32, i32, i32
  }
  func.func @transform_5(%arg0: i32) -> (i32, i32, i32) {
    %c0_i32 = arith.constant 0 : i32
    %c0_i32_0 = arith.constant 0 : i32
    %c0_i32_1 = arith.constant 0 : i32
    return %arg0, %c0_i32, %c0_i32_0 : i32, i32, i32
  }
  func.func @transform_6(%arg0: i32) -> (i32, i32, i32) {
    %c0_i32 = arith.constant 0 : i32
    %c0_i32_0 = arith.constant 0 : i32
    %c0_i32_1 = arith.constant 0 : i32
    return %arg0, %c0_i32, %c0_i32_0 : i32, i32, i32
  }
  func.func @transform_7(%arg0: i32) -> (i32, i32, i32) {
    %c0_i32 = arith.constant 0 : i32
    %c0_i32_0 = arith.constant 0 : i32
    %c0_i32_1 = arith.constant 0 : i32
    return %arg0, %c0_i32, %c0_i32_0 : i32, i32, i32
  }
  func.func @transform_8(%arg0: i32) -> (i32, i32, i32) {
    %c0_i32 = arith.constant 0 : i32
    %c0_i32_0 = arith.constant 0 : i32
    %c0_i32_1 = arith.constant 0 : i32
    return %arg0, %c0_i32, %c0_i32_0 : i32, i32, i32
  }
}

module attributes {stable_mosaic.version = 11 : i64} {
  func.func @_mlp_kernel(%arg0: i32, %arg1: memref<2x8xf32, #tpu.memory_space<vmem>>, %arg2: memref<8x1024xf32, #tpu.memory_space<vmem>>, %arg3: memref<1x1024xf32, #tpu.memory_space<vmem>>, %arg4: memref<1024x256xf32, #tpu.memory_space<vmem>>, %arg5: memref<1x256xf32, #tpu.memory_space<vmem>>, %arg6: memref<2x256xf32, #tpu.memory_space<vmem>>) attributes {dimension_semantics = [#tpu.dimension_semantics<arbitrary>], iteration_bounds = array<i64: 1>, scalar_prefetch = 0 : i64, scratch_operands = 0 : i64, tpu.core_type = #tpu.core_type<tc>, window_params = [{pipeline_mode = #tpu.pipeline_mode<synchronous>, transform_indices = @transform_0, window_bounds = array<i64: 2, 8>}, {pipeline_mode = #tpu.pipeline_mode<synchronous>, transform_indices = @transform_1, window_bounds = array<i64: 8, 1024>}, {pipeline_mode = #tpu.pipeline_mode<synchronous>, transform_indices = @transform_2, window_bounds = array<i64: 1, 1024>}, {pipeline_mode = #tpu.pipeline_mode<synchronous>, transform_indices = @transform_3, window_bounds = array<i64: 1024, 256>}, {pipeline_mode = #tpu.pipeline_mode<synchronous>, transform_indices = @transform_4, window_bounds = array<i64: 1, 256>}, {pipeline_mode = #tpu.pipeline_mode<synchronous>, transform_indices = @transform_5, window_bounds = array<i64: 2, 256>}]} {
    %c0 = arith.constant 0 : index
    %c0_0 = arith.constant 0 : index
    %0 = vector.load %arg1[%c0, %c0_0] : memref<2x8xf32, #tpu.memory_space<vmem>>, vector<2x8xf32>
    %c0_1 = arith.constant 0 : index
    %c0_2 = arith.constant 0 : index
    %1 = vector.load %arg2[%c0_1, %c0_2] : memref<8x1024xf32, #tpu.memory_space<vmem>>, vector<8x1024xf32>
    %cst = arith.constant dense<0.000000e+00> : vector<2x1024xf32>
    %2 = tpu.matmul %0, %1, %cst {dimension_numbers = #tpu.dot_dimension_numbers<[1], [0], [0], [1], [0, 0, 1, 1], [], []>} : vector<2x8xf32>, vector<8x1024xf32>, vector<2x1024xf32> -> vector<2x1024xf32>
    %c0_3 = arith.constant 0 : index
    %c0_4 = arith.constant 0 : index
    %3 = vector.load %arg3[%c0_3, %c0_4] : memref<1x1024xf32, #tpu.memory_space<vmem>>, vector<1x1024xf32>
    %4 = vector.broadcast %3 : vector<1x1024xf32> to vector<2x1024xf32>
    %5 = arith.addf %2, %4 : vector<2x1024xf32>
    %cst_5 = arith.constant 0.000000e+00 : f32
    %6 = vector.broadcast %cst_5 : f32 to vector<2x1024xf32>
    %7 = arith.maximumf %5, %6 : vector<2x1024xf32>
    %c0_6 = arith.constant 0 : index
    %c0_7 = arith.constant 0 : index
    %8 = vector.load %arg4[%c0_6, %c0_7] : memref<1024x256xf32, #tpu.memory_space<vmem>>, vector<1024x256xf32>
    %cst_8 = arith.constant dense<0.000000e+00> : vector<2x256xf32>
    %9 = tpu.matmul %7, %8, %cst_8 {dimension_numbers = #tpu.dot_dimension_numbers<[1], [0], [0], [1], [0, 0, 1, 1], [], []>} : vector<2x1024xf32>, vector<1024x256xf32>, vector<2x256xf32> -> vector<2x256xf32>
    %c0_9 = arith.constant 0 : index
    %c0_10 = arith.constant 0 : index
    %10 = vector.load %arg5[%c0_9, %c0_10] : memref<1x256xf32, #tpu.memory_space<vmem>>, vector<1x256xf32>
    %11 = vector.broadcast %10 : vector<1x256xf32> to vector<2x256xf32>
    %12 = arith.addf %9, %11 : vector<2x256xf32>
    %c0_11 = arith.constant 0 : index
    %c0_12 = arith.constant 0 : index
    %13 = vector.load %arg6[%c0_11, %c0_12] : memref<2x256xf32, #tpu.memory_space<vmem>>, vector<2x256xf32>
    tpu.vector_store %arg6[%c0_11, %c0_12], %12 {strides = array<i32>} : memref<2x256xf32, #tpu.memory_space<vmem>>, vector<2x256xf32>,
    return
  }
  func.func @transform_0(%arg0: i32) -> (i32, i32) {
    %c0_i32 = arith.constant 0 : i32
    %c0_i32_0 = arith.constant 0 : i32
    %c0_i32_1 = arith.constant 0 : i32
    return %c0_i32, %c0_i32_0 : i32, i32
  }
  func.func @transform_1(%arg0: i32) -> (i32, i32) {
    %c0_i32 = arith.constant 0 : i32
    %c0_i32_0 = arith.constant 0 : i32
    %c0_i32_1 = arith.constant 0 : i32
    return %c0_i32, %c0_i32_0 : i32, i32
  }
  func.func @transform_2(%arg0: i32) -> (i32, i32) {
    %c0_i32 = arith.constant 0 : i32
    %c0_i32_0 = arith.constant 0 : i32
    %c0_i32_1 = arith.constant 0 : i32
    return %c0_i32, %c0_i32_0 : i32, i32
  }
  func.func @transform_3(%arg0: i32) -> (i32, i32) {
    %c0_i32 = arith.constant 0 : i32
    %c0_i32_0 = arith.constant 0 : i32
    %c0_i32_1 = arith.constant 0 : i32
    return %c0_i32, %c0_i32_0 : i32, i32
  }
  func.func @transform_4(%arg0: i32) -> (i32, i32) {
    %c0_i32 = arith.constant 0 : i32
    %c0_i32_0 = arith.constant 0 : i32
    %c0_i32_1 = arith.constant 0 : i32
    return %c0_i32, %c0_i32_0 : i32, i32
  }
  func.func @transform_5(%arg0: i32) -> (i32, i32) {
    %c0_i32 = arith.constant 0 : i32
    %c0_i32_0 = arith.constant 0 : i32
    %c0_i32_1 = arith.constant 0 : i32
    return %c0_i32, %c0_i32_0 : i32, i32
  }
}

module attributes {stable_mosaic.version = 11 : i64} {
  func.func @_mlp_kernel(%arg0: i32, %arg1: memref<2x768xf32, #tpu.memory_space<vmem>>, %arg2: memref<1x768x1024xf32, #tpu.memory_space<vmem>>, %arg3: memref<1x1x1024xf32, #tpu.memory_space<vmem>>, %arg4: memref<1x1024x128xf32, #tpu.memory_space<vmem>>, %arg5: memref<1x1x128xf32, #tpu.memory_space<vmem>>, %arg6: memref<1x2x128xf32, #tpu.memory_space<vmem>>) attributes {dimension_semantics = [#tpu.dimension_semantics<parallel>], iteration_bounds = array<i64: 3>, scalar_prefetch = 0 : i64, scratch_operands = 0 : i64, tpu.core_type = #tpu.core_type<tc>, window_params = [{pipeline_mode = #tpu.pipeline_mode<synchronous>, transform_indices = @transform_0, window_bounds = array<i64: 2, 768>}, {transform_indices = @transform_1, window_bounds = array<i64: 1, 768, 1024>}, {transform_indices = @transform_2, window_bounds = array<i64: 1, 1, 1024>}, {transform_indices = @transform_3, window_bounds = array<i64: 1, 1024, 128>}, {transform_indices = @transform_4, window_bounds = array<i64: 1, 1, 128>}, {transform_indices = @transform_5, window_bounds = array<i64: 1, 2, 128>}]} {
    %c0 = arith.constant 0 : index
    %c0_0 = arith.constant 0 : index
    %0 = vector.load %arg1[%c0, %c0_0] : memref<2x768xf32, #tpu.memory_space<vmem>>, vector<2x768xf32>
    %c0_1 = arith.constant 0 : index
    %c0_2 = arith.constant 0 : index
    %c0_3 = arith.constant 0 : index
    %1 = vector.load %arg2[%c0_1, %c0_2, %c0_3] : memref<1x768x1024xf32, #tpu.memory_space<vmem>>, vector<1x768x1024xf32>
    %2 = vector.shape_cast %1 : vector<1x768x1024xf32> to vector<768x1024xf32>
    %cst = arith.constant dense<0.000000e+00> : vector<2x1024xf32>
    %3 = tpu.matmul %0, %2, %cst {dimension_numbers = #tpu.dot_dimension_numbers<[1], [0], [0], [1], [0, 0, 1, 1], [], []>} : vector<2x768xf32>, vector<768x1024xf32>, vector<2x1024xf32> -> vector<2x1024xf32>
    %c0_4 = arith.constant 0 : index
    %c0_5 = arith.constant 0 : index
    %c0_6 = arith.constant 0 : index
    %4 = vector.load %arg3[%c0_4, %c0_5, %c0_6] : memref<1x1x1024xf32, #tpu.memory_space<vmem>>, vector<1x1x1024xf32>
    %5 = vector.shape_cast %4 : vector<1x1x1024xf32> to vector<1x1024xf32>
    %6 = vector.broadcast %5 : vector<1x1024xf32> to vector<2x1024xf32>
    %7 = arith.addf %3, %6 : vector<2x1024xf32>
    %cst_7 = arith.constant 0.000000e+00 : f32
    %8 = vector.broadcast %cst_7 : f32 to vector<2x1024xf32>
    %9 = arith.maximumf %7, %8 : vector<2x1024xf32>
    %c0_8 = arith.constant 0 : index
    %c0_9 = arith.constant 0 : index
    %c0_10 = arith.constant 0 : index
    %10 = vector.load %arg4[%c0_8, %c0_9, %c0_10] : memref<1x1024x128xf32, #tpu.memory_space<vmem>>, vector<1x1024x128xf32>
    %11 = vector.shape_cast %10 : vector<1x1024x128xf32> to vector<1024x128xf32>
    %cst_11 = arith.constant dense<0.000000e+00> : vector<2x128xf32>
    %12 = tpu.matmul %9, %11, %cst_11 {dimension_numbers = #tpu.dot_dimension_numbers<[1], [0], [0], [1], [0, 0, 1, 1], [], []>} : vector<2x1024xf32>, vector<1024x128xf32>, vector<2x128xf32> -> vector<2x128xf32>
    %c0_12 = arith.constant 0 : index
    %c0_13 = arith.constant 0 : index
    %c0_14 = arith.constant 0 : index
    %13 = vector.load %arg5[%c0_12, %c0_13, %c0_14] : memref<1x1x128xf32, #tpu.memory_space<vmem>>, vector<1x1x128xf32>
    %14 = vector.shape_cast %13 : vector<1x1x128xf32> to vector<1x128xf32>
    %15 = vector.broadcast %14 : vector<1x128xf32> to vector<2x128xf32>
    %16 = arith.addf %12, %15 : vector<2x128xf32>
    %c0_15 = arith.constant 0 : index
    %c0_16 = arith.constant 0 : index
    %c0_17 = arith.constant 0 : index
    %17 = vector.load %arg6[%c0_15, %c0_16, %c0_17] : memref<1x2x128xf32, #tpu.memory_space<vmem>>, vector<1x2x128xf32>
    %18 = vector.shape_cast %17 : vector<1x2x128xf32> to vector<2x128xf32>
    %19 = vector.shape_cast %16 : vector<2x128xf32> to vector<1x2x128xf32>
    tpu.vector_store %arg6[%c0_15, %c0_16, %c0_17], %19 {strides = array<i32>} : memref<1x2x128xf32, #tpu.memory_space<vmem>>, vector<1x2x128xf32>,
    return
  }
  func.func @transform_0(%arg0: i32) -> (i32, i32) {
    %c0_i32 = arith.constant 0 : i32
    %c0_i32_0 = arith.constant 0 : i32
    %c0_i32_1 = arith.constant 0 : i32
    return %c0_i32, %c0_i32_0 : i32, i32
  }
  func.func @transform_1(%arg0: i32) -> (i32, i32, i32) {
    %c0_i32 = arith.constant 0 : i32
    %c0_i32_0 = arith.constant 0 : i32
    %c0_i32_1 = arith.constant 0 : i32
    return %arg0, %c0_i32, %c0_i32_0 : i32, i32, i32
  }
  func.func @transform_2(%arg0: i32) -> (i32, i32, i32) {
    %c0_i32 = arith.constant 0 : i32
    %c0_i32_0 = arith.constant 0 : i32
    %c0_i32_1 = arith.constant 0 : i32
    return %arg0, %c0_i32, %c0_i32_0 : i32, i32, i32
  }
  func.func @transform_3(%arg0: i32) -> (i32, i32, i32) {
    %c0_i32 = arith.constant 0 : i32
    %c0_i32_0 = arith.constant 0 : i32
    %c0_i32_1 = arith.constant 0 : i32
    return %arg0, %c0_i32, %c0_i32_0 : i32, i32, i32
  }
  func.func @transform_4(%arg0: i32) -> (i32, i32, i32) {
    %c0_i32 = arith.constant 0 : i32
    %c0_i32_0 = arith.constant 0 : i32
    %c0_i32_1 = arith.constant 0 : i32
    return %arg0, %c0_i32, %c0_i32_0 : i32, i32, i32
  }
  func.func @transform_5(%arg0: i32) -> (i32, i32, i32) {
    %c0_i32 = arith.constant 0 : i32
    %c0_i32_0 = arith.constant 0 : i32
    %c0_i32_1 = arith.constant 0 : i32
    return %arg0, %c0_i32, %c0_i32_0 : i32, i32, i32
  }
}

</mosaic_0001>

<bundles_post_ra>
// kernel: a2c_forward.4
= control target key start
LH: loop header
LB: loop body
LE: loop exit
PB: predicated region body
PF: predicated region fallthrough
CT: control target
= control target key end

     0   :  { %s672_s12 = smov 0   ;;  %s800_s0 = inlined_call_operand.vmem [shape: f32[2,98,64], index: 0, kind: input, shape index: {}]   ;;  %s801_s1 = inlined_call_operand.vmem [shape: f32[2,64,16], index: 1, kind: input, shape index: {}]   ;;  %s802_s2 = inlined_call_operand.vmem [shape: f32[2,1,16], index: 2, kind: input, shape index: {}]   ;;  %s803_s3 = inlined_call_operand.vmem [shape: f32[2,98,16], index: 3, kind: output, shape index: {}]  }
   0x1 LB: > { %s507_s13 = sadd.s32 4294967295, %s647_s12   ;;  %p511_p0 = scmp.ge.s32.totalorder %s647_s12, 1  ;;  %s647_s12 = sphi %s672_s12, %s13_s12  }
   0x2   : > { %p155_p1 = scmp.lt.s32.totalorder %s647_s12, 3 }
   0x4   : > { %p156_p2 = pnand %p511_p0, %p155_p1 }
   0x5   : > { %p187_p3 = scmp.lt.s32.totalorder (!%p156_p2), %s507_s13, 1  ;;  %v649_v0 = vmov (!%p156_p2), 0.0|0.0   ;;  %vm650_vm0 = vmmov (!%p156_p2), 0   ;;  %v651_v1 = vmov (!%p156_p2), 0.0   ;;  %vm233_vm1 = vcmask (!%p156_p2), 523264  }
   0x6   : > { %159 = sbr.rel (%p156_p2) target bundleno = 275 (0x113), region = 32  ;;  %609 = vmatprep.subr.bf16.mxu0 (!%p156_p2), %v649_v0  ;;  %621 = vmatprep.subr.bf16.mxu1 (!%p156_p2), %v649_v0  ;;  %vm416_vm2 = vcmask (!%p156_p2), 130048   ;;  %vm429_vm3 = vcmask (!%p156_p2), 123904  }
   0x7   : > { %570 = vmatprep.mubr.msk.f32.mxu0 (!%p156_p2), %vm650_vm0, %v651_v1  ;;  %591 = vmatprep.mubr.msk.f32.mxu1 (!%p156_p2), %vm650_vm0, %v651_v1 }
   0xd   : > { %s805_s13 = smov (!%p187_p3, %s507_s13), 1 }
   0xe   : > { %s532_s14 = sshll.u32 %s805_s13, 6  ;;  %s629_s18 = smul.u32 104, %s805_s13 }
   0xf   : > { %s196_s17 = scalar_lea.vmem %s801_s1, %s532_s14  ;;  %s199_s24 = scalar_lea.vmem %s802_s2, %s805_s13 }
  0x10   : > { %v218_v2 = vld [vmem:[%s196_s17] sm:$0xff]  ;;  %v219_v3 = vld [vmem:[%s196_s17 + $0x8] sm:$0xff]  ;;  %v220_v5 = vld [vmem:[%s196_s17 + $0x10] sm:$0xff]  ;;  %s696_s21 = scalar_lea.vmem %s800_s0, %s629_s18  ;;  %s759_s27 = scalar_lea.vmem %s803_s3, %s629_s18 }
  0x11   : > { %v610_v4 = vpack.c.bf16 %v219_v3, %v218_v2  ;;  %v221_v6 = vld [vmem:[%s196_s17 + $0x18] sm:$0xff]  ;;  %v222_v8 = vld [vmem:[%s196_s17 + $0x20] sm:$0xff]  ;;  %v223_v9 = vld [vmem:[%s196_s17 + $0x28] sm:$0xff] }
  0x12   : > { %v613_v7 = vpack.c.bf16 %v221_v6, %v220_v5  ;;  %v616_v10 = vpack.c.bf16 %v223_v9, %v222_v8  ;;  %v224_v11 = vld [vmem:[%s196_s17 + $0x30] sm:$0xff]  ;;  %v225_v12 = vld [vmem:[%s196_s17 + $0x38] sm:$0xff]  ;;  %v205_v14 = vld [vmem:[%s696_s21] sm:$0xff] }
  0x13   : > { %611 = vmatpush3.bf16.msra.mxu0 %v610_v4  ;;  %625 = vmatpush3.bf16.msra.mxu1 %v610_v4  ;;  %v619_v13 = vpack.c.bf16 %v225_v12, %v224_v11  ;;  %v212_v15 = vld [vmem:[%s696_s21 + $0x38] sm:$0xff]  ;;  %v206_v16 = vld [vmem:[%s696_s21 + $0x8] sm:$0xff]  ;;  %v213_v17 = vld [vmem:[%s696_s21 + $0x40] sm:$0xff] }
  0x14   : > { %612 = vmatprep.subr.bf16.mxu0 %v649_v0  ;;  %622 = vmatprep.subr.bf16.mxu1 %v649_v0  ;;  %v207_v18 = vld [vmem:[%s696_s21 + $0x10] sm:$0xff]  ;;  %v214_v19 = vld [vmem:[%s696_s21 + $0x48] sm:$0xff]  ;;  %v208_v20 = vld [vmem:[%s696_s21 + $0x18] sm:$0xff] }
  0x15   : > { %v215_v21 = vld [vmem:[%s696_s21 + $0x50] sm:$0xff]  ;;  %v209_v22 = vld [vmem:[%s696_s21 + $0x20] sm:$0xff]  ;;  %v216_v23 = vld [vmem:[%s696_s21 + $0x58] sm:$0xff] }
  0x16   : > { %v210_v24 = vld [vmem:[%s696_s21 + $0x28] sm:$0xff]  ;;  %v217_v25 = vld [vmem:[%s696_s21 + $0x60] sm:$0x3]  ;;  %v211_v26 = vld [vmem:[%s696_s21 + $0x30] sm:$0xff] }
  0x17   : > { %614 = vmatpush3.bf16.msra.mxu0 %v613_v7  ;;  %626 = vmatpush3.bf16.msra.mxu1 %v613_v7  ;;  %v750_v27 = vld [vmem:[%s199_s24] ss:$0 sm:$0xff] }
  0x18   : > { %615 = vmatprep.subr.bf16.mxu0 %v649_v0  ;;  %623 = vmatprep.subr.bf16.mxu1 %v649_v0 }
  0x1b   : > { %617 = vmatpush3.bf16.msra.mxu0 %v616_v10  ;;  %627 = vmatpush3.bf16.msra.mxu1 %v616_v10 }
  0x1c   : > { %618 = vmatprep.subr.bf16.mxu0 %v649_v0  ;;  %624 = vmatprep.subr.bf16.mxu1 %v649_v0 }
  0x1f   : > { %620 = vmatpush3.bf16.msra.mxu0 %v619_v13  ;;  %628 = vmatpush3.bf16.msra.mxu1 %v619_v13 }
  0x22   : > { %571 = vmatmul.mubr.msk.f32.vlgmr.msra.gmra.mrb[0].mxu0 %vm233_vm1, %v205_v14  ;;  %592 = vmatmul.mubr.msk.f32.vlgmr.msra.gmra.mrb[0].mxu1 %vm233_vm1, %v212_v15 }
  0x23   : > { %573 = vmatprep.mubr.msk.f32.mxu0 %vm650_vm0, %v651_v1  ;;  %594 = vmatprep.mubr.msk.f32.mxu1 %vm650_vm0, %v651_v1 }
  0x26   : > { %574 = vmatmul.mubr.msk.f32.gmra.mrb[2].mxu0 %vm233_vm1, %v206_v16  ;;  %595 = vmatmul.mubr.msk.f32.gmra.mrb[2].mxu1 %vm233_vm1, %v213_v17 }
  0x27   : > { %576 = vmatprep.mubr.msk.f32.mxu0 %vm650_vm0, %v651_v1  ;;  %597 = vmatprep.mubr.msk.f32.mxu1 %vm650_vm0, %v651_v1 }
  0x2a   : > { %577 = vmatmul.mubr.msk.f32.gmra.mrb[4].mxu0 %vm233_vm1, %v207_v18  ;;  %598 = vmatmul.mubr.msk.f32.gmra.mrb[4].mxu1 %vm233_vm1, %v214_v19 }
  0x2b   : > { %579 = vmatprep.mubr.msk.f32.mxu0 %vm650_vm0, %v651_v1  ;;  %600 = vmatprep.mubr.msk.f32.mxu1 %vm650_vm0, %v651_v1 }
  0x2e   : > { %580 = vmatmul.mubr.msk.f32.gmra.mrb[6].mxu0 %vm233_vm1, %v208_v20  ;;  %601 = vmatmul.mubr.msk.f32.gmra.mrb[6].mxu1 %vm233_vm1, %v215_v21 }
  0x2f   : > { %582 = vmatprep.mubr.msk.f32.mxu0 %vm650_vm0, %v651_v1  ;;  %603 = vmatprep.mubr.msk.f32.mxu1 %vm650_vm0, %v651_v1 }
  0x32   : > { %583 = vmatmul.mubr.msk.f32.gmra.mrb[8].mxu0 %vm233_vm1, %v209_v22  ;;  %604 = vmatmul.mubr.msk.f32.gmra.mrb[8].mxu1 %vm233_vm1, %v216_v23 }
  0x33   : > { %585 = vmatprep.mubr.msk.f32.mxu0 %vm650_vm0, %v651_v1  ;;  %606 = vmatprep.mubr.msk.f32.mxu1 %vm650_vm0, %v651_v1 }
  0x36   : > { %586 = vmatmul.mubr.msk.f32.gmra.mrb[10].mxu0 %vm233_vm1, %v210_v24  ;;  %607 = vmatmul.mubr.msk.f32.gmra.mrb[10].mxu1 %vm233_vm1, %v217_v25 }
  0x37   : > { %588 = vmatprep.mubr.msk.f32.mxu0 %vm650_vm0, %v651_v1 }
  0x3a   : > { %589 = vmatmul.mubr.msk.f32.gmra.mrb[12].mxu0 %vm233_vm1, %v211_v26 }
  0xf5   : > { %v339_v28 = vpop.f32.mrb[0].mxu0  ;;  %v374_v29 = vpop.f32.mrb[0].mxu1 }
  0xf6   : > { %v340_v30 = vadd.f32 %v750_v27, %v339_v28  ;;  %v572_v31 = vpop.f32.mrb[1].mxu0  ;;  %v375_v32 = vadd.f32 %v750_v27, %v374_v29  ;;  %v593_v33 = vpop.f32.mrb[1].mxu1 }
  0xf8   : > { %v403_v34 = vmax.f32 %v340_v30, 0.0  ;;  %v410_v35 = vmax.f32 %v375_v32, 0.0 }
  0xf9   : > { %v344_v36 = vpop.f32.mrb[2].mxu0  ;;  %v379_v37 = vpop.f32.mrb[2].mxu1 }
  0xfa   : > { %417 = vst.msk [vmem:[%s759_s27] sm:$0xff] %vm416_vm2, %v403_v34  ;;  %424 = vst.msk [vmem:[%s759_s27 + $0x38] sm:$0xff] %vm416_vm2, %v410_v35  ;;  %v345_v38 = vadd.f32 %v750_v27, %v344_v36  ;;  %v575_v39 = vpop.f32.mrb[3].mxu0  ;;  %v380_v40 = vadd.f32 %v750_v27, %v379_v37  ;;  %v596_v41 = vpop.f32.mrb[3].mxu1 }
  0xfc   : > { %v404_v42 = vmax.f32 %v345_v38, 0.0  ;;  %v411_v43 = vmax.f32 %v380_v40, 0.0 }
  0xfd   : > { %v349_v44 = vpop.f32.mrb[4].mxu0  ;;  %v384_v45 = vpop.f32.mrb[4].mxu1 }
  0xfe   : > { %418 = vst.msk [vmem:[%s759_s27 + $0x8] sm:$0xff] %vm416_vm2, %v404_v42  ;;  %425 = vst.msk [vmem:[%s759_s27 + $0x40] sm:$0xff] %vm416_vm2, %v411_v43  ;;  %v350_v46 = vadd.f32 %v750_v27, %v349_v44  ;;  %v578_v47 = vpop.f32.mrb[5].mxu0  ;;  %v385_v48 = vadd.f32 %v750_v27, %v384_v45  ;;  %v599_v49 = vpop.f32.mrb[5].mxu1 }
 0x100   : > { %v405_v50 = vmax.f32 %v350_v46, 0.0  ;;  %v412_v51 = vmax.f32 %v385_v48, 0.0 }
 0x101   : > { %v354_v52 = vpop.f32.mrb[6].mxu0  ;;  %v389_v53 = vpop.f32.mrb[6].mxu1 }
 0x102   : > { %419 = vst.msk [vmem:[%s759_s27 + $0x10] sm:$0xff] %vm416_vm2, %v405_v50  ;;  %426 = vst.msk [vmem:[%s759_s27 + $0x48] sm:$0xff] %vm416_vm2, %v412_v51  ;;  %v355_v54 = vadd.f32 %v750_v27, %v354_v52  ;;  %v581_v55 = vpop.f32.mrb[7].mxu0  ;;  %v390_v56 = vadd.f32 %v750_v27, %v389_v53  ;;  %v602_v57 = vpop.f32.mrb[7].mxu1 }
 0x104   : > { %v406_v58 = vmax.f32 %v355_v54, 0.0  ;;  %v413_v59 = vmax.f32 %v390_v56, 0.0 }
 0x105   : > { %v359_v60 = vpop.f32.mrb[8].mxu0  ;;  %v394_v61 = vpop.f32.mrb[8].mxu1 }
 0x106   : > { %420 = vst.msk [vmem:[%s759_s27 + $0x18] sm:$0xff] %vm416_vm2, %v406_v58  ;;  %427 = vst.msk [vmem:[%s759_s27 + $0x50] sm:$0xff] %vm416_vm2, %v413_v59  ;;  %v360_v62 = vadd.f32 %v750_v27, %v359_v60  ;;  %v584_v63 = vpop.f32.mrb[9].mxu0  ;;  %v395_v0 = vadd.f32 %v750_v27, %v394_v61  ;;  %v605_v1 = vpop.f32.mrb[9].mxu1 }
 0x108   : > { %v407_v2 = vmax.f32 %v360_v62, 0.0  ;;  %v414_v3 = vmax.f32 %v395_v0, 0.0 }
 0x109   : > { %v364_v4 = vpop.f32.mrb[10].mxu0  ;;  %v399_v5 = vpop.f32.mrb[10].mxu1 }
 0x10a   : > { %421 = vst.msk [vmem:[%s759_s27 + $0x20] sm:$0xff] %vm416_vm2, %v407_v2  ;;  %428 = vst.msk [vmem:[%s759_s27 + $0x58] sm:$0xff] %vm416_vm2, %v414_v3  ;;  %v365_v6 = vadd.f32 %v750_v27, %v364_v4  ;;  %v587_v7 = vpop.f32.mrb[11].mxu0  ;;  %v400_v8 = vadd.f32 %v750_v27, %v399_v5  ;;  %v608_v9 = vpop.f32.mrb[11].mxu1 }
 0x10c   : > { %v408_v10 = vmax.f32 %v365_v6, 0.0  ;;  %v415_v11 = vmax.f32 %v400_v8, 0.0 }
 0x10d   : > { %v369_v12 = vpop.f32.mrb[12].mxu0 }
 0x10e   : > { %422 = vst.msk [vmem:[%s759_s27 + $0x28] sm:$0xff] %vm416_vm2, %v408_v10  ;;  %v370_v13 = vadd.f32 %v750_v27, %v369_v12  ;;  %v590_v14 = vpop.f32.mrb[13].mxu0 }
 0x10f   : > { %430 = vst.msk [vmem:[%s759_s27 + $0x60] sm:$0x3] %vm429_vm3, %v415_v11 }
 0x110   : > { %v409_v15 = vmax.f32 %v370_v13, 0.0 }
 0x112   : > { %423 = vst.msk [vmem:[%s759_s27 + $0x30] sm:$0xff] %vm416_vm2, %v409_v15 }
 0x113 PF: > { %s13_s12 = sadd.s32 1, %s647_s12  }
 0x114   : > { %p10_p4 = scmp.ge.s32.totalorder %s13_s12, 4  }
 0x116   :  { %12 = sbr.rel (!%p10_p4) target bundleno = 1 (0x1), region = 68 }

// kernel: a2c_forward.5
= control target key start
LH: loop header
LB: loop body
LE: loop exit
PB: predicated region body
PF: predicated region fallthrough
CT: control target
= control target key end

     0   :  { %s1220_s27 = smov 0   ;;  %s1371_s0 = inlined_call_operand.vmem [shape: f32[2,8,256], index: 0, kind: input, shape index: {}]   ;;  %s1372_s1 = inlined_call_operand.vmem [shape: f32[2,256,32], index: 1, kind: input, shape index: {}]   ;;  %s1373_s2 = inlined_call_operand.vmem [shape: f32[2,1,32], index: 2, kind: input, shape index: {}]   ;;  %s1374_s3 = inlined_call_operand.vmem [shape: f32[2,8], index: 3, kind: input, shape index: {}]   ;;  %s1375_s4 = inlined_call_operand.vmem [shape: f32[2,32,256], index: 4, kind: input, shape index: {}]   ;;  %s1376_s5 = inlined_call_operand.vmem [shape: f32[2,1,256], index: 5, kind: input, shape index: {}]   ;;  %s1377_s6 = inlined_call_operand.vmem [shape: f32[2,256,256], index: 6, kind: input, shape index: {}]   ;;  %s1378_s7 = inlined_call_operand.vmem [shape: f32[2,1,256], index: 7, kind: input, shape index: {}]   ;;  %s1379_s8 = inlined_call_operand.vmem [shape: f32[2,2,256], index: 8, kind: output, shape index: {}]  }
   0x1 LB: > { %s981_s28 = sadd.s32 4294967295, %s1171_s27   ;;  %p985_p0 = scmp.ge.s32.totalorder %s1171_s27, 1  ;;  %s1171_s27 = sphi %s1220_s27, %s18_s27  }
   0x2   : > { %p318_p1 = scmp.lt.s32.totalorder %s1171_s27, 3 }
   0x4   : > { %p319_p2 = pnand %p985_p0, %p318_p1 }
   0x5   : > { %p378_p3 = scmp.lt.s32.totalorder (!%p319_p2), %s981_s28, 1  ;;  %v1173_v50 = vmov (!%p319_p2), 0.0   ;;  %vm1174_vm0 = vmmov (!%p319_p2), 0   ;;  %vm527_vm1 = vcmask (!%p319_p2), 64512   ;;  %vm621_vm2 = vcmask (!%p319_p2), 261120  }
   0x6   : > { %322 = sbr.rel (%p319_p2) target bundleno = 919 (0x397), region = 52 }
   0xd   : > { %s1381_s28 = smov (!%p378_p3, %s981_s28), 1 }
   0xe   : > { %s1005_s29 = sshll.u32 %s1381_s28, 8  ;;  %s1004_s11 = sshll.u32 %s1381_s28, 4 }
   0xf   : > { %s1234_s10 = scalar_lea.vmem %s1372_s1, %s1005_s29  ;;  %s1254_s14 = scalar_lea.vmem %s1371_s0, %s1004_s11 }
  0x10   : > { %v432_v0 = vld [vmem:[%s1234_s10 + $0x80] sm:$0xff]  ;;  %v433_v1 = vld [vmem:[%s1234_s10 + $0x88] sm:$0xff]  ;;  %v434_v5 = vld [vmem:[%s1234_s10 + $0x90] sm:$0xff]  ;;  %s1006_s15 = sshll.u32 %s1381_s28, 6  ;;  %s390_s18 = scalar_lea.vmem %s1373_s2, %s1381_s28 }
  0x11   : > { %v416_v2 = vld [vmem:[%s1234_s10] sm:$0xff]  ;;  %v1051_v3 = vpack.c.bf16 %v433_v1, %v432_v0  ;;  %v417_v4 = vld [vmem:[%s1234_s10 + $0x8] sm:$0xff]  ;;  %v435_v6 = vld [vmem:[%s1234_s10 + $0x98] sm:$0xff]  ;;  %s395_s21 = scalar_lea.vmem %s1375_s4, %s1006_s15  ;;  %s1007_s24 = sshll.u32 %s1381_s28, 9 }
  0x12   : > { %v1053_v7 = vpack.c.bf16 %v417_v4, %v416_v2  ;;  %v1055_v8 = vpack.c.bf16 %v435_v6, %v434_v5  ;;  %v418_v9 = vld [vmem:[%s1234_s10 + $0x10] sm:$0xff]  ;;  %v419_v10 = vld [vmem:[%s1234_s10 + $0x18] sm:$0xff]  ;;  %v436_v11 = vld [vmem:[%s1234_s10 + $0xa0] sm:$0xff]  ;;  %s1291_s29 = scalar_lea.vmem %s1377_s6, %s1007_s24  ;;  %s992_s30 = sshll.u32 %s1381_s28, 1 }
  0x13   : > { %1052 = vmatprep.subr.bf16.mxu0 %v1051_v3  ;;  %v437_v12 = vld [vmem:[%s1234_s10 + $0xa8] sm:$0xff]  ;;  %v1057_v13 = vpack.c.bf16 %v419_v10, %v418_v9  ;;  %v420_v15 = vld [vmem:[%s1234_s10 + $0x20] sm:$0xff]  ;;  %v438_v17 = vld [vmem:[%s1234_s10 + $0xb0] sm:$0xff]  ;;  %s399_s11 = scalar_lea.vmem %s1376_s5, %s992_s30  ;;  %s1008_s15 = sshll.u32 %s1381_s28, 2 }
  0x14   : > { %1054 = vmatpush3.bf16.msra.mxu0 %v1053_v7  ;;  %v1059_v14 = vpack.c.bf16 %v437_v12, %v436_v11  ;;  %v421_v16 = vld [vmem:[%s1234_s10 + $0x28] sm:$0xff]  ;;  %v439_v18 = vld [vmem:[%s1234_s10 + $0xb8] sm:$0xff]  ;;  %v422_v21 = vld [vmem:[%s1234_s10 + $0x30] sm:$0xff] }
  0x15   : > { %1056 = vmatprep.subr.bf16.mxu0 %v1055_v8  ;;  %v1061_v19 = vpack.c.bf16 %v421_v16, %v420_v15  ;;  %v1063_v20 = vpack.c.bf16 %v439_v18, %v438_v17  ;;  %v423_v22 = vld [vmem:[%s1234_s10 + $0x38] sm:$0xff]  ;;  %v440_v23 = vld [vmem:[%s1234_s10 + $0xc0] sm:$0xff]  ;;  %v441_v24 = vld [vmem:[%s1234_s10 + $0xc8] sm:$0xff] }
  0x16   : > { %v415_v25 = vld [vmem:[%s1254_s14 + $0x8] sm:$0xff]  ;;  %v1065_v26 = vpack.c.bf16 %v423_v22, %v422_v21  ;;  %v1067_v27 = vpack.c.bf16 %v441_v24, %v440_v23  ;;  %v424_v28 = vld [vmem:[%s1234_s10 + $0x40] sm:$0xff]  ;;  %v442_v30 = vld [vmem:[%s1234_s10 + $0xd0] sm:$0xff] }
  0x17   : > { %519 = vmatprep.mubr.f32.mxu0 %v415_v25  ;;  %v425_v29 = vld [vmem:[%s1234_s10 + $0x48] sm:$0xff]  ;;  %v443_v31 = vld [vmem:[%s1234_s10 + $0xd8] sm:$0xff]  ;;  %v426_v34 = vld [vmem:[%s1234_s10 + $0x50] sm:$0xff] }
  0x18   : > { %1058 = vmatpush3.bf16.msra.mxu0 %v1057_v13  ;;  %v1069_v32 = vpack.c.bf16 %v425_v29, %v424_v28  ;;  %v1071_v33 = vpack.c.bf16 %v443_v31, %v442_v30  ;;  %v427_v35 = vld [vmem:[%s1234_s10 + $0x58] sm:$0xff]  ;;  %v444_v36 = vld [vmem:[%s1234_s10 + $0xe0] sm:$0xff]  ;;  %v445_v37 = vld [vmem:[%s1234_s10 + $0xe8] sm:$0xff] }
  0x19   : > { %1060 = vmatprep.subr.bf16.mxu0 %v1059_v14  ;;  %v1073_v38 = vpack.c.bf16 %v427_v35, %v426_v34  ;;  %v1075_v39 = vpack.c.bf16 %v445_v37, %v444_v36  ;;  %v428_v40 = vld [vmem:[%s1234_s10 + $0x60] sm:$0xff]  ;;  %v429_v41 = vld [vmem:[%s1234_s10 + $0x68] sm:$0xff]  ;;  %v446_v42 = vld [vmem:[%s1234_s10 + $0xf0] sm:$0xff] }
  0x1a   : > { %v447_v43 = vld [vmem:[%s1234_s10 + $0xf8] sm:$0xff]  ;;  %v1077_v44 = vpack.c.bf16 %v429_v41, %v428_v40  ;;  %v430_v46 = vld [vmem:[%s1234_s10 + $0x70] sm:$0xff]  ;;  %v414_v49 = vld [vmem:[%s1254_s14] sm:$0xff]  ;;  %s408_s14 = scalar_lea.vmem %s1378_s7, %s992_s30 }
  0x1b   : > { %v1079_v45 = vpack.c.bf16 %v447_v43, %v446_v42  ;;  %v431_v47 = vld [vmem:[%s1234_s10 + $0x78] sm:$0xff]  ;;  %v998_v52 = vld [vmem:[%s390_s18] ss:$0 sm:$0xff]  ;;  %v602_v55 = vld [vmem:[%s395_s21 + $0x8] sm:$0xff]  ;;  %s413_s18 = scalar_lea.vmem %s1379_s8, %s1008_s15 }
  0x1c   : > { %1062 = vmatpush3.bf16.msra.mxu0 %v1061_v19  ;;  %v1081_v48 = vpack.c.bf16 %v431_v47, %v430_v46  ;;  %v604_v56 = vld [vmem:[%s395_s21 + $0x18] sm:$0xff]  ;;  %v601_v57 = vld [vmem:[%s395_s21] sm:$0xff]  ;;  %v603_v58 = vld [vmem:[%s395_s21 + $0x10] sm:$0xff] }
  0x1d   : > { %1064 = vmatprep.subr.bf16.mxu0 %v1063_v20  ;;  %v606_v60 = vld [vmem:[%s395_s21 + $0x28] sm:$0xff]  ;;  %v608_v61 = vld [vmem:[%s395_s21 + $0x38] sm:$0xff]  ;;  %v1083_v62 = vpack.c.bf16 %v604_v56, %v602_v55  ;;  %v526_v0 = vld [vmem:[%s1374_s3] sm:$0x3]  ;;  %v1085_v1 = vpack.c.bf16 %v603_v58, %v601_v57 }
  0x1e   : > { %v1087_v2 = vpack.c.bf16 %v608_v61, %v606_v60  ;;  %v605_v3 = vld [vmem:[%s395_s21 + $0x20] sm:$0xff]  ;;  %v607_v4 = vld [vmem:[%s395_s21 + $0x30] sm:$0xff]  ;;  %v699_v6 = vld [vmem:[%s1291_s29 + $0x8] sm:$0xff] }
  0x1f   : > { %v1089_v5 = vpack.c.bf16 %v607_v4, %v605_v3  ;;  %v701_v7 = vld [vmem:[%s1291_s29 + $0x18] sm:$0xff]  ;;  %v698_v8 = vld [vmem:[%s1291_s29] sm:$0xff]  ;;  %v700_v10 = vld [vmem:[%s1291_s29 + $0x10] sm:$0xff] }
  0x20   : > { %1066 = vmatpush3.bf16.msra.mxu0 %v1065_v26  ;;  %v1091_v9 = vpack.c.bf16 %v701_v7, %v699_v6  ;;  %v703_v11 = vld [vmem:[%s1291_s29 + $0x28] sm:$0xff]  ;;  %v705_v12 = vld [vmem:[%s1291_s29 + $0x38] sm:$0xff]  ;;  %v1093_v13 = vpack.c.bf16 %v700_v10, %v698_v8  ;;  %v702_v15 = vld [vmem:[%s1291_s29 + $0x20] sm:$0xff] }
  0x21   : > { %1068 = vmatprep.subr.bf16.mxu0 %v1067_v27  ;;  %v1095_v14 = vpack.c.bf16 %v705_v12, %v703_v11  ;;  %v704_v16 = vld [vmem:[%s1291_s29 + $0x30] sm:$0xff]  ;;  %v707_v17 = vld [vmem:[%s1291_s29 + $0x48] sm:$0xff]  ;;  %v709_v18 = vld [vmem:[%s1291_s29 + $0x58] sm:$0xff] }
  0x22   : > { %1092 = vmatprep.subr.bf16.mxu1 %v1091_v9  ;;  %v1097_v19 = vpack.c.bf16 %v704_v16, %v702_v15  ;;  %v1099_v20 = vpack.c.bf16 %v709_v18, %v707_v17  ;;  %v706_v21 = vld [vmem:[%s1291_s29 + $0x40] sm:$0xff]  ;;  %v708_v22 = vld [vmem:[%s1291_s29 + $0x50] sm:$0xff]  ;;  %v711_v23 = vld [vmem:[%s1291_s29 + $0x68] sm:$0xff] }
  0x23   : > { %1094 = vmatpush1.bf16.msra.mxu1 %v1093_v13  ;;  %v713_v24 = vld [vmem:[%s1291_s29 + $0x78] sm:$0xff]  ;;  %v1101_v25 = vpack.c.bf16 %v708_v22, %v706_v21  ;;  %v710_v27 = vld [vmem:[%s1291_s29 + $0x60] sm:$0xff]  ;;  %v712_v28 = vld [vmem:[%s1291_s29 + $0x70] sm:$0xff] }
  0x24   : > { %1070 = vmatpush3.bf16.msra.mxu0 %v1069_v32  ;;  %1096 = vmatprep.subr.bf16.mxu1 %v1095_v14  ;;  %v1103_v26 = vpack.c.bf16 %v713_v24, %v711_v23  ;;  %v715_v29 = vld [vmem:[%s1291_s29 + $0x88] sm:$0xff]  ;;  %v717_v30 = vld [vmem:[%s1291_s29 + $0x98] sm:$0xff]  ;;  %v1105_v31 = vpack.c.bf16 %v712_v28, %v710_v27  ;;  %v716_v34 = vld [vmem:[%s1291_s29 + $0x90] sm:$0xff] }
  0x25   : > { %1072 = vmatprep.subr.bf16.mxu0 %v1071_v33  ;;  %v1107_v32 = vpack.c.bf16 %v717_v30, %v715_v29  ;;  %v714_v33 = vld [vmem:[%s1291_s29 + $0x80] sm:$0xff]  ;;  %v719_v35 = vld [vmem:[%s1291_s29 + $0xa8] sm:$0xff]  ;;  %v721_v36 = vld [vmem:[%s1291_s29 + $0xb8] sm:$0xff] }
  0x26   : > { %v1109_v37 = vpack.c.bf16 %v716_v34, %v714_v33  ;;  %v720_v40 = vld [vmem:[%s1291_s29 + $0xb0] sm:$0xff]  ;;  %v723_v41 = vld [vmem:[%s1291_s29 + $0xc8] sm:$0xff]  ;;  %v725_v42 = vld [vmem:[%s1291_s29 + $0xd8] sm:$0xff] }
  0x27   : > { %1098 = vmatpush1.bf16.msra.mxu1 %v1097_v19  ;;  %v724_v46 = vld [vmem:[%s1291_s29 + $0xd0] sm:$0xff]  ;;  %v727_v47 = vld [vmem:[%s1291_s29 + $0xe8] sm:$0xff]  ;;  %v730_v57 = vld [vmem:[%s1291_s29 + $0x100] sm:$0xff] }
  0x28   : > { %1074 = vmatpush3.bf16.msra.mxu0 %v1073_v38  ;;  %1100 = vmatprep.subr.bf16.mxu1 %v1099_v20  ;;  %v1111_v38 = vpack.c.bf16 %v721_v36, %v719_v35  ;;  %v732_v58 = vld [vmem:[%s1291_s29 + $0x110] sm:$0xff]  ;;  %v737_v60 = vld [vmem:[%s1291_s29 + $0x138] sm:$0xff]  ;;  %v743_v7 = vld [vmem:[%s1291_s29 + $0x168] sm:$0xff] }
  0x29   : > { %1076 = vmatprep.subr.bf16.mxu0 %v1075_v39  ;;  %v718_v39 = vld [vmem:[%s1291_s29 + $0xa0] sm:$0xff]  ;;  %v1125_v61 = vpack.c.bf16 %v732_v58, %v730_v57  ;;  %v740_v6 = vld [vmem:[%s1291_s29 + $0x150] sm:$0xff]  ;;  %v745_v8 = vld [vmem:[%s1291_s29 + $0x178] sm:$0xff] }
  0x2a   : > { %v1113_v43 = vpack.c.bf16 %v720_v40, %v718_v39  ;;  %v1135_v10 = vpack.c.bf16 %v745_v8, %v743_v7  ;;  %v742_v11 = vld [vmem:[%s1291_s29 + $0x160] sm:$0xff]  ;;  %v744_v12 = vld [vmem:[%s1291_s29 + $0x170] sm:$0xff]  ;;  %v747_v13 = vld [vmem:[%s1291_s29 + $0x188] sm:$0xff]  ;;  %v611_v40 = vlaneseq }
  0x2b   : > { %1102 = vmatpush1.bf16.msra.mxu1 %v1101_v25  ;;  %v749_v14 = vld [vmem:[%s1291_s29 + $0x198] sm:$0xff]  ;;  %v1137_v15 = vpack.c.bf16 %v744_v12, %v742_v11  ;;  %v746_v17 = vld [vmem:[%s1291_s29 + $0x180] sm:$0xff]  ;;  %v748_v18 = vld [vmem:[%s1291_s29 + $0x190] sm:$0xff] }
  0x2c   : > { %1078 = vmatpush3.bf16.msra.mxu0 %v1077_v44  ;;  %1104 = vmatprep.subr.bf16.mxu1 %v1103_v26  ;;  %v1115_v44 = vpack.c.bf16 %v725_v42, %v723_v41  ;;  %v1139_v16 = vpack.c.bf16 %v749_v14, %v747_v13  ;;  %v751_v19 = vld [vmem:[%s1291_s29 + $0x1a8] sm:$0xff]  ;;  %v753_v20 = vld [vmem:[%s1291_s29 + $0x1b8] sm:$0xff]  ;;  %v1141_v21 = vpack.c.bf16 %v748_v18, %v746_v17  ;;  %v750_v23 = vld [vmem:[%s1291_s29 + $0x1a0] sm:$0xff]  ;;  %v612_v41 = vshrl.u32 %v611_v40, 7 }
  0x2d   : > { %1080 = vmatprep.subr.bf16.mxu0 %v1079_v45  ;;  %v722_v45 = vld [vmem:[%s1291_s29 + $0xc0] sm:$0xff]  ;;  %v1143_v22 = vpack.c.bf16 %v753_v20, %v751_v19  ;;  %v752_v24 = vld [vmem:[%s1291_s29 + $0x1b0] sm:$0xff]  ;;  %v755_v25 = vld [vmem:[%s1291_s29 + $0x1c8] sm:$0xff] }
  0x2e   : > { %v757_v26 = vld [vmem:[%s1291_s29 + $0x1d8] sm:$0xff]  ;;  %v1145_v27 = vpack.c.bf16 %v752_v24, %v750_v23  ;;  %v759_v34 = vld [vmem:[%s1291_s29 + $0x1e8] sm:$0xff]  ;;  %v613_v42 = vsub.s32 0, %v612_v41 }
  0x2f   : > { %1106 = vmatpush1.bf16.msra.mxu1 %v1105_v31  ;;  %v1147_v28 = vpack.c.bf16 %v757_v26, %v755_v25  ;;  %v754_v31 = vld [vmem:[%s1291_s29 + $0x1c0] sm:$0xff]  ;;  %v761_v35 = vld [vmem:[%s1291_s29 + $0x1f8] sm:$0xff] }
  0x30   : > { %1082 = vmatpush3.bf16.msra.mxu0 %v1081_v48  ;;  %1108 = vmatprep.subr.bf16.mxu1 %v1107_v32  ;;  %v729_v48 = vld [vmem:[%s1291_s29 + $0xf8] sm:$0xff]  ;;  %v756_v32 = vld [vmem:[%s1291_s29 + $0x1d0] sm:$0xff]  ;;  %v1151_v36 = vpack.c.bf16 %v761_v35, %v759_v34 }
  0x31   : > { %1046 = vmatprep.subr.mxu0 %v1173_v50  ;;  %v1149_v33 = vpack.c.bf16 %v756_v32, %v754_v31 }
  0x33   : > { %520 = vmatmul.mubr.f32.vlgmr.msra.gmra.mrb[0].mxu0 %v414_v49  ;;  %1110 = vmatpush1.bf16.msra.mxu1 %v1109_v37  ;;  %v1117_v49 = vpack.c.bf16 %v724_v46, %v722_v45  ;;  %v758_v37 = vld [vmem:[%s1291_s29 + $0x1e0] sm:$0xff] }
  0x34   : > { %1048 = vmatprep.mubr.msk.f32.mxu0 %vm1174_vm0, %v1173_v50  ;;  %1112 = vmatprep.subr.bf16.mxu1 %v1111_v38  ;;  %v760_v38 = vld [vmem:[%s1291_s29 + $0x1f0] sm:$0xff] }
  0x35   : > { %v1153_v39 = vpack.c.bf16 %v760_v38, %v758_v37 }
  0x37   : > { %1114 = vmatpush1.bf16.msra.mxu1 %v1113_v43  ;;  %v609_v43 = vld [vmem:[%s399_s11] sm:$0x3] }
  0x38   : > { %1116 = vmatprep.subr.bf16.mxu1 %v1115_v44  ;;  %v617_v44 = vsub.s32 1, %v612_v41  ;;  %v614_v45 = vrot.slane %v609_v43, %v613_v42 }
  0x3a   : > { %v618_v46 = vrot.slane %v609_v43, %v617_v44 }
  0x3b   : > { %1118 = vmatpush1.bf16.msra.mxu1 %v1117_v49 }
 0x106   : > { %v1041_v51 = vpop.f32.mrb[0].mxu0 }
 0x107   : > { %v1042_v53 = vpop.f32.mrb[1].mxu0 }
 0x108   : > { %v1043_v54 = vadd.f32 %v1042_v53, %v1041_v51  ;;  %v726_v51 = vld [vmem:[%s1291_s29 + $0xe0] sm:$0xff]  ;;  %v731_v53 = vld [vmem:[%s1291_s29 + $0x108] sm:$0xff] }
 0x10a   : > { %v522_v59 = vadd.f32 %v1043_v54, %v998_v52  ;;  %v728_v52 = vld [vmem:[%s1291_s29 + $0xf0] sm:$0xff]  ;;  %v733_v54 = vld [vmem:[%s1291_s29 + $0x118] sm:$0xff] }
 0x10b   : > { %v1121_v55 = vpack.c.bf16 %v728_v52, %v726_v51  ;;  %v1123_v56 = vpack.c.bf16 %v733_v54, %v731_v53  ;;  %v762_v53 = vld [vmem:[%s408_s14] sm:$0x3] }
 0x10c   : > { %v525_v63 = vmax.f32 %v522_v59, 0.0  ;;  %v735_v59 = vld [vmem:[%s1291_s29 + $0x128] sm:$0xff]  ;;  %v767_v54 = vrot.slane %v762_v53, %v613_v42 }
 0x10e   : > { %1047 = vmatpush3.msra.mxu0 %v525_v63  ;;  %v734_v63 = vld [vmem:[%s1291_s29 + $0x120] sm:$0xff] }
 0x10f   : > { %1049 = vmatmul.mubr.msk.f32.vlgmr.msra.gmra.mrb[2].mxu0 %vm527_vm1, %v526_v0  ;;  %1084 = vmatprep.subr.bf16.mxu0 %v1083_v62  ;;  %v1127_v62 = vpack.c.bf16 %v737_v60, %v735_v59  ;;  %v736_v0 = vld [vmem:[%s1291_s29 + $0x130] sm:$0xff] }
 0x110   : > { %1086 = vmatpush1.bf16.msra.mxu0 %v1085_v1  ;;  %689 = vmatprep.mubr.f32.mxu0 %v1173_v50  ;;  %v1119_v50 = vpack.c.bf16 %v729_v48, %v727_v47  ;;  %v739_v1 = vld [vmem:[%s1291_s29 + $0x148] sm:$0xff]  ;;  %v1129_v3 = vpack.c.bf16 %v736_v0, %v734_v63 }
 0x111   : > { %1088 = vmatprep.subr.bf16.mxu0 %v1087_v2  ;;  %v741_v2 = vld [vmem:[%s1291_s29 + $0x158] sm:$0xff] }
 0x112   : > { %1120 = vmatprep.subr.bf16.mxu1 %v1119_v50  ;;  %v1131_v4 = vpack.c.bf16 %v741_v2, %v739_v1 }
 0x113   : > { %1122 = vmatpush1.bf16.msra.mxu1 %v1121_v55  ;;  %v771_v55 = vrot.slane %v762_v53, %v617_v44 }
 0x114   : > { %1090 = vmatpush1.bf16.msra.mxu0 %v1089_v5  ;;  %1124 = vmatprep.subr.bf16.mxu1 %v1123_v56  ;;  %v738_v5 = vld [vmem:[%s1291_s29 + $0x140] sm:$0xff] }
 0x115   : > { %v1133_v9 = vpack.c.bf16 %v740_v6, %v738_v5 }
 0x117   : > { %1126 = vmatpush1.bf16.msra.mxu1 %v1125_v61 }
 0x118   : > { %1128 = vmatprep.subr.bf16.mxu1 %v1127_v62 }
 0x11b   : > { %1130 = vmatpush1.bf16.msra.mxu1 %v1129_v3 }
 0x11c   : > { %1132 = vmatprep.subr.bf16.mxu1 %v1131_v4 }
 0x11f   : > { %1134 = vmatpush1.bf16.msra.mxu1 %v1133_v9 }
 0x120   : > { %1136 = vmatprep.subr.bf16.mxu1 %v1135_v10 }
 0x123   : > { %1138 = vmatpush1.bf16.msra.mxu1 %v1137_v15 }
 0x124   : > { %1140 = vmatprep.subr.bf16.mxu1 %v1139_v16 }
 0x127   : > { %1142 = vmatpush1.bf16.msra.mxu1 %v1141_v21 }
 0x128   : > { %1144 = vmatprep.subr.bf16.mxu1 %v1143_v22 }
 0x12b   : > { %1146 = vmatpush1.bf16.msra.mxu1 %v1145_v27 }
 0x12c   : > { %1148 = vmatprep.subr.bf16.mxu1 %v1147_v28 }
 0x12f   : > { %1150 = vmatpush1.bf16.msra.mxu1 %v1149_v33 }
 0x130   : > { %1152 = vmatprep.subr.bf16.mxu1 %v1151_v36 }
 0x133   : > { %1154 = vmatpush1.bf16.msra.mxu1 %v1153_v39 }
 0x1e2   : > { %v597_v29 = vpop.f32.mrb[2].mxu0 }
 0x1e3   : > { %1000 = vmatmul.mubr.msk.f32.vlgmr.msra.gmra.mrb[4].mxu0 %vm621_vm2, %v597_v29  ;;  %v1050_v30 = vpop.f32.mrb[3].mxu0 }
 0x2b6   : > { %v691_v47 = vpop.f32.mrb[4].mxu0 }
 0x2b7   : > { %v692_v48 = vadd.f32 %v691_v47, %v614_v45  ;;  %v693_v49 = vpop.f32.mrb[5].mxu0 }
 0x2b8   : > { %v694_v50 = vadd.f32 %v693_v49, %v618_v46 }
 0x2b9   : > { %v696_v52 = vmax.f32 %v692_v48, 0.0 }
 0x2ba   : > { %v697_v51 = vmax.f32 %v694_v50, 0.0 }
 0x2bc   : > { %838 = vmatprep.mubr.f32.mxu1 %v697_v51 }
 0x2bd   : > { %839 = vmatmul.mubr.f32.vlgmr.msra.gmra.mrb[0].mxu1 %v696_v52 }
 0x390   : > { %v840_v56 = vpop.f32.mrb[0].mxu1 }
 0x391   : > { %v841_v57 = vadd.f32 %v840_v56, %v767_v54  ;;  %v842_v58 = vpop.f32.mrb[1].mxu1 }
 0x392   : > { %v843_v59 = vadd.f32 %v842_v58, %v771_v55 }
 0x394   : > { %v847_v60 = vcombine.low %v841_v57, %v843_v59 }
 0x396   : > { %1001 = vst.sshfl [vmem:[%s413_s18] sm:$0x33 pattern:$0x76325410] %v847_v60 }
 0x397 PF: > { %s18_s27 = sadd.s32 1, %s1171_s27  }
 0x398   : > { %p15_p4 = scmp.ge.s32.totalorder %s18_s27, 4  }
 0x39a   :  { %17 = sbr.rel (!%p15_p4) target bundleno = 1 (0x1), region = 100 }

// kernel: a2c_forward.6
= control target key start
LH: loop header
LB: loop body
LE: loop exit
PB: predicated region body
PF: predicated region fallthrough
CT: control target
= control target key end

     0   :  { %v1205_v2 = vmov 0.0   ;;  %vm71_vm0 = vcmask 64512   ;;  %s2078_s1 = inlined_call_operand.vmem [shape: f32[8,1024], index: 1, kind: input, shape index: {}]   ;;  %s2079_s0 = inlined_call_operand.vmem [shape: f32[2,8], index: 0, kind: input, shape index: {}]   ;;  %s2080_s3 = inlined_call_operand.vmem [shape: f32[1024,256], index: 3, kind: input, shape index: {}]   ;;  %s2081_s2 = inlined_call_operand.vmem [shape: f32[1,1024], index: 2, kind: input, shape index: {}]   ;;  %s2082_s4 = inlined_call_operand.vmem [shape: f32[1,256], index: 4, kind: input, shape index: {}]   ;;  %s2083_s5 = inlined_call_operand.vmem [shape: f32[2,256], index: 5, kind: output, shape index: {}]  }
   0x1   :  { %v22_v0 = vld [vmem:[%s2078_s1 + $0x8] sm:$0xff]  ;;  %v21_v1 = vld [vmem:[%s2078_s1] sm:$0xff]  ;;  %139 = vmatprep.mubr.f32.mxu0 %v1205_v2  ;;  %210 = vmatprep.mubr.f32.mxu1 %v1205_v2  ;;  %v24_v6 = vld [vmem:[%s2078_s1 + $0x18] sm:$0xff] }
   0x2   :  { %v20_v3 = vld [vmem:[%s2079_s0] sm:$0x3]  ;;  %75 = vmatprep.subr.mxu0 %v22_v0  ;;  %v26_v4 = vld [vmem:[%s2078_s1 + $0x28] sm:$0xff]  ;;  %146 = vmatprep.subr.mxu1 %v24_v6  ;;  %v23_v7 = vld [vmem:[%s2078_s1 + $0x10] sm:$0xff] }
   0x3   :  { %v25_v5 = vld [vmem:[%s2078_s1 + $0x20] sm:$0xff]  ;;  %76 = vmatpush1.msra.mxu0 %v21_v1  ;;  %v28_v8 = vld [vmem:[%s2078_s1 + $0x38] sm:$0xff]  ;;  %v27_v9 = vld [vmem:[%s2078_s1 + $0x30] sm:$0xff]  ;;  %147 = vmatpush1.msra.mxu1 %v23_v7 }
   0x4   :  { %935 = vmatmul.mubr.msk.f32.vlgmr.msra.gmra.mrb[0].mxu0 %vm71_vm0, %v20_v3  ;;  %217 = vmatprep.subr.mxu0 %v26_v4  ;;  %v368_v10 = vld [vmem:[%s2080_s3 + $0x8] sm:$0xff]  ;;  %v370_v11 = vld [vmem:[%s2080_s3 + $0x18] sm:$0xff]  ;;  %v367_v13 = vld [vmem:[%s2080_s3] sm:$0xff] }
   0x5   :  { %218 = vmatpush1.msra.mxu0 %v25_v5  ;;  %281 = vmatprep.mubr.f32.mxu0 %v1205_v2  ;;  %v940_v12 = vpack.c.bf16 %v370_v11, %v368_v10  ;;  %v369_v14 = vld [vmem:[%s2080_s3 + $0x10] sm:$0xff]  ;;  %v372_v15 = vld [vmem:[%s2080_s3 + $0x28] sm:$0xff]  ;;  %v374_v16 = vld [vmem:[%s2080_s3 + $0x38] sm:$0xff] }
   0x6   :  { %v496_v17 = vld [vmem:[%s2080_s3 + $0x408] sm:$0xff]  ;;  %v498_v18 = vld [vmem:[%s2080_s3 + $0x418] sm:$0xff]  ;;  %936 = vmatmul.mubr.msk.f32.vlgmr.msra.gmra.mrb[0].mxu1 %vm71_vm0, %v20_v3  ;;  %288 = vmatprep.subr.mxu1 %v28_v8  ;;  %v495_v20 = vld [vmem:[%s2080_s3 + $0x400] sm:$0xff]  ;;  %v942_v22 = vpack.c.bf16 %v369_v14, %v367_v13  ;;  %v944_v26 = vpack.c.bf16 %v374_v16, %v372_v15 }
   0x7   :  { %v1068_v19 = vpack.c.bf16 %v498_v18, %v496_v17  ;;  %v497_v21 = vld [vmem:[%s2080_s3 + $0x410] sm:$0xff]  ;;  %289 = vmatpush1.msra.mxu1 %v27_v9  ;;  %v371_v23 = vld [vmem:[%s2080_s3 + $0x20] sm:$0xff]  ;;  %v500_v25 = vld [vmem:[%s2080_s3 + $0x428] sm:$0xff]  ;;  %352 = vmatprep.mubr.f32.mxu1 %v1205_v2 }
   0x8   :  { %937 = vmatmul.mubr.msk.f32.vlgmr.msra.gmra.mrb[2].mxu0 %vm71_vm0, %v20_v3  ;;  %v1070_v24 = vpack.c.bf16 %v497_v21, %v495_v20  ;;  %941 = vmatprep.subr.bf16.mxu1 %v940_v12  ;;  %v373_v27 = vld [vmem:[%s2080_s3 + $0x30] sm:$0xff]  ;;  %v376_v28 = vld [vmem:[%s2080_s3 + $0x48] sm:$0xff]  ;;  %v502_v29 = vld [vmem:[%s2080_s3 + $0x438] sm:$0xff] }
   0x9   :  { %1069 = vmatprep.subr.bf16.mxu0 %v1068_v19  ;;  %v378_v30 = vld [vmem:[%s2080_s3 + $0x58] sm:$0xff]  ;;  %v1072_v31 = vpack.c.bf16 %v502_v29, %v500_v25  ;;  %v499_v32 = vld [vmem:[%s2080_s3 + $0x420] sm:$0xff]  ;;  %v501_v33 = vld [vmem:[%s2080_s3 + $0x430] sm:$0xff]  ;;  %v946_v37 = vpack.c.bf16 %v373_v27, %v371_v23 }
   0xa   :  { %938 = vmatmul.mubr.msk.f32.vlgmr.msra.gmra.mrb[2].mxu1 %vm71_vm0, %v20_v3  ;;  %1071 = vmatpush1.bf16.msra.mxu0 %v1070_v24  ;;  %v1074_v34 = vpack.c.bf16 %v501_v33, %v499_v32  ;;  %v504_v35 = vld [vmem:[%s2080_s3 + $0x448] sm:$0xff]  ;;  %v506_v36 = vld [vmem:[%s2080_s3 + $0x458] sm:$0xff]  ;;  %v375_v38 = vld [vmem:[%s2080_s3 + $0x40] sm:$0xff]  ;;  %v948_v41 = vpack.c.bf16 %v378_v30, %v376_v28 }
   0xb   :  { %943 = vmatpush1.bf16.msra.mxu1 %v942_v22  ;;  %1073 = vmatprep.subr.bf16.mxu0 %v1072_v31  ;;  %v1076_v39 = vpack.c.bf16 %v506_v36, %v504_v35  ;;  %v503_v40 = vld [vmem:[%s2080_s3 + $0x440] sm:$0xff]  ;;  %v377_v42 = vld [vmem:[%s2080_s3 + $0x50] sm:$0xff]  ;;  %v380_v43 = vld [vmem:[%s2080_s3 + $0x68] sm:$0xff] }
   0xc   :  { %945 = vmatprep.subr.bf16.mxu1 %v944_v26  ;;  %v505_v44 = vld [vmem:[%s2080_s3 + $0x450] sm:$0xff]  ;;  %v382_v45 = vld [vmem:[%s2080_s3 + $0x78] sm:$0xff]  ;;  %v508_v46 = vld [vmem:[%s2080_s3 + $0x468] sm:$0xff]  ;;  %v950_v49 = vpack.c.bf16 %v377_v42, %v375_v38 }
   0xd   :  { %v510_v47 = vld [vmem:[%s2080_s3 + $0x478] sm:$0xff]  ;;  %v1078_v48 = vpack.c.bf16 %v505_v44, %v503_v40  ;;  %v379_v50 = vld [vmem:[%s2080_s3 + $0x60] sm:$0xff]  ;;  %v509_v53 = vld [vmem:[%s2080_s3 + $0x470] sm:$0xff]  ;;  %v952_v54 = vpack.c.bf16 %v382_v45, %v380_v43 }
   0xe   :  { %1075 = vmatpush1.bf16.msra.mxu0 %v1074_v34  ;;  %v1080_v51 = vpack.c.bf16 %v510_v47, %v508_v46  ;;  %v507_v52 = vld [vmem:[%s2080_s3 + $0x460] sm:$0xff]  ;;  %v381_v55 = vld [vmem:[%s2080_s3 + $0x70] sm:$0xff]  ;;  %v512_v56 = vld [vmem:[%s2080_s3 + $0x488] sm:$0xff] }
   0xf   :  { %947 = vmatpush1.bf16.msra.mxu1 %v946_v37  ;;  %1077 = vmatprep.subr.bf16.mxu0 %v1076_v39  ;;  %v514_v57 = vld [vmem:[%s2080_s3 + $0x498] sm:$0xff]  ;;  %v384_v58 = vld [vmem:[%s2080_s3 + $0x88] sm:$0xff]  ;;  %v1082_v60 = vpack.c.bf16 %v509_v53, %v507_v52  ;;  %v954_v61 = vpack.c.bf16 %v381_v55, %v379_v50  ;;  %v383_v62 = vld [vmem:[%s2080_s3 + $0x80] sm:$0xff] }
  0x10   :  { %949 = vmatprep.subr.bf16.mxu1 %v948_v41  ;;  %v386_v59 = vld [vmem:[%s2080_s3 + $0x98] sm:$0xff]  ;;  %v1084_v63 = vpack.c.bf16 %v514_v57, %v512_v56  ;;  %v511_v0 = vld [vmem:[%s2080_s3 + $0x480] sm:$0xff]  ;;  %v513_v1 = vld [vmem:[%s2080_s3 + $0x490] sm:$0xff] }
  0x11   :  { %v956_v2 = vpack.c.bf16 %v386_v59, %v384_v58  ;;  %v385_v3 = vld [vmem:[%s2080_s3 + $0x90] sm:$0xff]  ;;  %v516_v4 = vld [vmem:[%s2080_s3 + $0x4a8] sm:$0xff]  ;;  %v518_v5 = vld [vmem:[%s2080_s3 + $0x4b8] sm:$0xff]  ;;  %v1086_v8 = vpack.c.bf16 %v513_v1, %v511_v0 }
  0x12   :  { %1079 = vmatpush1.bf16.msra.mxu0 %v1078_v48  ;;  %v388_v6 = vld [vmem:[%s2080_s3 + $0xa8] sm:$0xff]  ;;  %v390_v7 = vld [vmem:[%s2080_s3 + $0xb8] sm:$0xff]  ;;  %v958_v9 = vpack.c.bf16 %v385_v3, %v383_v62  ;;  %v387_v10 = vld [vmem:[%s2080_s3 + $0xa0] sm:$0xff]  ;;  %v1088_v11 = vpack.c.bf16 %v518_v5, %v516_v4 }
  0x13   :  { %951 = vmatpush1.bf16.msra.mxu1 %v950_v49  ;;  %1081 = vmatprep.subr.bf16.mxu0 %v1080_v51  ;;  %v515_v12 = vld [vmem:[%s2080_s3 + $0x4a0] sm:$0xff]  ;;  %v517_v13 = vld [vmem:[%s2080_s3 + $0x4b0] sm:$0xff]  ;;  %v960_v14 = vpack.c.bf16 %v390_v7, %v388_v6  ;;  %v520_v16 = vld [vmem:[%s2080_s3 + $0x4c8] sm:$0xff] }
  0x14   :  { %953 = vmatprep.subr.bf16.mxu1 %v952_v54  ;;  %v389_v15 = vld [vmem:[%s2080_s3 + $0xb0] sm:$0xff]  ;;  %v522_v17 = vld [vmem:[%s2080_s3 + $0x4d8] sm:$0xff]  ;;  %v392_v18 = vld [vmem:[%s2080_s3 + $0xc8] sm:$0xff]  ;;  %v1090_v20 = vpack.c.bf16 %v517_v13, %v515_v12 }
  0x15   :  { %v394_v19 = vld [vmem:[%s2080_s3 + $0xd8] sm:$0xff]  ;;  %v962_v21 = vpack.c.bf16 %v389_v15, %v387_v10  ;;  %v391_v22 = vld [vmem:[%s2080_s3 + $0xc0] sm:$0xff]  ;;  %v1092_v23 = vpack.c.bf16 %v522_v17, %v520_v16  ;;  %v521_v25 = vld [vmem:[%s2080_s3 + $0x4d0] sm:$0xff] }
  0x16   :  { %1083 = vmatpush1.bf16.msra.mxu0 %v1082_v60  ;;  %v519_v24 = vld [vmem:[%s2080_s3 + $0x4c0] sm:$0xff]  ;;  %v964_v26 = vpack.c.bf16 %v394_v19, %v392_v18  ;;  %v393_v27 = vld [vmem:[%s2080_s3 + $0xd0] sm:$0xff]  ;;  %v524_v28 = vld [vmem:[%s2080_s3 + $0x4e8] sm:$0xff] }
  0x17   :  { %955 = vmatpush1.bf16.msra.mxu1 %v954_v61  ;;  %1085 = vmatprep.subr.bf16.mxu0 %v1084_v63  ;;  %v526_v29 = vld [vmem:[%s2080_s3 + $0x4f8] sm:$0xff]  ;;  %v396_v30 = vld [vmem:[%s2080_s3 + $0xe8] sm:$0xff]  ;;  %v1094_v32 = vpack.c.bf16 %v521_v25, %v519_v24  ;;  %v966_v33 = vpack.c.bf16 %v393_v27, %v391_v22  ;;  %v395_v34 = vld [vmem:[%s2080_s3 + $0xe0] sm:$0xff] }
  0x18   :  { %957 = vmatprep.subr.bf16.mxu1 %v956_v2  ;;  %v398_v31 = vld [vmem:[%s2080_s3 + $0xf8] sm:$0xff]  ;;  %v1096_v35 = vpack.c.bf16 %v526_v29, %v524_v28  ;;  %v523_v36 = vld [vmem:[%s2080_s3 + $0x4e0] sm:$0xff]  ;;  %v525_v37 = vld [vmem:[%s2080_s3 + $0x4f0] sm:$0xff] }
  0x19   :  { %v968_v38 = vpack.c.bf16 %v398_v31, %v396_v30  ;;  %v397_v39 = vld [vmem:[%s2080_s3 + $0xf0] sm:$0xff]  ;;  %v528_v40 = vld [vmem:[%s2080_s3 + $0x508] sm:$0xff]  ;;  %v530_v41 = vld [vmem:[%s2080_s3 + $0x518] sm:$0xff]  ;;  %v1098_v44 = vpack.c.bf16 %v525_v37, %v523_v36 }
  0x1a   :  { %1087 = vmatpush1.bf16.msra.mxu0 %v1086_v8  ;;  %v400_v42 = vld [vmem:[%s2080_s3 + $0x108] sm:$0xff]  ;;  %v402_v43 = vld [vmem:[%s2080_s3 + $0x118] sm:$0xff]  ;;  %v970_v45 = vpack.c.bf16 %v397_v39, %v395_v34  ;;  %v399_v46 = vld [vmem:[%s2080_s3 + $0x100] sm:$0xff]  ;;  %v1100_v47 = vpack.c.bf16 %v530_v41, %v528_v40 }
  0x1b   :  { %959 = vmatpush1.bf16.msra.mxu1 %v958_v9  ;;  %1089 = vmatprep.subr.bf16.mxu0 %v1088_v11  ;;  %v527_v48 = vld [vmem:[%s2080_s3 + $0x500] sm:$0xff]  ;;  %v529_v49 = vld [vmem:[%s2080_s3 + $0x510] sm:$0xff]  ;;  %v972_v50 = vpack.c.bf16 %v402_v43, %v400_v42  ;;  %v532_v52 = vld [vmem:[%s2080_s3 + $0x528] sm:$0xff] }
  0x1c   :  { %961 = vmatprep.subr.bf16.mxu1 %v960_v14  ;;  %v401_v51 = vld [vmem:[%s2080_s3 + $0x110] sm:$0xff]  ;;  %v534_v53 = vld [vmem:[%s2080_s3 + $0x538] sm:$0xff]  ;;  %v404_v54 = vld [vmem:[%s2080_s3 + $0x128] sm:$0xff]  ;;  %v1102_v56 = vpack.c.bf16 %v529_v49, %v527_v48 }
  0x1d   :  { %v406_v55 = vld [vmem:[%s2080_s3 + $0x138] sm:$0xff]  ;;  %v974_v57 = vpack.c.bf16 %v401_v51, %v399_v46  ;;  %v403_v58 = vld [vmem:[%s2080_s3 + $0x120] sm:$0xff]  ;;  %v1104_v59 = vpack.c.bf16 %v534_v53, %v532_v52  ;;  %v533_v61 = vld [vmem:[%s2080_s3 + $0x530] sm:$0xff] }
  0x1e   :  { %1091 = vmatpush1.bf16.msra.mxu0 %v1090_v20  ;;  %v531_v60 = vld [vmem:[%s2080_s3 + $0x520] sm:$0xff]  ;;  %v976_v62 = vpack.c.bf16 %v406_v55, %v404_v54  ;;  %v405_v63 = vld [vmem:[%s2080_s3 + $0x130] sm:$0xff]  ;;  %v536_v0 = vld [vmem:[%s2080_s3 + $0x548] sm:$0xff] }
  0x1f   :  { %963 = vmatpush1.bf16.msra.mxu1 %v962_v21  ;;  %1093 = vmatprep.subr.bf16.mxu0 %v1092_v23  ;;  %v538_v1 = vld [vmem:[%s2080_s3 + $0x558] sm:$0xff]  ;;  %v408_v2 = vld [vmem:[%s2080_s3 + $0x148] sm:$0xff]  ;;  %v1106_v4 = vpack.c.bf16 %v533_v61, %v531_v60  ;;  %v978_v5 = vpack.c.bf16 %v405_v63, %v403_v58  ;;  %v407_v6 = vld [vmem:[%s2080_s3 + $0x140] sm:$0xff] }
  0x20   :  { %965 = vmatprep.subr.bf16.mxu1 %v964_v26  ;;  %v410_v3 = vld [vmem:[%s2080_s3 + $0x158] sm:$0xff]  ;;  %v1108_v7 = vpack.c.bf16 %v538_v1, %v536_v0  ;;  %v535_v8 = vld [vmem:[%s2080_s3 + $0x540] sm:$0xff]  ;;  %v537_v9 = vld [vmem:[%s2080_s3 + $0x550] sm:$0xff] }
  0x21   :  { %v980_v10 = vpack.c.bf16 %v410_v3, %v408_v2  ;;  %v409_v11 = vld [vmem:[%s2080_s3 + $0x150] sm:$0xff]  ;;  %v540_v12 = vld [vmem:[%s2080_s3 + $0x568] sm:$0xff]  ;;  %v542_v13 = vld [vmem:[%s2080_s3 + $0x578] sm:$0xff]  ;;  %v1110_v16 = vpack.c.bf16 %v537_v9, %v535_v8 }
  0x22   :  { %1095 = vmatpush1.bf16.msra.mxu0 %v1094_v32  ;;  %v412_v14 = vld [vmem:[%s2080_s3 + $0x168] sm:$0xff]  ;;  %v414_v15 = vld [vmem:[%s2080_s3 + $0x178] sm:$0xff]  ;;  %v982_v17 = vpack.c.bf16 %v409_v11, %v407_v6  ;;  %v411_v18 = vld [vmem:[%s2080_s3 + $0x160] sm:$0xff]  ;;  %v1112_v19 = vpack.c.bf16 %v542_v13, %v540_v12 }
  0x23   :  { %967 = vmatpush1.bf16.msra.mxu1 %v966_v33  ;;  %1097 = vmatprep.subr.bf16.mxu0 %v1096_v35  ;;  %v539_v20 = vld [vmem:[%s2080_s3 + $0x560] sm:$0xff]  ;;  %v541_v21 = vld [vmem:[%s2080_s3 + $0x570] sm:$0xff]  ;;  %v984_v22 = vpack.c.bf16 %v414_v15, %v412_v14  ;;  %v544_v24 = vld [vmem:[%s2080_s3 + $0x588] sm:$0xff] }
  0x24   :  { %969 = vmatprep.subr.bf16.mxu1 %v968_v38  ;;  %v413_v23 = vld [vmem:[%s2080_s3 + $0x170] sm:$0xff]  ;;  %v546_v25 = vld [vmem:[%s2080_s3 + $0x598] sm:$0xff]  ;;  %v416_v26 = vld [vmem:[%s2080_s3 + $0x188] sm:$0xff]  ;;  %v1114_v28 = vpack.c.bf16 %v541_v21, %v539_v20 }
  0x25   :  { %v418_v27 = vld [vmem:[%s2080_s3 + $0x198] sm:$0xff]  ;;  %v986_v29 = vpack.c.bf16 %v413_v23, %v411_v18  ;;  %v415_v30 = vld [vmem:[%s2080_s3 + $0x180] sm:$0xff]  ;;  %v1116_v31 = vpack.c.bf16 %v546_v25, %v544_v24  ;;  %v545_v33 = vld [vmem:[%s2080_s3 + $0x590] sm:$0xff] }
  0x26   :  { %1099 = vmatpush1.bf16.msra.mxu0 %v1098_v44  ;;  %v543_v32 = vld [vmem:[%s2080_s3 + $0x580] sm:$0xff]  ;;  %v988_v34 = vpack.c.bf16 %v418_v27, %v416_v26  ;;  %v417_v35 = vld [vmem:[%s2080_s3 + $0x190] sm:$0xff]  ;;  %v548_v36 = vld [vmem:[%s2080_s3 + $0x5a8] sm:$0xff] }
  0x27   :  { %971 = vmatpush1.bf16.msra.mxu1 %v970_v45  ;;  %1101 = vmatprep.subr.bf16.mxu0 %v1100_v47  ;;  %v550_v37 = vld [vmem:[%s2080_s3 + $0x5b8] sm:$0xff]  ;;  %v420_v38 = vld [vmem:[%s2080_s3 + $0x1a8] sm:$0xff]  ;;  %v1118_v40 = vpack.c.bf16 %v545_v33, %v543_v32  ;;  %v990_v41 = vpack.c.bf16 %v417_v35, %v415_v30  ;;  %v547_v43 = vld [vmem:[%s2080_s3 + $0x5a0] sm:$0xff] }
  0x28   :  { %973 = vmatprep.subr.bf16.mxu1 %v972_v50  ;;  %v422_v39 = vld [vmem:[%s2080_s3 + $0x1b8] sm:$0xff]  ;;  %v1120_v42 = vpack.c.bf16 %v550_v37, %v548_v36  ;;  %v549_v44 = vld [vmem:[%s2080_s3 + $0x5b0] sm:$0xff]  ;;  %v419_v46 = vld [vmem:[%s2080_s3 + $0x1a0] sm:$0xff] }
  0x29   :  { %v992_v45 = vpack.c.bf16 %v422_v39, %v420_v38  ;;  %v421_v47 = vld [vmem:[%s2080_s3 + $0x1b0] sm:$0xff]  ;;  %v424_v48 = vld [vmem:[%s2080_s3 + $0x1c8] sm:$0xff]  ;;  %v426_v49 = vld [vmem:[%s2080_s3 + $0x1d8] sm:$0xff]  ;;  %v1122_v50 = vpack.c.bf16 %v549_v44, %v547_v43 }
  0x2a   :  { %1103 = vmatpush1.bf16.msra.mxu0 %v1102_v56  ;;  %v994_v51 = vpack.c.bf16 %v421_v47, %v419_v46  ;;  %v996_v52 = vpack.c.bf16 %v426_v49, %v424_v48  ;;  %v423_v53 = vld [vmem:[%s2080_s3 + $0x1c0] sm:$0xff]  ;;  %v425_v54 = vld [vmem:[%s2080_s3 + $0x1d0] sm:$0xff]  ;;  %v428_v56 = vld [vmem:[%s2080_s3 + $0x1e8] sm:$0xff] }
  0x2b   :  { %975 = vmatpush1.bf16.msra.mxu1 %v974_v57  ;;  %1105 = vmatprep.subr.bf16.mxu0 %v1104_v59  ;;  %v998_v55 = vpack.c.bf16 %v425_v54, %v423_v53  ;;  %v430_v57 = vld [vmem:[%s2080_s3 + $0x1f8] sm:$0xff]  ;;  %v552_v58 = vld [vmem:[%s2080_s3 + $0x5c8] sm:$0xff]  ;;  %v427_v61 = vld [vmem:[%s2080_s3 + $0x1e0] sm:$0xff] }
  0x2c   :  { %977 = vmatprep.subr.bf16.mxu1 %v976_v62  ;;  %v1000_v59 = vpack.c.bf16 %v430_v57, %v428_v56  ;;  %v554_v60 = vld [vmem:[%s2080_s3 + $0x5d8] sm:$0xff]  ;;  %v429_v62 = vld [vmem:[%s2080_s3 + $0x1f0] sm:$0xff]  ;;  %v551_v1 = vld [vmem:[%s2080_s3 + $0x5c0] sm:$0xff] }
  0x2d   :  { %v1124_v63 = vpack.c.bf16 %v554_v60, %v552_v58  ;;  %v1002_v0 = vpack.c.bf16 %v429_v62, %v427_v61  ;;  %v553_v2 = vld [vmem:[%s2080_s3 + $0x5d0] sm:$0xff]  ;;  %v556_v6 = vld [vmem:[%s2080_s3 + $0x5e8] sm:$0xff]  ;;  %v558_v8 = vld [vmem:[%s2080_s3 + $0x5f8] sm:$0xff] }
  0x2e   :  { %1107 = vmatpush1.bf16.msra.mxu0 %v1106_v4  ;;  %v1126_v3 = vpack.c.bf16 %v553_v2, %v551_v1  ;;  %v432_v4 = vld [vmem:[%s2080_s3 + $0x208] sm:$0xff]  ;;  %v1128_v9 = vpack.c.bf16 %v558_v8, %v556_v6  ;;  %v557_v11 = vld [vmem:[%s2080_s3 + $0x5f0] sm:$0xff]  ;;  %v562_v14 = vld [vmem:[%s2080_s3 + $0x618] sm:$0xff] }
  0x2f   :  { %979 = vmatpush1.bf16.msra.mxu1 %v978_v5  ;;  %1109 = vmatprep.subr.bf16.mxu0 %v1108_v7  ;;  %v434_v5 = vld [vmem:[%s2080_s3 + $0x218] sm:$0xff]  ;;  %v560_v13 = vld [vmem:[%s2080_s3 + $0x608] sm:$0xff]  ;;  %v431_v27 = vld [vmem:[%s2080_s3 + $0x200] sm:$0xff] }
  0x30   :  { %981 = vmatprep.subr.bf16.mxu1 %v980_v10  ;;  %v1004_v7 = vpack.c.bf16 %v434_v5, %v432_v4  ;;  %v555_v10 = vld [vmem:[%s2080_s3 + $0x5e0] sm:$0xff]  ;;  %v1132_v15 = vpack.c.bf16 %v562_v14, %v560_v13  ;;  %v436_v32 = vld [vmem:[%s2080_s3 + $0x228] sm:$0xff]  ;;  %v438_v33 = vld [vmem:[%s2080_s3 + $0x238] sm:$0xff] }
  0x31   :  { %v1130_v12 = vpack.c.bf16 %v557_v11, %v555_v10  ;;  %v435_v43 = vld [vmem:[%s2080_s3 + $0x220] sm:$0xff]  ;;  %v437_v44 = vld [vmem:[%s2080_s3 + $0x230] sm:$0xff]  ;;  %v564_v56 = vld [vmem:[%s2080_s3 + $0x628] sm:$0xff] }
  0x32   :  { %1111 = vmatpush1.bf16.msra.mxu0 %v1110_v16  ;;  %v31_v16 = vlaneseq  ;;  %v559_v49 = vld [vmem:[%s2080_s3 + $0x600] sm:$0xff]  ;;  %v566_v57 = vld [vmem:[%s2080_s3 + $0x638] sm:$0xff]  ;;  %v1010_v61 = vpack.c.bf16 %v437_v44, %v435_v43  ;;  %v565_v6 = vld [vmem:[%s2080_s3 + $0x630] sm:$0xff] }
  0x33   :  { %983 = vmatpush1.bf16.msra.mxu1 %v982_v17  ;;  %1113 = vmatprep.subr.bf16.mxu0 %v1112_v19  ;;  %v1669_v19 = vld [vmem:[%s2081_s2] sm:$0xff]  ;;  %v1136_v4 = vpack.c.bf16 %v566_v57, %v564_v56  ;;  %v568_v10 = vld [vmem:[%s2080_s3 + $0x648] sm:$0xff]  ;;  %v570_v11 = vld [vmem:[%s2080_s3 + $0x658] sm:$0xff] }
  0x34   :  { %985 = vmatprep.subr.bf16.mxu1 %v984_v22  ;;  %v1663_v17 = vshrl.u32 %v31_v16, 7  ;;  %v563_v5 = vld [vmem:[%s2080_s3 + $0x620] sm:$0xff]  ;;  %v445_v16 = vld [vmem:[%s2080_s3 + $0x270] sm:$0xff] }
  0x35   :  { %v1138_v14 = vpack.c.bf16 %v565_v6, %v563_v5  ;;  %v451_v44 = vld [vmem:[%s2080_s3 + $0x2a0] sm:$0xff]  ;;  %v457_v57 = vld [vmem:[%s2080_s3 + $0x2d0] sm:$0xff] }
  0x36   :  { %1115 = vmatpush1.bf16.msra.mxu0 %v1114_v28  ;;  %v33_v18 = vsub.s32 0, %v1663_v17  ;;  %v37_v20 = vsub.s32 1, %v1663_v17  ;;  %v49_v22 = vsub.s32 4, %v1663_v17  ;;  %v45_v23 = vsub.s32 3, %v1663_v17  ;;  %v455_v56 = vld [vmem:[%s2080_s3 + $0x2c0] sm:$0xff]  ;;  %v461_v6 = vld [vmem:[%s2080_s3 + $0x2f0] sm:$0xff] }
  0x37   :  { %987 = vmatpush1.bf16.msra.mxu1 %v986_v29  ;;  %1117 = vmatprep.subr.bf16.mxu0 %v1116_v31  ;;  %v53_v25 = vsub.s32 5, %v1663_v17  ;;  %v433_v31 = vld [vmem:[%s2080_s3 + $0x210] sm:$0xff]  ;;  %v61_v35 = vsub.s32 7, %v1663_v17  ;;  %v459_v5 = vld [vmem:[%s2080_s3 + $0x2e0] sm:$0xff] }
  0x38   :  { %989 = vmatprep.subr.bf16.mxu1 %v988_v34  ;;  %v34_v21 = vrot.slane %v1669_v19, %v33_v18  ;;  %v38_v24 = vrot.slane %v1669_v19, %v37_v20  ;;  %v50_v30 = vrot.slane %v1669_v19, %v49_v22  ;;  %v46_v34 = vrot.slane %v1669_v19, %v45_v23  ;;  %v567_v23 = vld [vmem:[%s2080_s3 + $0x640] sm:$0xff] }
  0x39   :  { %v54_v37 = vrot.slane %v1669_v19, %v53_v25  ;;  %v62_v53 = vrot.slane %v1669_v19, %v61_v35  ;;  %v1140_v22 = vpack.c.bf16 %v570_v11, %v568_v10  ;;  %v448_v25 = vld [vmem:[%s2080_s3 + $0x288] sm:$0xff]  ;;  %v571_v35 = vld [vmem:[%s2080_s3 + $0x660] sm:$0xff]  ;;  %v585_v10 = vld [vmem:[%s2080_s3 + $0x6d0] sm:$0xff] }
  0x3a   :  { %1119 = vmatpush1.bf16.msra.mxu0 %v1118_v40  ;;  %v464_v11 = vld [vmem:[%s2080_s3 + $0x308] sm:$0xff] }
  0x3b   :  { %991 = vmatpush1.bf16.msra.mxu1 %v990_v41  ;;  %1121 = vmatprep.subr.bf16.mxu0 %v1120_v42  ;;  %v1006_v41 = vpack.c.bf16 %v433_v31, %v431_v27  ;;  %v1008_v42 = vpack.c.bf16 %v438_v33, %v436_v32  ;;  %v572_v27 = vld [vmem:[%s2080_s3 + $0x668] sm:$0xff]  ;;  %v447_v31 = vld [vmem:[%s2080_s3 + $0x280] sm:$0xff]  ;;  %v449_v32 = vld [vmem:[%s2080_s3 + $0x290] sm:$0xff] }
  0x3c   :  { %993 = vmatprep.subr.bf16.mxu1 %v992_v45 }
  0x3e   :  { %1123 = vmatpush1.bf16.msra.mxu0 %v1122_v50  ;;  %v561_v50 = vld [vmem:[%s2080_s3 + $0x610] sm:$0xff] }
  0x3f   :  { %995 = vmatpush1.bf16.msra.mxu1 %v994_v51  ;;  %1125 = vmatprep.subr.bf16.mxu0 %v1124_v63  ;;  %v440_v51 = vld [vmem:[%s2080_s3 + $0x248] sm:$0xff]  ;;  %v1134_v62 = vpack.c.bf16 %v561_v50, %v559_v49  ;;  %v439_v63 = vld [vmem:[%s2080_s3 + $0x240] sm:$0xff]  ;;  %v577_v49 = vld [vmem:[%s2080_s3 + $0x690] sm:$0xff] }
  0x40   :  { %997 = vmatprep.subr.bf16.mxu1 %v996_v52  ;;  %v456_v50 = vld [vmem:[%s2080_s3 + $0x2c8] sm:$0xff] }
  0x42   :  { %1127 = vmatpush1.bf16.msra.mxu0 %v1126_v3 }
  0x43   :  { %999 = vmatpush1.bf16.msra.mxu1 %v998_v55  ;;  %1129 = vmatprep.subr.bf16.mxu0 %v1128_v9  ;;  %v442_v55 = vld [vmem:[%s2080_s3 + $0x258] sm:$0xff] }
  0x44   :  { %1001 = vmatprep.subr.bf16.mxu1 %v1000_v59  ;;  %v1012_v3 = vpack.c.bf16 %v442_v55, %v440_v51  ;;  %v446_v9 = vld [vmem:[%s2080_s3 + $0x278] sm:$0xff] }
  0x45   :  { %v458_v51 = vld [vmem:[%s2080_s3 + $0x2d8] sm:$0xff] }
  0x46   :  { %1131 = vmatpush1.bf16.msra.mxu0 %v1130_v12 }
  0x47   :  { %1003 = vmatpush1.bf16.msra.mxu1 %v1002_v0  ;;  %1133 = vmatprep.subr.bf16.mxu0 %v1132_v15  ;;  %v441_v0 = vld [vmem:[%s2080_s3 + $0x250] sm:$0xff]  ;;  %v443_v15 = vld [vmem:[%s2080_s3 + $0x260] sm:$0xff] }
  0x48   :  { %1005 = vmatprep.subr.bf16.mxu1 %v1004_v7  ;;  %v444_v7 = vld [vmem:[%s2080_s3 + $0x268] sm:$0xff]  ;;  %v1014_v13 = vpack.c.bf16 %v441_v0, %v439_v63  ;;  %v462_v0 = vld [vmem:[%s2080_s3 + $0x2f8] sm:$0xff] }
  0x49   :  { %v460_v63 = vld [vmem:[%s2080_s3 + $0x2e8] sm:$0xff] }
  0xd7   :  { %v141_v26 = vpop.f32.mrb[0].mxu0 }
  0xd8   :  { %v142_v28 = vadd.f32 %v141_v26, %v34_v21  ;;  %v143_v29 = vpop.f32.mrb[1].mxu0  ;;  %v1016_v21 = vpack.c.bf16 %v446_v9, %v444_v7  ;;  %v450_v26 = vld [vmem:[%s2080_s3 + $0x298] sm:$0xff]  ;;  %v1032_v7 = vpack.c.bf16 %v462_v0, %v460_v63  ;;  %v583_v9 = vld [vmem:[%s2080_s3 + $0x6c0] sm:$0xff]  ;;  %v601_v0 = vld [vmem:[%s2080_s3 + $0x750] sm:$0xff] }
  0xd9   :  { %v144_v36 = vadd.f32 %v143_v29, %v38_v24  ;;  %v1697_v38 = vpop.f32.mrb[0].mxu1  ;;  %v569_v24 = vld [vmem:[%s2080_s3 + $0x650] sm:$0xff]  ;;  %v1018_v29 = vpack.c.bf16 %v445_v16, %v443_v15  ;;  %v1020_v33 = vpack.c.bf16 %v450_v26, %v448_v25  ;;  %v1034_v15 = vpack.c.bf16 %v461_v6, %v459_v5  ;;  %v587_v25 = vld [vmem:[%s2080_s3 + $0x6e0] sm:$0xff] }
  0xda   :  { %v214_v45 = vpop.f32.mrb[1].mxu1  ;;  %v359_v46 = vmax.f32 %v142_v28, 0.0  ;;  %v574_v28 = vld [vmem:[%s2080_s3 + $0x678] sm:$0xff]  ;;  %v1158_v16 = vpack.c.bf16 %v585_v10, %v583_v9  ;;  %v589_v26 = vld [vmem:[%s2080_s3 + $0x6f0] sm:$0xff]  ;;  %v599_v63 = vld [vmem:[%s2080_s3 + $0x740] sm:$0xff] }
  0xdb   :  { %v360_v39 = vmax.f32 %v144_v36, 0.0  ;;  %v283_v40 = vpop.f32.mrb[2].mxu0  ;;  %v215_v52 = vadd.f32 %v214_v45, %v46_v34  ;;  %v1144_v34 = vpack.c.bf16 %v574_v28, %v572_v27  ;;  %v573_v36 = vld [vmem:[%s2080_s3 + $0x670] sm:$0xff]  ;;  %v468_v27 = vld [vmem:[%s2080_s3 + $0x328] sm:$0xff]  ;;  %v470_v28 = vld [vmem:[%s2080_s3 + $0x338] sm:$0xff]  ;;  %v1174_v6 = vpack.c.bf16 %v601_v0, %v599_v63 }
  0xdc   :  { %v284_v47 = vadd.f32 %v283_v40, %v50_v30  ;;  %v285_v48 = vpop.f32.mrb[3].mxu0  ;;  %v1142_v30 = vpack.c.bf16 %v569_v24, %v567_v23  ;;  %v576_v40 = vld [vmem:[%s2080_s3 + $0x688] sm:$0xff]  ;;  %v1146_v43 = vpack.c.bf16 %v573_v36, %v571_v35  ;;  %v453_v45 = vld [vmem:[%s2080_s3 + $0x2b0] sm:$0xff]  ;;  %v1040_v35 = vpack.c.bf16 %v470_v28, %v468_v27  ;;  %v607_v27 = vld [vmem:[%s2080_s3 + $0x780] sm:$0xff] }
  0xdd   :  { %v286_v54 = vadd.f32 %v285_v48, %v54_v37  ;;  %699 = vmatprep.mubr.f32.mxu1 %v360_v39  ;;  %v362_v58 = vmax.f32 %v215_v52, 0.0  ;;  %v1724_v59 = vpop.f32.mrb[2].mxu1  ;;  %v452_v37 = vld [vmem:[%s2080_s3 + $0x2a8] sm:$0xff]  ;;  %v454_v39 = vld [vmem:[%s2080_s3 + $0x2b8] sm:$0xff]  ;;  %v575_v48 = vld [vmem:[%s2080_s3 + $0x680] sm:$0xff] }
  0xde   :  { %700 = vmatmul.mubr.f32.vlgmr.msra.gmra.mrb[4].mxu1 %v359_v46  ;;  %v356_v1 = vpop.f32.mrb[3].mxu1  ;;  %v363_v2 = vmax.f32 %v284_v47, 0.0  ;;  %v1024_v46 = vpack.c.bf16 %v454_v39, %v452_v37  ;;  %v580_v52 = vld [vmem:[%s2080_s3 + $0x6a8] sm:$0xff]  ;;  %v1150_v55 = vpack.c.bf16 %v577_v49, %v575_v48  ;;  %v591_v37 = vld [vmem:[%s2080_s3 + $0x700] sm:$0xff]  ;;  %v593_v39 = vld [vmem:[%s2080_s3 + $0x710] sm:$0xff] }
  0xdf   :  { %v364_v60 = vmax.f32 %v286_v54, 0.0  ;;  %1007 = vmatpush1.bf16.msra.mxu1 %v1006_v41  ;;  %v357_v8 = vadd.f32 %v356_v1, %v62_v53  ;;  %770 = vmatprep.mubr.f32.mxu1 %v362_v58  ;;  %v578_v41 = vld [vmem:[%s2080_s3 + $0x698] sm:$0xff]  ;;  %v1026_v54 = vpack.c.bf16 %v453_v45, %v451_v44  ;;  %v1028_v58 = vpack.c.bf16 %v458_v51, %v456_v50  ;;  %v584_v1 = vld [vmem:[%s2080_s3 + $0x6c8] sm:$0xff]  ;;  %v595_v50 = vld [vmem:[%s2080_s3 + $0x720] sm:$0xff] }
  0xe0   :  { %1009 = vmatprep.subr.bf16.mxu1 %v1008_v42  ;;  %v1022_v42 = vpack.c.bf16 %v449_v32, %v447_v31  ;;  %v1148_v47 = vpack.c.bf16 %v578_v41, %v576_v40  ;;  %v582_v53 = vld [vmem:[%s2080_s3 + $0x6b8] sm:$0xff]  ;;  %v1162_v32 = vpack.c.bf16 %v589_v26, %v587_v25  ;;  %v472_v40 = vld [vmem:[%s2080_s3 + $0x348] sm:$0xff]  ;;  %v1166_v45 = vpack.c.bf16 %v593_v39, %v591_v37  ;;  %v597_v51 = vld [vmem:[%s2080_s3 + $0x730] sm:$0xff] }
  0xe1   :  { %841 = vmatprep.mubr.f32.mxu0 %v364_v60  ;;  %v366_v12 = vmax.f32 %v357_v8, 0.0  ;;  %v1152_v60 = vpack.c.bf16 %v582_v53, %v580_v52  ;;  %v474_v41 = vld [vmem:[%s2080_s3 + $0x358] sm:$0xff]  ;;  %v476_v52 = vld [vmem:[%s2080_s3 + $0x368] sm:$0xff]  ;;  %v609_v28 = vld [vmem:[%s2080_s3 + $0x790] sm:$0xff] }
  0xe2   :  { %842 = vmatmul.mubr.f32.vlgmr.msra.gmra.mrb[4].mxu0 %v363_v2  ;;  %v586_v2 = vld [vmem:[%s2080_s3 + $0x6d8] sm:$0xff]  ;;  %v1044_v48 = vpack.c.bf16 %v474_v41, %v472_v40  ;;  %v41_v40 = vsub.s32 2, %v1663_v17  ;;  %v611_v41 = vld [vmem:[%s2080_s3 + $0x7a0] sm:$0xff] }
  0xe3   :  { %1011 = vmatpush1.bf16.msra.mxu1 %v1010_v61  ;;  %1135 = vmatpush1.bf16.msra.mxu0 %v1134_v62  ;;  %v579_v61 = vld [vmem:[%s2080_s3 + $0x6a0] sm:$0xff]  ;;  %v581_v62 = vld [vmem:[%s2080_s3 + $0x6b0] sm:$0xff]  ;;  %v1156_v8 = vpack.c.bf16 %v586_v2, %v584_v1  ;;  %v478_v53 = vld [vmem:[%s2080_s3 + $0x378] sm:$0xff] }
  0xe4   :  { %1013 = vmatprep.subr.bf16.mxu1 %v1012_v3  ;;  %1137 = vmatprep.subr.bf16.mxu0 %v1136_v4  ;;  %v1030_v3 = vpack.c.bf16 %v457_v57, %v455_v56  ;;  %v1154_v4 = vpack.c.bf16 %v581_v62, %v579_v61  ;;  %v1170_v57 = vpack.c.bf16 %v597_v51, %v595_v50  ;;  %v480_v1 = vld [vmem:[%s2080_s3 + $0x388] sm:$0xff]  ;;  %v482_v2 = vld [vmem:[%s2080_s3 + $0x398] sm:$0xff] }
  0xe5   :  { %912 = vmatprep.mubr.f32.mxu0 %v366_v12  ;;  %v466_v12 = vld [vmem:[%s2080_s3 + $0x318] sm:$0xff]  ;;  %v1048_v61 = vpack.c.bf16 %v478_v53, %v476_v52  ;;  %v1052_v9 = vpack.c.bf16 %v482_v2, %v480_v1  ;;  %v42_v50 = vrot.slane %v1669_v19, %v41_v40  ;;  %v57_v53 = vsub.s32 6, %v1663_v17  ;;  %v619_v1 = vld [vmem:[%s2080_s3 + $0x7e0] sm:$0xff]  ;;  %v621_v2 = vld [vmem:[%s2080_s3 + $0x7f0] sm:$0xff] }
  0xe6   :  { %v1036_v23 = vpack.c.bf16 %v466_v12, %v464_v11  ;;  %v603_v11 = vld [vmem:[%s2080_s3 + $0x760] sm:$0xff]  ;;  %v605_v12 = vld [vmem:[%s2080_s3 + $0x770] sm:$0xff] }
  0xe7   :  { %1015 = vmatpush1.bf16.msra.mxu1 %v1014_v13  ;;  %1139 = vmatpush1.bf16.msra.mxu0 %v1138_v14  ;;  %v588_v13 = vld [vmem:[%s2080_s3 + $0x6e8] sm:$0xff]  ;;  %v590_v14 = vld [vmem:[%s2080_s3 + $0x6f8] sm:$0xff]  ;;  %v58_v63 = vrot.slane %v1669_v19, %v57_v53  ;;  %v623_v19 = vld [vmem:[%s2082_s4] sm:$0x3] }
  0xe8   :  { %1017 = vmatprep.subr.bf16.mxu1 %v1016_v21  ;;  %1141 = vmatprep.subr.bf16.mxu0 %v1140_v22  ;;  %v463_v21 = vld [vmem:[%s2080_s3 + $0x300] sm:$0xff]  ;;  %v465_v22 = vld [vmem:[%s2080_s3 + $0x310] sm:$0xff]  ;;  %v1160_v24 = vpack.c.bf16 %v590_v14, %v588_v13  ;;  %v484_v13 = vld [vmem:[%s2080_s3 + $0x3a8] sm:$0xff] }
  0xe9   :  { %v1038_v31 = vpack.c.bf16 %v465_v22, %v463_v21  ;;  %v486_v14 = vld [vmem:[%s2080_s3 + $0x3b8] sm:$0xff]  ;;  %v1178_v22 = vpack.c.bf16 %v605_v12, %v603_v11 }
  0xea   :  { %v1056_v25 = vpack.c.bf16 %v486_v14, %v484_v13 }
  0xeb   :  { %1019 = vmatpush1.bf16.msra.mxu1 %v1018_v29  ;;  %1143 = vmatpush1.bf16.msra.mxu0 %v1142_v30  ;;  %v592_v29 = vld [vmem:[%s2080_s3 + $0x708] sm:$0xff]  ;;  %v594_v30 = vld [vmem:[%s2080_s3 + $0x718] sm:$0xff] }
  0xec   :  { %1021 = vmatprep.subr.bf16.mxu1 %v1020_v33  ;;  %1145 = vmatprep.subr.bf16.mxu0 %v1144_v34  ;;  %v467_v33 = vld [vmem:[%s2080_s3 + $0x320] sm:$0xff]  ;;  %v469_v34 = vld [vmem:[%s2080_s3 + $0x330] sm:$0xff]  ;;  %v1164_v36 = vpack.c.bf16 %v594_v30, %v592_v29  ;;  %v488_v29 = vld [vmem:[%s2080_s3 + $0x3c8] sm:$0xff] }
  0xed   :  { %v1042_v44 = vpack.c.bf16 %v469_v34, %v467_v33  ;;  %v490_v30 = vld [vmem:[%s2080_s3 + $0x3d8] sm:$0xff]  ;;  %v1182_v34 = vpack.c.bf16 %v609_v28, %v607_v27 }
  0xee   :  { %v1060_v37 = vpack.c.bf16 %v490_v30, %v488_v29 }
  0xef   :  { %1023 = vmatpush1.bf16.msra.mxu1 %v1022_v42  ;;  %1147 = vmatpush1.bf16.msra.mxu0 %v1146_v43  ;;  %v596_v42 = vld [vmem:[%s2080_s3 + $0x728] sm:$0xff]  ;;  %v598_v43 = vld [vmem:[%s2080_s3 + $0x738] sm:$0xff] }
  0xf0   :  { %1025 = vmatprep.subr.bf16.mxu1 %v1024_v46  ;;  %1149 = vmatprep.subr.bf16.mxu0 %v1148_v47  ;;  %v471_v46 = vld [vmem:[%s2080_s3 + $0x340] sm:$0xff]  ;;  %v473_v47 = vld [vmem:[%s2080_s3 + $0x350] sm:$0xff]  ;;  %v1168_v49 = vpack.c.bf16 %v598_v43, %v596_v42  ;;  %v492_v43 = vld [vmem:[%s2080_s3 + $0x3e8] sm:$0xff] }
  0xf1   :  { %v1046_v56 = vpack.c.bf16 %v473_v47, %v471_v46  ;;  %v613_v42 = vld [vmem:[%s2080_s3 + $0x7b0] sm:$0xff]  ;;  %v618_v46 = vld [vmem:[%s2080_s3 + $0x7d8] sm:$0xff] }
  0xf3   :  { %1027 = vmatpush1.bf16.msra.mxu1 %v1026_v54  ;;  %1151 = vmatpush1.bf16.msra.mxu0 %v1150_v55  ;;  %v600_v54 = vld [vmem:[%s2080_s3 + $0x748] sm:$0xff]  ;;  %v602_v55 = vld [vmem:[%s2080_s3 + $0x758] sm:$0xff] }
  0xf4   :  { %1029 = vmatprep.subr.bf16.mxu1 %v1028_v58  ;;  %1153 = vmatprep.subr.bf16.mxu0 %v1152_v60  ;;  %v475_v58 = vld [vmem:[%s2080_s3 + $0x360] sm:$0xff]  ;;  %v477_v60 = vld [vmem:[%s2080_s3 + $0x370] sm:$0xff]  ;;  %v1172_v62 = vpack.c.bf16 %v602_v55, %v600_v54 }
  0xf5   :  { %v1050_v5 = vpack.c.bf16 %v477_v60, %v475_v58  ;;  %v493_v54 = vld [vmem:[%s2080_s3 + $0x3f0] sm:$0xff]  ;;  %v615_v55 = vld [vmem:[%s2080_s3 + $0x7c0] sm:$0xff]  ;;  %v622_v58 = vld [vmem:[%s2080_s3 + $0x7f8] sm:$0xff] }
  0xf7   :  { %1031 = vmatpush1.bf16.msra.mxu1 %v1030_v3  ;;  %1155 = vmatpush1.bf16.msra.mxu0 %v1154_v4  ;;  %v604_v3 = vld [vmem:[%s2080_s3 + $0x768] sm:$0xff]  ;;  %v606_v4 = vld [vmem:[%s2080_s3 + $0x778] sm:$0xff] }
  0xf8   :  { %1033 = vmatprep.subr.bf16.mxu1 %v1032_v7  ;;  %1157 = vmatprep.subr.bf16.mxu0 %v1156_v8  ;;  %v479_v7 = vld [vmem:[%s2080_s3 + $0x380] sm:$0xff]  ;;  %v481_v8 = vld [vmem:[%s2080_s3 + $0x390] sm:$0xff]  ;;  %v1176_v10 = vpack.c.bf16 %v606_v4, %v604_v3  ;;  %v1194_v3 = vpack.c.bf16 %v621_v2, %v619_v1 }
  0xf9   :  { %v1054_v21 = vpack.c.bf16 %v481_v8, %v479_v7  ;;  %v632_v8 = vrot.slane %v623_v19, %v37_v20 }
  0xfb   :  { %1035 = vmatpush1.bf16.msra.mxu1 %v1034_v15  ;;  %1159 = vmatpush1.bf16.msra.mxu0 %v1158_v16  ;;  %v608_v15 = vld [vmem:[%s2080_s3 + $0x788] sm:$0xff]  ;;  %v610_v16 = vld [vmem:[%s2080_s3 + $0x798] sm:$0xff] }
  0xfc   :  { %1037 = vmatprep.subr.bf16.mxu1 %v1036_v23  ;;  %1161 = vmatprep.subr.bf16.mxu0 %v1160_v24  ;;  %v483_v23 = vld [vmem:[%s2080_s3 + $0x3a0] sm:$0xff]  ;;  %v485_v24 = vld [vmem:[%s2080_s3 + $0x3b0] sm:$0xff]  ;;  %v1180_v26 = vpack.c.bf16 %v610_v16, %v608_v15 }
  0xfd   :  { %v1058_v33 = vpack.c.bf16 %v485_v24, %v483_v23 }
  0xff   :  { %1039 = vmatpush1.bf16.msra.mxu1 %v1038_v31  ;;  %1163 = vmatpush1.bf16.msra.mxu0 %v1162_v32  ;;  %v612_v31 = vld [vmem:[%s2080_s3 + $0x7a8] sm:$0xff]  ;;  %v614_v32 = vld [vmem:[%s2080_s3 + $0x7b8] sm:$0xff] }
 0x100   :  { %1041 = vmatprep.subr.bf16.mxu1 %v1040_v35  ;;  %1165 = vmatprep.subr.bf16.mxu0 %v1164_v36  ;;  %v487_v35 = vld [vmem:[%s2080_s3 + $0x3c0] sm:$0xff]  ;;  %v489_v36 = vld [vmem:[%s2080_s3 + $0x3d0] sm:$0xff]  ;;  %v1184_v39 = vpack.c.bf16 %v614_v32, %v612_v31 }
 0x101   :  { %v1062_v47 = vpack.c.bf16 %v489_v36, %v487_v35 }
 0x103   :  { %1043 = vmatpush1.bf16.msra.mxu1 %v1042_v44  ;;  %1167 = vmatpush1.bf16.msra.mxu0 %v1166_v45  ;;  %v494_v44 = vld [vmem:[%s2080_s3 + $0x3f8] sm:$0xff]  ;;  %v616_v45 = vld [vmem:[%s2080_s3 + $0x7c8] sm:$0xff] }
 0x104   :  { %1045 = vmatprep.subr.bf16.mxu1 %v1044_v48  ;;  %1169 = vmatprep.subr.bf16.mxu0 %v1168_v49  ;;  %v1186_v48 = vpack.c.bf16 %v613_v42, %v611_v41  ;;  %v491_v49 = vld [vmem:[%s2080_s3 + $0x3e0] sm:$0xff]  ;;  %v1064_v51 = vpack.c.bf16 %v494_v44, %v492_v43  ;;  %v1188_v52 = vpack.c.bf16 %v618_v46, %v616_v45 }
 0x105   :  { %v1066_v60 = vpack.c.bf16 %v493_v54, %v491_v49 }
 0x107   :  { %1047 = vmatpush1.bf16.msra.mxu1 %v1046_v56  ;;  %1171 = vmatpush1.bf16.msra.mxu0 %v1170_v57  ;;  %v617_v56 = vld [vmem:[%s2080_s3 + $0x7d0] sm:$0xff]  ;;  %v620_v57 = vld [vmem:[%s2080_s3 + $0x7e8] sm:$0xff] }
 0x108   :  { %1049 = vmatprep.subr.bf16.mxu1 %v1048_v61  ;;  %1173 = vmatprep.subr.bf16.mxu0 %v1172_v62  ;;  %v1190_v61 = vpack.c.bf16 %v617_v56, %v615_v55  ;;  %v213_v62 = vadd.f32 %v1697_v38, %v42_v50  ;;  %v1192_v0 = vpack.c.bf16 %v622_v58, %v620_v57 }
 0x10a   :  { %v361_v4 = vmax.f32 %v213_v62, 0.0 }
 0x10b   :  { %1051 = vmatpush1.bf16.msra.mxu1 %v1050_v5  ;;  %1175 = vmatpush1.bf16.msra.mxu0 %v1174_v6  ;;  %v355_v5 = vadd.f32 %v1724_v59, %v58_v63  ;;  %v628_v6 = vrot.slane %v623_v19, %v33_v18 }
 0x10c   :  { %1053 = vmatprep.subr.bf16.mxu1 %v1052_v9  ;;  %1177 = vmatprep.subr.bf16.mxu0 %v1176_v10 }
 0x10d   :  { %v365_v38 = vmax.f32 %v355_v5, 0.0 }
 0x10f   :  { %1055 = vmatpush1.bf16.msra.mxu1 %v1054_v21  ;;  %1179 = vmatpush1.bf16.msra.mxu0 %v1178_v22 }
 0x110   :  { %1057 = vmatprep.subr.bf16.mxu1 %v1056_v25  ;;  %1181 = vmatprep.subr.bf16.mxu0 %v1180_v26 }
 0x113   :  { %1059 = vmatpush1.bf16.msra.mxu1 %v1058_v33  ;;  %1183 = vmatpush1.bf16.msra.mxu0 %v1182_v34 }
 0x114   :  { %1061 = vmatprep.subr.bf16.mxu1 %v1060_v37  ;;  %1185 = vmatprep.subr.bf16.mxu0 %v1184_v39 }
 0x117   :  { %1063 = vmatpush1.bf16.msra.mxu1 %v1062_v47  ;;  %1187 = vmatpush1.bf16.msra.mxu0 %v1186_v48 }
 0x118   :  { %1065 = vmatprep.subr.bf16.mxu1 %v1064_v51  ;;  %1189 = vmatprep.subr.bf16.mxu0 %v1188_v52 }
 0x11b   :  { %1067 = vmatpush1.bf16.msra.mxu1 %v1066_v60  ;;  %1191 = vmatpush1.bf16.msra.mxu0 %v1190_v61 }
 0x11c   :  { %1193 = vmatprep.subr.bf16.mxu0 %v1192_v0 }
 0x11e   :  { %771 = vmatmul.mubr.f32.vlgmr.msra.gmra.mrb[4].mxu1 %v361_v4 }
 0x11f   :  { %1195 = vmatpush1.bf16.msra.mxu0 %v1194_v3 }
 0x122   :  { %913 = vmatmul.mubr.f32.vlgmr.msra.gmra.mrb[4].mxu0 %v365_v38 }
 0x1f1   :  { %v772_v7 = vpop.f32.mrb[4].mxu1 }
 0x1f2   :  { %v774_v9 = vpop.f32.mrb[5].mxu1  ;;  %v1196_v10 = vadd.f32 %v772_v7, %v628_v6 }
 0x1f3   :  { %v1198_v11 = vadd.f32 %v774_v9, %v632_v8 }
 0x1f5   :  { %v914_v59 = vpop.f32.mrb[4].mxu0 }
 0x1f6   :  { %v1197_v12 = vadd.f32 %v1196_v10, %v914_v59  ;;  %v916_v13 = vpop.f32.mrb[5].mxu0 }
 0x1f7   :  { %v1199_v14 = vadd.f32 %v1198_v11, %v916_v13 }
 0x1f9   :  { %v921_v15 = vcombine.low %v1197_v12, %v1199_v14 }
 0x1fb   :  { %939 = vst.sshfl [vmem:[%s2083_s5] sm:$0x33 pattern:$0x76325410] %v921_v15 }

// kernel: a2c_forward.7
= control target key start
LH: loop header
LB: loop body
LE: loop exit
PB: predicated region body
PF: predicated region fallthrough
CT: control target
= control target key end

     0   :  { %s3607_s18 = smov 0   ;;  %s4619_s0 = inlined_call_operand.vmem [shape: f32[2,768], index: 0, kind: input, shape index: {}]   ;;  %s4620_s1 = inlined_call_operand.vmem [shape: f32[3,768,1024], index: 1, kind: input, shape index: {}]   ;;  %s4621_s2 = inlined_call_operand.vmem [shape: f32[3,1,1024], index: 2, kind: input, shape index: {}]   ;;  %s4622_s3 = inlined_call_operand.vmem [shape: f32[3,1024,128], index: 3, kind: input, shape index: {}]   ;;  %s4623_s4 = inlined_call_operand.vmem [shape: f32[3,1,128], index: 4, kind: input, shape index: {}]   ;;  %s4624_s5 = inlined_call_operand.vmem [shape: f32[3,2,128], index: 5, kind: output, shape index: {}]  }
   0x1 LB: > { %s2481_s19 = sadd.s32 4294967295, %s3574_s18   ;;  %p2485_p0 = scmp.ge.s32.totalorder %s3574_s18, 1  ;;  %s3574_s18 = sphi %s3607_s18, %s15_s18  }
   0x2   : > { %p214_p1 = scmp.lt.s32.totalorder %s3574_s18, 4 }
   0x4   : > { %p215_p2 = pnand %p2485_p0, %p214_p1 }
   0x5   : > { %p253_p3 = scmp.lt.s32.totalorder (!%p215_p2), %s2481_s19, 2  ;;  %v1046_v0 = vlaneseq (!%p215_p2)  ;;  %v3576_v1 = vmov (!%p215_p2), 1983009808   ;;  %v3623_v5 = vld [vmem:[%s4619_s0] sm:$0xff] (!%p215_p2) }
   0x6   : > { %218 = sbr.rel (%p215_p2) target bundleno = 843 (0x34b), region = 40  ;;  %v1090_v2 = vunpack.c.l.s4 (!%p215_p2), %v3576_v1 }
   0x7   : > { %v3617_v3 = vshrl.u32 (!%p215_p2), %v1046_v0, 7 }
   0x8   : > { %v1091_v4 = vunpack.c.0.s8 (!%p215_p2), %v1090_v2 }
   0xa   : > { %v3626_v6 = vsub.s32 (!%p215_p2), %v1091_v4, %v3617_v3 }
   0xc   : > { %v3638_v10 = vrot.slane (!%p215_p2), %v3623_v5, %v3626_v6 }
   0xd   : > { %s4626_s19 = smov (!%p253_p3, %s2481_s19), 2 }
   0xe   : > { %s3556_s20 = smul.u32 6144, %s4626_s19  ;;  %v3648_v20 = vcombine.high %v3638_v10, %v3638_v10  ;;  %s2495_s28 = sshll.u32 %s4626_s19, 10 }
   0xf   : > { %s4449_s6 = scalar_lea.vmem %s4622_s3, %s2495_s28  ;;  %s2487_s9 = sshll.u32 %s4626_s19, 3 }
  0x10   : > { %s3631_s25 = scalar_lea.vmem %s4620_s1, %s3556_s20  ;;  %1183 = vmatprep.mubr.f32.mxu0 %v3648_v20  ;;  %1396 = vmatprep.mubr.f32.mxu1 %v3648_v20  ;;  %s261_s12 = scalar_lea.vmem %s4621_s2, %s2487_s9 }
  0x11   : > { %v277_v7 = vld [vmem:[%s3631_s25 + $0x8] sm:$0xff]  ;;  %v279_v9 = vld [vmem:[%s3631_s25 + $0x18] sm:$0xff]  ;;  %v276_v13 = vld [vmem:[%s3631_s25] sm:$0xff]  ;;  %s269_s15 = scalar_lea.vmem %s4623_s4, %s4626_s19  ;;  %s2490_s16 = sshll.u32 %s4626_s19, 1 }
  0x12   : > { %v285_v8 = vld [vmem:[%s3631_s25 + $0x48] sm:$0xff]  ;;  %v287_v12 = vld [vmem:[%s3631_s25 + $0x58] sm:$0xff]  ;;  %v284_v14 = vld [vmem:[%s3631_s25 + $0x40] sm:$0xff]  ;;  %s273_s21 = scalar_lea.vmem %s4624_s5, %s2490_s16 }
  0x13   : > { %v2636_v11 = vpack.c.bf16 %v285_v8, %v277_v7  ;;  %v2828_v15 = vpack.c.bf16 %v287_v12, %v279_v9  ;;  %v2638_v16 = vpack.c.bf16 %v284_v14, %v276_v13  ;;  %v278_v17 = vld [vmem:[%s3631_s25 + $0x10] sm:$0xff]  ;;  %v293_v19 = vld [vmem:[%s3631_s25 + $0x88] sm:$0xff]  ;;  %v295_v23 = vld [vmem:[%s3631_s25 + $0x98] sm:$0xff] }
  0x14   : > { %v286_v18 = vld [vmem:[%s3631_s25 + $0x50] sm:$0xff]  ;;  %v301_v22 = vld [vmem:[%s3631_s25 + $0xc8] sm:$0xff]  ;;  %v303_v24 = vld [vmem:[%s3631_s25 + $0xd8] sm:$0xff] }
  0x15   : > { %2637 = vmatprep.subr.bf16.mxu0 %v2636_v11  ;;  %v2830_v21 = vpack.c.bf16 %v286_v18, %v278_v17  ;;  %2829 = vmatprep.subr.bf16.mxu1 %v2828_v15  ;;  %v2640_v25 = vpack.c.bf16 %v301_v22, %v293_v19  ;;  %v2832_v26 = vpack.c.bf16 %v303_v24, %v295_v23  ;;  %v292_v27 = vld [vmem:[%s3631_s25 + $0x80] sm:$0xff]  ;;  %v294_v29 = vld [vmem:[%s3631_s25 + $0x90] sm:$0xff]  ;;  %v309_v32 = vld [vmem:[%s3631_s25 + $0x108] sm:$0xff] }
  0x16   : > { %2639 = vmatpush1.bf16.msra.mxu0 %v2638_v16  ;;  %v300_v28 = vld [vmem:[%s3631_s25 + $0xc0] sm:$0xff]  ;;  %v302_v31 = vld [vmem:[%s3631_s25 + $0xd0] sm:$0xff]  ;;  %v317_v33 = vld [vmem:[%s3631_s25 + $0x148] sm:$0xff] }
  0x17   : > { %2831 = vmatpush1.bf16.msra.mxu1 %v2830_v21  ;;  %v2642_v30 = vpack.c.bf16 %v300_v28, %v292_v27  ;;  %2641 = vmatprep.subr.bf16.mxu0 %v2640_v25  ;;  %v2834_v34 = vpack.c.bf16 %v302_v31, %v294_v29  ;;  %v2644_v35 = vpack.c.bf16 %v317_v33, %v309_v32  ;;  %v311_v36 = vld [vmem:[%s3631_s25 + $0x118] sm:$0xff]  ;;  %v308_v38 = vld [vmem:[%s3631_s25 + $0x100] sm:$0xff]  ;;  %v310_v41 = vld [vmem:[%s3631_s25 + $0x110] sm:$0xff] }
  0x18   : > { %2833 = vmatprep.subr.bf16.mxu1 %v2832_v26  ;;  %v319_v37 = vld [vmem:[%s3631_s25 + $0x158] sm:$0xff]  ;;  %v316_v40 = vld [vmem:[%s3631_s25 + $0x140] sm:$0xff]  ;;  %v318_v42 = vld [vmem:[%s3631_s25 + $0x150] sm:$0xff] }
  0x19   : > { %v2836_v39 = vpack.c.bf16 %v319_v37, %v311_v36  ;;  %v2646_v43 = vpack.c.bf16 %v316_v40, %v308_v38  ;;  %v325_v44 = vld [vmem:[%s3631_s25 + $0x188] sm:$0xff]  ;;  %v327_v46 = vld [vmem:[%s3631_s25 + $0x198] sm:$0xff]  ;;  %v2838_v47 = vpack.c.bf16 %v318_v42, %v310_v41  ;;  %v324_v50 = vld [vmem:[%s3631_s25 + $0x180] sm:$0xff] }
  0x1a   : > { %2643 = vmatpush1.bf16.msra.mxu0 %v2642_v30  ;;  %v333_v45 = vld [vmem:[%s3631_s25 + $0x1c8] sm:$0xff]  ;;  %v335_v49 = vld [vmem:[%s3631_s25 + $0x1d8] sm:$0xff]  ;;  %v332_v51 = vld [vmem:[%s3631_s25 + $0x1c0] sm:$0xff] }
  0x1b   : > { %2835 = vmatpush1.bf16.msra.mxu1 %v2834_v34  ;;  %2645 = vmatprep.subr.bf16.mxu0 %v2644_v35  ;;  %v2648_v48 = vpack.c.bf16 %v333_v45, %v325_v44  ;;  %v2840_v52 = vpack.c.bf16 %v335_v49, %v327_v46  ;;  %v326_v53 = vld [vmem:[%s3631_s25 + $0x190] sm:$0xff]  ;;  %v341_v55 = vld [vmem:[%s3631_s25 + $0x208] sm:$0xff]  ;;  %v343_v57 = vld [vmem:[%s3631_s25 + $0x218] sm:$0xff]  ;;  %v2650_v59 = vpack.c.bf16 %v332_v51, %v324_v50 }
  0x1c   : > { %2837 = vmatprep.subr.bf16.mxu1 %v2836_v39  ;;  %v334_v54 = vld [vmem:[%s3631_s25 + $0x1d0] sm:$0xff]  ;;  %v349_v56 = vld [vmem:[%s3631_s25 + $0x248] sm:$0xff]  ;;  %v351_v58 = vld [vmem:[%s3631_s25 + $0x258] sm:$0xff] }
  0x1d   : > { %v2842_v60 = vpack.c.bf16 %v334_v54, %v326_v53  ;;  %v2652_v61 = vpack.c.bf16 %v349_v56, %v341_v55  ;;  %v340_v62 = vld [vmem:[%s3631_s25 + $0x200] sm:$0xff]  ;;  %v342_v0 = vld [vmem:[%s3631_s25 + $0x210] sm:$0xff]  ;;  %v2844_v1 = vpack.c.bf16 %v351_v58, %v343_v57  ;;  %v357_v4 = vld [vmem:[%s3631_s25 + $0x288] sm:$0xff] }
  0x1e   : > { %2647 = vmatpush1.bf16.msra.mxu0 %v2646_v43  ;;  %v348_v63 = vld [vmem:[%s3631_s25 + $0x240] sm:$0xff]  ;;  %v350_v2 = vld [vmem:[%s3631_s25 + $0x250] sm:$0xff]  ;;  %v365_v7 = vld [vmem:[%s3631_s25 + $0x2c8] sm:$0xff] }
  0x1f   : > { %2839 = vmatpush1.bf16.msra.mxu1 %v2838_v47  ;;  %2649 = vmatprep.subr.bf16.mxu0 %v2648_v48  ;;  %v359_v8 = vld [vmem:[%s3631_s25 + $0x298] sm:$0xff]  ;;  %v2654_v11 = vpack.c.bf16 %v348_v63, %v340_v62  ;;  %v2846_v12 = vpack.c.bf16 %v350_v2, %v342_v0  ;;  %v2656_v13 = vpack.c.bf16 %v365_v7, %v357_v4  ;;  %v356_v14 = vld [vmem:[%s3631_s25 + $0x280] sm:$0xff]  ;;  %v358_v16 = vld [vmem:[%s3631_s25 + $0x290] sm:$0xff] }
  0x20   : > { %2841 = vmatprep.subr.bf16.mxu1 %v2840_v52  ;;  %v367_v9 = vld [vmem:[%s3631_s25 + $0x2d8] sm:$0xff]  ;;  %v364_v15 = vld [vmem:[%s3631_s25 + $0x2c0] sm:$0xff]  ;;  %v366_v18 = vld [vmem:[%s3631_s25 + $0x2d0] sm:$0xff] }
  0x21   : > { %v2848_v17 = vpack.c.bf16 %v367_v9, %v359_v8  ;;  %v373_v19 = vld [vmem:[%s3631_s25 + $0x308] sm:$0xff]  ;;  %v375_v22 = vld [vmem:[%s3631_s25 + $0x318] sm:$0xff]  ;;  %v2658_v24 = vpack.c.bf16 %v364_v15, %v356_v14  ;;  %v2850_v25 = vpack.c.bf16 %v366_v18, %v358_v16  ;;  %v372_v27 = vld [vmem:[%s3631_s25 + $0x300] sm:$0xff] }
  0x22   : > { %2651 = vmatpush1.bf16.msra.mxu0 %v2650_v59  ;;  %v381_v21 = vld [vmem:[%s3631_s25 + $0x348] sm:$0xff]  ;;  %v383_v23 = vld [vmem:[%s3631_s25 + $0x358] sm:$0xff]  ;;  %v380_v28 = vld [vmem:[%s3631_s25 + $0x340] sm:$0xff] }
  0x23   : > { %2843 = vmatpush1.bf16.msra.mxu1 %v2842_v60  ;;  %2653 = vmatprep.subr.bf16.mxu0 %v2652_v61  ;;  %v2660_v26 = vpack.c.bf16 %v381_v21, %v373_v19  ;;  %v374_v29 = vld [vmem:[%s3631_s25 + $0x310] sm:$0xff]  ;;  %v2852_v30 = vpack.c.bf16 %v383_v23, %v375_v22  ;;  %v389_v32 = vld [vmem:[%s3631_s25 + $0x388] sm:$0xff]  ;;  %v391_v34 = vld [vmem:[%s3631_s25 + $0x398] sm:$0xff]  ;;  %v2662_v36 = vpack.c.bf16 %v380_v28, %v372_v27 }
  0x24   : > { %2845 = vmatprep.subr.bf16.mxu1 %v2844_v1  ;;  %v382_v31 = vld [vmem:[%s3631_s25 + $0x350] sm:$0xff]  ;;  %v397_v33 = vld [vmem:[%s3631_s25 + $0x3c8] sm:$0xff]  ;;  %v399_v35 = vld [vmem:[%s3631_s25 + $0x3d8] sm:$0xff] }
  0x25   : > { %v2854_v37 = vpack.c.bf16 %v382_v31, %v374_v29  ;;  %v2664_v38 = vpack.c.bf16 %v397_v33, %v389_v32  ;;  %v388_v39 = vld [vmem:[%s3631_s25 + $0x380] sm:$0xff]  ;;  %v390_v41 = vld [vmem:[%s3631_s25 + $0x390] sm:$0xff]  ;;  %v2856_v42 = vpack.c.bf16 %v399_v35, %v391_v34  ;;  %v405_v44 = vld [vmem:[%s3631_s25 + $0x408] sm:$0xff] }
  0x26   : > { %2655 = vmatpush1.bf16.msra.mxu0 %v2654_v11  ;;  %v396_v40 = vld [vmem:[%s3631_s25 + $0x3c0] sm:$0xff]  ;;  %v398_v43 = vld [vmem:[%s3631_s25 + $0x3d0] sm:$0xff]  ;;  %v413_v45 = vld [vmem:[%s3631_s25 + $0x448] sm:$0xff] }
  0x27   : > { %2847 = vmatpush1.bf16.msra.mxu1 %v2846_v12  ;;  %2657 = vmatprep.subr.bf16.mxu0 %v2656_v13  ;;  %v407_v46 = vld [vmem:[%s3631_s25 + $0x418] sm:$0xff]  ;;  %v2666_v48 = vpack.c.bf16 %v396_v40, %v388_v39  ;;  %v2858_v49 = vpack.c.bf16 %v398_v43, %v390_v41  ;;  %v2668_v50 = vpack.c.bf16 %v413_v45, %v405_v44  ;;  %v404_v51 = vld [vmem:[%s3631_s25 + $0x400] sm:$0xff]  ;;  %v406_v53 = vld [vmem:[%s3631_s25 + $0x410] sm:$0xff] }
  0x28   : > { %2849 = vmatprep.subr.bf16.mxu1 %v2848_v17  ;;  %v415_v47 = vld [vmem:[%s3631_s25 + $0x458] sm:$0xff]  ;;  %v412_v52 = vld [vmem:[%s3631_s25 + $0x440] sm:$0xff]  ;;  %v414_v55 = vld [vmem:[%s3631_s25 + $0x450] sm:$0xff] }
  0x29   : > { %v2860_v54 = vpack.c.bf16 %v415_v47, %v407_v46  ;;  %v421_v56 = vld [vmem:[%s3631_s25 + $0x488] sm:$0xff]  ;;  %v423_v58 = vld [vmem:[%s3631_s25 + $0x498] sm:$0xff]  ;;  %v2670_v60 = vpack.c.bf16 %v412_v52, %v404_v51  ;;  %v2862_v61 = vpack.c.bf16 %v414_v55, %v406_v53  ;;  %v420_v63 = vld [vmem:[%s3631_s25 + $0x480] sm:$0xff] }
  0x2a   : > { %2659 = vmatpush1.bf16.msra.mxu0 %v2658_v24  ;;  %v429_v57 = vld [vmem:[%s3631_s25 + $0x4c8] sm:$0xff]  ;;  %v431_v59 = vld [vmem:[%s3631_s25 + $0x4d8] sm:$0xff]  ;;  %v428_v0 = vld [vmem:[%s3631_s25 + $0x4c0] sm:$0xff] }
  0x2b   : > { %2851 = vmatpush1.bf16.msra.mxu1 %v2850_v25  ;;  %2661 = vmatprep.subr.bf16.mxu0 %v2660_v26  ;;  %v2672_v62 = vpack.c.bf16 %v429_v57, %v421_v56  ;;  %v422_v1 = vld [vmem:[%s3631_s25 + $0x490] sm:$0xff]  ;;  %v2864_v2 = vpack.c.bf16 %v431_v59, %v423_v58  ;;  %v437_v7 = vld [vmem:[%s3631_s25 + $0x508] sm:$0xff]  ;;  %v439_v9 = vld [vmem:[%s3631_s25 + $0x518] sm:$0xff]  ;;  %v2674_v12 = vpack.c.bf16 %v428_v0, %v420_v63 }
  0x2c   : > { %2853 = vmatprep.subr.bf16.mxu1 %v2852_v30  ;;  %v430_v4 = vld [vmem:[%s3631_s25 + $0x4d0] sm:$0xff]  ;;  %v445_v8 = vld [vmem:[%s3631_s25 + $0x548] sm:$0xff]  ;;  %v447_v11 = vld [vmem:[%s3631_s25 + $0x558] sm:$0xff] }
  0x2d   : > { %v2866_v13 = vpack.c.bf16 %v430_v4, %v422_v1  ;;  %v2676_v14 = vpack.c.bf16 %v445_v8, %v437_v7  ;;  %v436_v15 = vld [vmem:[%s3631_s25 + $0x500] sm:$0xff]  ;;  %v438_v17 = vld [vmem:[%s3631_s25 + $0x510] sm:$0xff]  ;;  %v2868_v18 = vpack.c.bf16 %v447_v11, %v439_v9  ;;  %v453_v21 = vld [vmem:[%s3631_s25 + $0x588] sm:$0xff] }
  0x2e   : > { %2663 = vmatpush1.bf16.msra.mxu0 %v2662_v36  ;;  %v444_v16 = vld [vmem:[%s3631_s25 + $0x540] sm:$0xff]  ;;  %v446_v19 = vld [vmem:[%s3631_s25 + $0x550] sm:$0xff]  ;;  %v461_v22 = vld [vmem:[%s3631_s25 + $0x5c8] sm:$0xff] }
  0x2f   : > { %2855 = vmatpush1.bf16.msra.mxu1 %v2854_v37  ;;  %2665 = vmatprep.subr.bf16.mxu0 %v2664_v38  ;;  %v455_v23 = vld [vmem:[%s3631_s25 + $0x598] sm:$0xff]  ;;  %v2678_v25 = vpack.c.bf16 %v444_v16, %v436_v15  ;;  %v2870_v26 = vpack.c.bf16 %v446_v19, %v438_v17  ;;  %v2680_v27 = vpack.c.bf16 %v461_v22, %v453_v21  ;;  %v452_v28 = vld [vmem:[%s3631_s25 + $0x580] sm:$0xff]  ;;  %v454_v30 = vld [vmem:[%s3631_s25 + $0x590] sm:$0xff] }
  0x30   : > { %2857 = vmatprep.subr.bf16.mxu1 %v2856_v42  ;;  %v463_v24 = vld [vmem:[%s3631_s25 + $0x5d8] sm:$0xff]  ;;  %v460_v29 = vld [vmem:[%s3631_s25 + $0x5c0] sm:$0xff]  ;;  %v462_v32 = vld [vmem:[%s3631_s25 + $0x5d0] sm:$0xff] }
  0x31   : > { %v2872_v31 = vpack.c.bf16 %v463_v24, %v455_v23  ;;  %v469_v33 = vld [vmem:[%s3631_s25 + $0x608] sm:$0xff]  ;;  %v471_v35 = vld [vmem:[%s3631_s25 + $0x618] sm:$0xff]  ;;  %v2682_v37 = vpack.c.bf16 %v460_v29, %v452_v28  ;;  %v2874_v38 = vpack.c.bf16 %v462_v32, %v454_v30  ;;  %v468_v40 = vld [vmem:[%s3631_s25 + $0x600] sm:$0xff]  ;;  %v1088_v24 = vcombine.high %v3623_v5, %v3623_v5 }
  0x32   : > { %2667 = vmatpush1.bf16.msra.mxu0 %v2666_v48  ;;  %v477_v34 = vld [vmem:[%s3631_s25 + $0x648] sm:$0xff]  ;;  %v479_v36 = vld [vmem:[%s3631_s25 + $0x658] sm:$0xff]  ;;  %v476_v41 = vld [vmem:[%s3631_s25 + $0x640] sm:$0xff] }
  0x33   : > { %2859 = vmatpush1.bf16.msra.mxu1 %v2858_v49  ;;  %2669 = vmatprep.subr.bf16.mxu0 %v2668_v50  ;;  %v2684_v39 = vpack.c.bf16 %v477_v34, %v469_v33  ;;  %v470_v42 = vld [vmem:[%s3631_s25 + $0x610] sm:$0xff]  ;;  %v2876_v43 = vpack.c.bf16 %v479_v36, %v471_v35  ;;  %v485_v45 = vld [vmem:[%s3631_s25 + $0x688] sm:$0xff]  ;;  %v487_v47 = vld [vmem:[%s3631_s25 + $0x698] sm:$0xff]  ;;  %v2686_v49 = vpack.c.bf16 %v476_v41, %v468_v40 }
  0x34   : > { %2861 = vmatprep.subr.bf16.mxu1 %v2860_v54  ;;  %v478_v44 = vld [vmem:[%s3631_s25 + $0x650] sm:$0xff]  ;;  %v493_v46 = vld [vmem:[%s3631_s25 + $0x6c8] sm:$0xff]  ;;  %v495_v48 = vld [vmem:[%s3631_s25 + $0x6d8] sm:$0xff]  ;;  %v3784_v36 = vrot.slane %v1088_v24, %v3626_v6 }
  0x35   : > { %v2878_v50 = vpack.c.bf16 %v478_v44, %v470_v42  ;;  %v2688_v51 = vpack.c.bf16 %v493_v46, %v485_v45  ;;  %v484_v52 = vld [vmem:[%s3631_s25 + $0x680] sm:$0xff]  ;;  %v486_v54 = vld [vmem:[%s3631_s25 + $0x690] sm:$0xff]  ;;  %v2880_v55 = vpack.c.bf16 %v495_v48, %v487_v47  ;;  %v501_v57 = vld [vmem:[%s3631_s25 + $0x708] sm:$0xff] }
  0x36   : > { %2671 = vmatpush1.bf16.msra.mxu0 %v2670_v60  ;;  %v492_v53 = vld [vmem:[%s3631_s25 + $0x6c0] sm:$0xff]  ;;  %v494_v56 = vld [vmem:[%s3631_s25 + $0x6d0] sm:$0xff]  ;;  %v509_v58 = vld [vmem:[%s3631_s25 + $0x748] sm:$0xff]  ;;  %v3796_v48 = vcombine.high %v3784_v36, %v3784_v36 }
  0x37   : > { %2863 = vmatpush1.bf16.msra.mxu1 %v2862_v61  ;;  %2673 = vmatprep.subr.bf16.mxu0 %v2672_v62  ;;  %v503_v59 = vld [vmem:[%s3631_s25 + $0x718] sm:$0xff]  ;;  %v2690_v61 = vpack.c.bf16 %v492_v53, %v484_v52  ;;  %v2882_v62 = vpack.c.bf16 %v494_v56, %v486_v54  ;;  %v2692_v63 = vpack.c.bf16 %v509_v58, %v501_v57  ;;  %v500_v0 = vld [vmem:[%s3631_s25 + $0x700] sm:$0xff]  ;;  %v510_v7 = vld [vmem:[%s3631_s25 + $0x750] sm:$0xff] }
  0x38   : > { %2865 = vmatprep.subr.bf16.mxu1 %v2864_v2  ;;  %v511_v60 = vld [vmem:[%s3631_s25 + $0x758] sm:$0xff]  ;;  %v508_v1 = vld [vmem:[%s3631_s25 + $0x740] sm:$0xff]  ;;  %v502_v2 = vld [vmem:[%s3631_s25 + $0x710] sm:$0xff] }
  0x39   : > { %v2884_v4 = vpack.c.bf16 %v511_v60, %v503_v59  ;;  %v517_v8 = vld [vmem:[%s3631_s25 + $0x788] sm:$0xff]  ;;  %v519_v11 = vld [vmem:[%s3631_s25 + $0x798] sm:$0xff]  ;;  %v516_v16 = vld [vmem:[%s3631_s25 + $0x780] sm:$0xff] }
  0x3a   : > { %2675 = vmatpush1.bf16.msra.mxu0 %v2674_v12  ;;  %v525_v9 = vld [vmem:[%s3631_s25 + $0x7c8] sm:$0xff]  ;;  %v527_v12 = vld [vmem:[%s3631_s25 + $0x7d8] sm:$0xff]  ;;  %v524_v17 = vld [vmem:[%s3631_s25 + $0x7c0] sm:$0xff] }
  0x3b   : > { %2867 = vmatpush1.bf16.msra.mxu1 %v2866_v13  ;;  %2677 = vmatprep.subr.bf16.mxu0 %v2676_v14  ;;  %v2694_v13 = vpack.c.bf16 %v508_v1, %v500_v0  ;;  %v2886_v14 = vpack.c.bf16 %v510_v7, %v502_v2  ;;  %v2696_v15 = vpack.c.bf16 %v525_v9, %v517_v8  ;;  %v526_v21 = vld [vmem:[%s3631_s25 + $0x7d0] sm:$0xff]  ;;  %v533_v22 = vld [vmem:[%s3631_s25 + $0x808] sm:$0xff]  ;;  %v532_v30 = vld [vmem:[%s3631_s25 + $0x800] sm:$0xff] }
  0x3c   : > { %2869 = vmatprep.subr.bf16.mxu1 %v2868_v18  ;;  %v518_v18 = vld [vmem:[%s3631_s25 + $0x790] sm:$0xff]  ;;  %v2888_v19 = vpack.c.bf16 %v527_v12, %v519_v11  ;;  %v541_v23 = vld [vmem:[%s3631_s25 + $0x848] sm:$0xff]  ;;  %v548_v42 = vld [vmem:[%s3631_s25 + $0x880] sm:$0xff] }
  0x3d   : > { %v2890_v28 = vpack.c.bf16 %v526_v21, %v518_v18  ;;  %v2700_v29 = vpack.c.bf16 %v541_v23, %v533_v22  ;;  %v534_v32 = vld [vmem:[%s3631_s25 + $0x810] sm:$0xff]  ;;  %v549_v34 = vld [vmem:[%s3631_s25 + $0x888] sm:$0xff]  ;;  %v564_v54 = vld [vmem:[%s3631_s25 + $0x900] sm:$0xff] }
  0x3e   : > { %2679 = vmatpush1.bf16.msra.mxu0 %v2678_v25  ;;  %v535_v25 = vld [vmem:[%s3631_s25 + $0x818] sm:$0xff]  ;;  %v542_v5 = vld [vmem:[%s3631_s25 + $0x850] sm:$0xff]  ;;  %v557_v35 = vld [vmem:[%s3631_s25 + $0x8c8] sm:$0xff] }
  0x3f   : > { %2871 = vmatpush1.bf16.msra.mxu1 %v2870_v26  ;;  %2681 = vmatprep.subr.bf16.mxu0 %v2680_v27  ;;  %v543_v26 = vld [vmem:[%s3631_s25 + $0x858] sm:$0xff]  ;;  %v2698_v27 = vpack.c.bf16 %v524_v17, %v516_v16  ;;  %v2894_v40 = vpack.c.bf16 %v542_v5, %v534_v32  ;;  %v2704_v41 = vpack.c.bf16 %v557_v35, %v549_v34  ;;  %v550_v44 = vld [vmem:[%s3631_s25 + $0x890] sm:$0xff]  ;;  %v565_v46 = vld [vmem:[%s3631_s25 + $0x908] sm:$0xff] }
  0x40   : > { %2873 = vmatprep.subr.bf16.mxu1 %v2872_v31  ;;  %v540_v31 = vld [vmem:[%s3631_s25 + $0x840] sm:$0xff]  ;;  %v2892_v33 = vpack.c.bf16 %v543_v26, %v535_v25  ;;  %v558_v6 = vld [vmem:[%s3631_s25 + $0x8d0] sm:$0xff]  ;;  %v573_v47 = vld [vmem:[%s3631_s25 + $0x948] sm:$0xff] }
  0x41   : > { %v2898_v52 = vpack.c.bf16 %v558_v6, %v550_v44  ;;  %v2708_v53 = vpack.c.bf16 %v573_v47, %v565_v46  ;;  %v566_v56 = vld [vmem:[%s3631_s25 + $0x910] sm:$0xff]  ;;  %v581_v59 = vld [vmem:[%s3631_s25 + $0x988] sm:$0xff]  ;;  %v580_v2 = vld [vmem:[%s3631_s25 + $0x980] sm:$0xff] }
  0x42   : > { %2683 = vmatpush1.bf16.msra.mxu0 %v2682_v37  ;;  %v551_v37 = vld [vmem:[%s3631_s25 + $0x898] sm:$0xff]  ;;  %v574_v58 = vld [vmem:[%s3631_s25 + $0x950] sm:$0xff]  ;;  %v589_v60 = vld [vmem:[%s3631_s25 + $0x9c8] sm:$0xff] }
  0x43   : > { %2875 = vmatpush1.bf16.msra.mxu1 %v2874_v38  ;;  %2685 = vmatprep.subr.bf16.mxu0 %v2684_v39  ;;  %v559_v38 = vld [vmem:[%s3631_s25 + $0x8d8] sm:$0xff]  ;;  %v2702_v39 = vpack.c.bf16 %v540_v31, %v532_v30  ;;  %v2902_v0 = vpack.c.bf16 %v574_v58, %v566_v56  ;;  %v2712_v1 = vpack.c.bf16 %v589_v60, %v581_v59  ;;  %v582_v7 = vld [vmem:[%s3631_s25 + $0x990] sm:$0xff]  ;;  %v597_v11 = vld [vmem:[%s3631_s25 + $0xa08] sm:$0xff] }
  0x44   : > { %2877 = vmatprep.subr.bf16.mxu1 %v2876_v43  ;;  %v556_v43 = vld [vmem:[%s3631_s25 + $0x8c0] sm:$0xff]  ;;  %v2896_v45 = vpack.c.bf16 %v559_v38, %v551_v37  ;;  %v590_v9 = vld [vmem:[%s3631_s25 + $0x9d0] sm:$0xff]  ;;  %v605_v12 = vld [vmem:[%s3631_s25 + $0xa48] sm:$0xff] }
  0x45   : > { %v2906_v16 = vpack.c.bf16 %v590_v9, %v582_v7  ;;  %v2716_v17 = vpack.c.bf16 %v605_v12, %v597_v11  ;;  %v596_v18 = vld [vmem:[%s3631_s25 + $0xa00] sm:$0xff]  ;;  %v598_v21 = vld [vmem:[%s3631_s25 + $0xa10] sm:$0xff]  ;;  %v613_v24 = vld [vmem:[%s3631_s25 + $0xa88] sm:$0xff] }
  0x46   : > { %2687 = vmatpush1.bf16.msra.mxu0 %v2686_v49  ;;  %v567_v49 = vld [vmem:[%s3631_s25 + $0x918] sm:$0xff]  ;;  %v606_v23 = vld [vmem:[%s3631_s25 + $0xa50] sm:$0xff]  ;;  %v621_v25 = vld [vmem:[%s3631_s25 + $0xac8] sm:$0xff] }
  0x47   : > { %2879 = vmatpush1.bf16.msra.mxu1 %v2878_v50  ;;  %2689 = vmatprep.subr.bf16.mxu0 %v2688_v51  ;;  %v575_v50 = vld [vmem:[%s3631_s25 + $0x958] sm:$0xff]  ;;  %v2706_v51 = vpack.c.bf16 %v556_v43, %v548_v42  ;;  %v2720_v30 = vpack.c.bf16 %v621_v25, %v613_v24  ;;  %v612_v31 = vld [vmem:[%s3631_s25 + $0xa80] sm:$0xff]  ;;  %v622_v34 = vld [vmem:[%s3631_s25 + $0xad0] sm:$0xff] }
  0x48   : > { %2881 = vmatprep.subr.bf16.mxu1 %v2880_v55  ;;  %v572_v55 = vld [vmem:[%s3631_s25 + $0x940] sm:$0xff]  ;;  %v2900_v57 = vpack.c.bf16 %v575_v50, %v567_v49  ;;  %v615_v26 = vld [vmem:[%s3631_s25 + $0xa98] sm:$0xff]  ;;  %v629_v35 = vld [vmem:[%s3631_s25 + $0xb08] sm:$0xff] }
  0x49   : > { %v620_v32 = vld [vmem:[%s3631_s25 + $0xac0] sm:$0xff]  ;;  %v637_v37 = vld [vmem:[%s3631_s25 + $0xb48] sm:$0xff]  ;;  %v631_v38 = vld [vmem:[%s3631_s25 + $0xb18] sm:$0xff] }
  0x4a   : > { %2691 = vmatpush1.bf16.msra.mxu0 %v2690_v61  ;;  %v583_v61 = vld [vmem:[%s3631_s25 + $0x998] sm:$0xff]  ;;  %v2724_v42 = vpack.c.bf16 %v637_v37, %v629_v35  ;;  %v628_v43 = vld [vmem:[%s3631_s25 + $0xb00] sm:$0xff]  ;;  %v638_v46 = vld [vmem:[%s3631_s25 + $0xb50] sm:$0xff] }
  0x4b   : > { %2883 = vmatpush1.bf16.msra.mxu1 %v2882_v62  ;;  %2693 = vmatprep.subr.bf16.mxu0 %v2692_v63  ;;  %v591_v62 = vld [vmem:[%s3631_s25 + $0x9d8] sm:$0xff]  ;;  %v2710_v63 = vpack.c.bf16 %v572_v55, %v564_v54  ;;  %v636_v44 = vld [vmem:[%s3631_s25 + $0xb40] sm:$0xff]  ;;  %v645_v47 = vld [vmem:[%s3631_s25 + $0xb88] sm:$0xff] }
  0x4c   : > { %2885 = vmatprep.subr.bf16.mxu1 %v2884_v4  ;;  %v588_v4 = vld [vmem:[%s3631_s25 + $0x9c0] sm:$0xff]  ;;  %v2904_v8 = vpack.c.bf16 %v591_v62, %v583_v61  ;;  %v653_v49 = vld [vmem:[%s3631_s25 + $0xbc8] sm:$0xff]  ;;  %v647_v50 = vld [vmem:[%s3631_s25 + $0xb98] sm:$0xff] }
  0x4d   : > { %v2728_v54 = vpack.c.bf16 %v653_v49, %v645_v47  ;;  %v644_v55 = vld [vmem:[%s3631_s25 + $0xb80] sm:$0xff]  ;;  %v654_v59 = vld [vmem:[%s3631_s25 + $0xbd0] sm:$0xff]  ;;  %v661_v60 = vld [vmem:[%s3631_s25 + $0xc08] sm:$0xff] }
  0x4e   : > { %2695 = vmatpush1.bf16.msra.mxu0 %v2694_v13  ;;  %v599_v13 = vld [vmem:[%s3631_s25 + $0xa18] sm:$0xff]  ;;  %v652_v56 = vld [vmem:[%s3631_s25 + $0xbc0] sm:$0xff]  ;;  %v669_v61 = vld [vmem:[%s3631_s25 + $0xc48] sm:$0xff] }
  0x4f   : > { %2887 = vmatpush1.bf16.msra.mxu1 %v2886_v14  ;;  %2697 = vmatprep.subr.bf16.mxu0 %v2696_v15  ;;  %v607_v14 = vld [vmem:[%s3631_s25 + $0xa58] sm:$0xff]  ;;  %v2714_v15 = vpack.c.bf16 %v588_v4, %v580_v2  ;;  %v2732_v2 = vpack.c.bf16 %v669_v61, %v661_v60  ;;  %v660_v4 = vld [vmem:[%s3631_s25 + $0xc00] sm:$0xff]  ;;  %v670_v11 = vld [vmem:[%s3631_s25 + $0xc50] sm:$0xff] }
  0x50   : > { %2889 = vmatprep.subr.bf16.mxu1 %v2888_v19  ;;  %v604_v19 = vld [vmem:[%s3631_s25 + $0xa40] sm:$0xff]  ;;  %v2908_v22 = vpack.c.bf16 %v607_v14, %v599_v13  ;;  %v663_v62 = vld [vmem:[%s3631_s25 + $0xc18] sm:$0xff]  ;;  %v677_v12 = vld [vmem:[%s3631_s25 + $0xc88] sm:$0xff] }
  0x51   : > { %v668_v7 = vld [vmem:[%s3631_s25 + $0xc40] sm:$0xff]  ;;  %v685_v13 = vld [vmem:[%s3631_s25 + $0xcc8] sm:$0xff]  ;;  %v679_v14 = vld [vmem:[%s3631_s25 + $0xc98] sm:$0xff] }
  0x52   : > { %2699 = vmatpush1.bf16.msra.mxu0 %v2698_v27  ;;  %v623_v27 = vld [vmem:[%s3631_s25 + $0xad8] sm:$0xff]  ;;  %v686_v24 = vld [vmem:[%s3631_s25 + $0xcd0] sm:$0xff]  ;;  %v693_v25 = vld [vmem:[%s3631_s25 + $0xd08] sm:$0xff] }
  0x53   : > { %2891 = vmatpush1.bf16.msra.mxu1 %v2890_v28  ;;  %2701 = vmatprep.subr.bf16.mxu0 %v2700_v29  ;;  %v2718_v28 = vpack.c.bf16 %v604_v19, %v596_v18  ;;  %v2910_v29 = vpack.c.bf16 %v606_v23, %v598_v21  ;;  %v2912_v5 = vpack.c.bf16 %v623_v27, %v615_v26  ;;  %v676_v19 = vld [vmem:[%s3631_s25 + $0xc80] sm:$0xff]  ;;  %v701_v26 = vld [vmem:[%s3631_s25 + $0xd48] sm:$0xff]  ;;  %v695_v27 = vld [vmem:[%s3631_s25 + $0xd18] sm:$0xff] }
  0x54   : > { %2893 = vmatprep.subr.bf16.mxu1 %v2892_v33  ;;  %v614_v33 = vld [vmem:[%s3631_s25 + $0xa90] sm:$0xff]  ;;  %v2736_v18 = vpack.c.bf16 %v685_v13, %v677_v12  ;;  %v684_v21 = vld [vmem:[%s3631_s25 + $0xcc0] sm:$0xff]  ;;  %v709_v37 = vld [vmem:[%s3631_s25 + $0xd88] sm:$0xff] }
  0x55   : > { %1184 = vmatmul.mubr.f32.vlgmr.msra.gmra.mrb[0].mxu0 %v3638_v10  ;;  %v702_v35 = vld [vmem:[%s3631_s25 + $0xd50] sm:$0xff]  ;;  %v725_v49 = vld [vmem:[%s3631_s25 + $0xe08] sm:$0xff] }
  0x56   : > { %2703 = vmatpush1.bf16.msra.mxu0 %v2702_v39  ;;  %1397 = vmatmul.mubr.f32.vlgmr.msra.gmra.mrb[0].mxu1 %v3638_v10  ;;  %v639_v39 = vld [vmem:[%s3631_s25 + $0xb58] sm:$0xff]  ;;  %v718_v47 = vld [vmem:[%s3631_s25 + $0xdd0] sm:$0xff]  ;;  %v741_v61 = vld [vmem:[%s3631_s25 + $0xe88] sm:$0xff] }
  0x57   : > { %2895 = vmatpush1.bf16.msra.mxu1 %v2894_v40  ;;  %2705 = vmatprep.subr.bf16.mxu0 %v2704_v41  ;;  %v2722_v40 = vpack.c.bf16 %v620_v32, %v612_v31  ;;  %v2914_v41 = vpack.c.bf16 %v622_v34, %v614_v33  ;;  %v2916_v6 = vpack.c.bf16 %v639_v39, %v631_v38  ;;  %v692_v32 = vld [vmem:[%s3631_s25 + $0xd00] sm:$0xff]  ;;  %v717_v38 = vld [vmem:[%s3631_s25 + $0xdc8] sm:$0xff]  ;;  %v711_v39 = vld [vmem:[%s3631_s25 + $0xd98] sm:$0xff] }
  0x58   : > { %2897 = vmatprep.subr.bf16.mxu1 %v2896_v45  ;;  %1254 = vmatprep.mubr.f32.mxu0 %v3796_v48  ;;  %v630_v45 = vld [vmem:[%s3631_s25 + $0xb10] sm:$0xff]  ;;  %v2740_v31 = vpack.c.bf16 %v701_v26, %v693_v25  ;;  %v700_v33 = vld [vmem:[%s3631_s25 + $0xd40] sm:$0xff]  ;;  %v757_v13 = vld [vmem:[%s3631_s25 + $0xf08] sm:$0xff] }
  0x59   : > { %1467 = vmatprep.mubr.f32.mxu1 %v3796_v48  ;;  %v734_v60 = vld [vmem:[%s3631_s25 + $0xe50] sm:$0xff]  ;;  %v773_v26 = vld [vmem:[%s3631_s25 + $0xf88] sm:$0xff] }
  0x5a   : > { %2707 = vmatpush1.bf16.msra.mxu0 %v2706_v51  ;;  %v655_v51 = vld [vmem:[%s3631_s25 + $0xbd8] sm:$0xff]  ;;  %v750_v12 = vld [vmem:[%s3631_s25 + $0xed0] sm:$0xff] }
  0x5b   : > { %2899 = vmatpush1.bf16.msra.mxu1 %v2898_v52  ;;  %2709 = vmatprep.subr.bf16.mxu0 %v2708_v53  ;;  %v2726_v52 = vpack.c.bf16 %v636_v44, %v628_v43  ;;  %v2918_v53 = vpack.c.bf16 %v638_v46, %v630_v45  ;;  %v2920_v58 = vpack.c.bf16 %v655_v51, %v647_v50  ;;  %v708_v44 = vld [vmem:[%s3631_s25 + $0xd80] sm:$0xff]  ;;  %v733_v50 = vld [vmem:[%s3631_s25 + $0xe48] sm:$0xff]  ;;  %v727_v51 = vld [vmem:[%s3631_s25 + $0xe18] sm:$0xff] }
  0x5c   : > { %2901 = vmatprep.subr.bf16.mxu1 %v2900_v57  ;;  %v646_v57 = vld [vmem:[%s3631_s25 + $0xb90] sm:$0xff]  ;;  %v2744_v43 = vpack.c.bf16 %v717_v38, %v709_v37  ;;  %v716_v45 = vld [vmem:[%s3631_s25 + $0xdc0] sm:$0xff]  ;;  %v789_v38 = vld [vmem:[%s3631_s25 + $0x1008] sm:$0xff] }
  0x5d   : > { %v766_v25 = vld [vmem:[%s3631_s25 + $0xf50] sm:$0xff] }
  0x5e   : > { %2711 = vmatpush1.bf16.msra.mxu0 %v2710_v63  ;;  %v671_v63 = vld [vmem:[%s3631_s25 + $0xc58] sm:$0xff]  ;;  %v782_v37 = vld [vmem:[%s3631_s25 + $0xfd0] sm:$0xff] }
  0x5f   : > { %2903 = vmatpush1.bf16.msra.mxu1 %v2902_v0  ;;  %2713 = vmatprep.subr.bf16.mxu0 %v2712_v1  ;;  %v2730_v0 = vpack.c.bf16 %v652_v56, %v644_v55  ;;  %v2922_v1 = vpack.c.bf16 %v654_v59, %v646_v57  ;;  %v2924_v9 = vpack.c.bf16 %v671_v63, %v663_v62  ;;  %v724_v56 = vld [vmem:[%s3631_s25 + $0xe00] sm:$0xff]  ;;  %v749_v62 = vld [vmem:[%s3631_s25 + $0xec8] sm:$0xff]  ;;  %v743_v63 = vld [vmem:[%s3631_s25 + $0xe98] sm:$0xff] }
  0x60   : > { %2905 = vmatprep.subr.bf16.mxu1 %v2904_v8  ;;  %v662_v8 = vld [vmem:[%s3631_s25 + $0xc10] sm:$0xff]  ;;  %v2748_v55 = vpack.c.bf16 %v733_v50, %v725_v49  ;;  %v732_v57 = vld [vmem:[%s3631_s25 + $0xe40] sm:$0xff]  ;;  %v805_v50 = vld [vmem:[%s3631_s25 + $0x1088] sm:$0xff] }
  0x61   : > { %v798_v49 = vld [vmem:[%s3631_s25 + $0x1050] sm:$0xff] }
  0x62   : > { %2715 = vmatpush1.bf16.msra.mxu0 %v2714_v15  ;;  %v687_v15 = vld [vmem:[%s3631_s25 + $0xcd8] sm:$0xff] }
  0x63   : > { %2907 = vmatpush1.bf16.msra.mxu1 %v2906_v16  ;;  %2717 = vmatprep.subr.bf16.mxu0 %v2716_v17  ;;  %v2734_v16 = vpack.c.bf16 %v668_v7, %v660_v4  ;;  %v2926_v17 = vpack.c.bf16 %v670_v11, %v662_v8  ;;  %v2928_v23 = vpack.c.bf16 %v687_v15, %v679_v14  ;;  %v740_v7 = vld [vmem:[%s3631_s25 + $0xe80] sm:$0xff]  ;;  %v765_v14 = vld [vmem:[%s3631_s25 + $0xf48] sm:$0xff]  ;;  %v759_v15 = vld [vmem:[%s3631_s25 + $0xf18] sm:$0xff] }
  0x64   : > { %2909 = vmatprep.subr.bf16.mxu1 %v2908_v22  ;;  %v678_v22 = vld [vmem:[%s3631_s25 + $0xc90] sm:$0xff]  ;;  %v2752_v4 = vpack.c.bf16 %v749_v62, %v741_v61  ;;  %v748_v8 = vld [vmem:[%s3631_s25 + $0xec0] sm:$0xff] }
  0x65   : > { %v814_v62 = vld [vmem:[%s3631_s25 + $0x10d0] sm:$0xff] }
  0x66   : > { %2719 = vmatpush1.bf16.msra.mxu0 %v2718_v28  ;;  %v703_v28 = vld [vmem:[%s3631_s25 + $0xd58] sm:$0xff] }
  0x67   : > { %2911 = vmatpush1.bf16.msra.mxu1 %v2910_v29  ;;  %2721 = vmatprep.subr.bf16.mxu0 %v2720_v30  ;;  %v2738_v29 = vpack.c.bf16 %v684_v21, %v676_v19  ;;  %v2930_v30 = vpack.c.bf16 %v686_v24, %v678_v22  ;;  %v2932_v34 = vpack.c.bf16 %v703_v28, %v695_v27  ;;  %v756_v21 = vld [vmem:[%s3631_s25 + $0xf00] sm:$0xff]  ;;  %v781_v27 = vld [vmem:[%s3631_s25 + $0xfc8] sm:$0xff]  ;;  %v775_v28 = vld [vmem:[%s3631_s25 + $0xf98] sm:$0xff] }
  0x68   : > { %2913 = vmatprep.subr.bf16.mxu1 %v2912_v5  ;;  %v694_v5 = vld [vmem:[%s3631_s25 + $0xd10] sm:$0xff]  ;;  %v2756_v19 = vpack.c.bf16 %v765_v14, %v757_v13  ;;  %v764_v22 = vld [vmem:[%s3631_s25 + $0xf40] sm:$0xff] }
  0x69   : > { %v822_v13 = vld [vmem:[%s3631_s25 + $0x1110] sm:$0xff] }
  0x6a   : > { %2723 = vmatpush1.bf16.msra.mxu0 %v2722_v40  ;;  %v719_v40 = vld [vmem:[%s3631_s25 + $0xdd8] sm:$0xff] }
  0x6b   : > { %2915 = vmatpush1.bf16.msra.mxu1 %v2914_v41  ;;  %2725 = vmatprep.subr.bf16.mxu0 %v2724_v42  ;;  %v2742_v41 = vpack.c.bf16 %v700_v33, %v692_v32  ;;  %v2934_v42 = vpack.c.bf16 %v702_v35, %v694_v5  ;;  %v2936_v46 = vpack.c.bf16 %v719_v40, %v711_v39  ;;  %v772_v33 = vld [vmem:[%s3631_s25 + $0xf80] sm:$0xff]  ;;  %v797_v39 = vld [vmem:[%s3631_s25 + $0x1048] sm:$0xff]  ;;  %v791_v40 = vld [vmem:[%s3631_s25 + $0x1018] sm:$0xff] }
  0x6c   : > { %2917 = vmatprep.subr.bf16.mxu1 %v2916_v6  ;;  %v710_v6 = vld [vmem:[%s3631_s25 + $0xd90] sm:$0xff]  ;;  %v2760_v32 = vpack.c.bf16 %v781_v27, %v773_v26  ;;  %v780_v5 = vld [vmem:[%s3631_s25 + $0xfc0] sm:$0xff] }
  0x6d   : > { %v838_v26 = vld [vmem:[%s3631_s25 + $0x1190] sm:$0xff] }
  0x6e   : > { %2727 = vmatpush1.bf16.msra.mxu0 %v2726_v52  ;;  %v735_v52 = vld [vmem:[%s3631_s25 + $0xe58] sm:$0xff] }
  0x6f   : > { %2919 = vmatpush1.bf16.msra.mxu1 %v2918_v53  ;;  %2729 = vmatprep.subr.bf16.mxu0 %v2728_v54  ;;  %v2746_v53 = vpack.c.bf16 %v716_v45, %v708_v44  ;;  %v2938_v54 = vpack.c.bf16 %v718_v47, %v710_v6  ;;  %v2940_v59 = vpack.c.bf16 %v735_v52, %v727_v51  ;;  %v788_v45 = vld [vmem:[%s3631_s25 + $0x1000] sm:$0xff]  ;;  %v813_v51 = vld [vmem:[%s3631_s25 + $0x10c8] sm:$0xff]  ;;  %v807_v52 = vld [vmem:[%s3631_s25 + $0x1098] sm:$0xff] }
  0x70   : > { %2921 = vmatprep.subr.bf16.mxu1 %v2920_v58  ;;  %v726_v58 = vld [vmem:[%s3631_s25 + $0xe10] sm:$0xff]  ;;  %v2764_v44 = vpack.c.bf16 %v797_v39, %v789_v38  ;;  %v796_v6 = vld [vmem:[%s3631_s25 + $0x1040] sm:$0xff] }
  0x71   : > { %v854_v38 = vld [vmem:[%s3631_s25 + $0x1210] sm:$0xff] }
  0x72   : > { %2731 = vmatpush1.bf16.msra.mxu0 %v2730_v0  ;;  %v751_v0 = vld [vmem:[%s3631_s25 + $0xed8] sm:$0xff] }
  0x73   : > { %2923 = vmatpush1.bf16.msra.mxu1 %v2922_v1  ;;  %2733 = vmatprep.subr.bf16.mxu0 %v2732_v2  ;;  %v2750_v1 = vpack.c.bf16 %v732_v57, %v724_v56  ;;  %v2942_v2 = vpack.c.bf16 %v734_v60, %v726_v58  ;;  %v2944_v11 = vpack.c.bf16 %v751_v0, %v743_v63  ;;  %v804_v58 = vld [vmem:[%s3631_s25 + $0x1080] sm:$0xff]  ;;  %v806_v60 = vld [vmem:[%s3631_s25 + $0x1090] sm:$0xff]  ;;  %v821_v63 = vld [vmem:[%s3631_s25 + $0x1108] sm:$0xff] }
  0x74   : > { %2925 = vmatprep.subr.bf16.mxu1 %v2924_v9  ;;  %v742_v9 = vld [vmem:[%s3631_s25 + $0xe90] sm:$0xff]  ;;  %v2768_v57 = vpack.c.bf16 %v813_v51, %v805_v50  ;;  %v829_v0 = vld [vmem:[%s3631_s25 + $0x1148] sm:$0xff] }
  0x75   : > { %v870_v50 = vld [vmem:[%s3631_s25 + $0x1290] sm:$0xff] }
  0x76   : > { %2735 = vmatpush1.bf16.msra.mxu0 %v2734_v16  ;;  %v767_v16 = vld [vmem:[%s3631_s25 + $0xf58] sm:$0xff] }
  0x77   : > { %2927 = vmatpush1.bf16.msra.mxu1 %v2926_v17  ;;  %2737 = vmatprep.subr.bf16.mxu0 %v2736_v18  ;;  %v2754_v17 = vpack.c.bf16 %v748_v8, %v740_v7  ;;  %v2946_v18 = vpack.c.bf16 %v750_v12, %v742_v9  ;;  %v2948_v24 = vpack.c.bf16 %v767_v16, %v759_v15  ;;  %v828_v12 = vld [vmem:[%s3631_s25 + $0x1140] sm:$0xff]  ;;  %v830_v15 = vld [vmem:[%s3631_s25 + $0x1150] sm:$0xff]  ;;  %v837_v16 = vld [vmem:[%s3631_s25 + $0x1188] sm:$0xff] }
  0x78   : > { %2929 = vmatprep.subr.bf16.mxu1 %v2928_v23  ;;  %v758_v23 = vld [vmem:[%s3631_s25 + $0xf10] sm:$0xff]  ;;  %v2962_v8 = vpack.c.bf16 %v814_v62, %v806_v60  ;;  %v2772_v9 = vpack.c.bf16 %v829_v0, %v821_v63  ;;  %v892_v62 = vld [vmem:[%s3631_s25 + $0x1340] sm:$0xff] }
  0x79   : > { %v886_v63 = vld [vmem:[%s3631_s25 + $0x1310] sm:$0xff] }
  0x7a   : > { %2739 = vmatpush1.bf16.msra.mxu0 %v2738_v29  ;;  %v783_v29 = vld [vmem:[%s3631_s25 + $0xfd8] sm:$0xff] }
  0x7b   : > { %2931 = vmatpush1.bf16.msra.mxu1 %v2930_v30  ;;  %2741 = vmatprep.subr.bf16.mxu0 %v2740_v31  ;;  %v2758_v30 = vpack.c.bf16 %v764_v22, %v756_v21  ;;  %v2950_v31 = vpack.c.bf16 %v766_v25, %v758_v23  ;;  %v2952_v35 = vpack.c.bf16 %v783_v29, %v775_v28  ;;  %v844_v25 = vld [vmem:[%s3631_s25 + $0x11c0] sm:$0xff]  ;;  %v846_v28 = vld [vmem:[%s3631_s25 + $0x11d0] sm:$0xff]  ;;  %v853_v29 = vld [vmem:[%s3631_s25 + $0x1208] sm:$0xff] }
  0x7c   : > { %2933 = vmatprep.subr.bf16.mxu1 %v2932_v34  ;;  %v774_v34 = vld [vmem:[%s3631_s25 + $0xf90] sm:$0xff]  ;;  %v2966_v22 = vpack.c.bf16 %v830_v15, %v822_v13  ;;  %v908_v15 = vld [vmem:[%s3631_s25 + $0x13c0] sm:$0xff] }
  0x7e   : > { %2743 = vmatpush1.bf16.msra.mxu0 %v2742_v41  ;;  %v799_v41 = vld [vmem:[%s3631_s25 + $0x1058] sm:$0xff] }
  0x7f   : > { %2935 = vmatpush1.bf16.msra.mxu1 %v2934_v42  ;;  %2745 = vmatprep.subr.bf16.mxu0 %v2744_v43  ;;  %v2762_v42 = vpack.c.bf16 %v780_v5, %v772_v33  ;;  %v2954_v43 = vpack.c.bf16 %v782_v37, %v774_v34  ;;  %v2956_v47 = vpack.c.bf16 %v799_v41, %v791_v40  ;;  %v860_v37 = vld [vmem:[%s3631_s25 + $0x1240] sm:$0xff]  ;;  %v862_v40 = vld [vmem:[%s3631_s25 + $0x1250] sm:$0xff]  ;;  %v869_v41 = vld [vmem:[%s3631_s25 + $0x1288] sm:$0xff] }
  0x80   : > { %2937 = vmatprep.subr.bf16.mxu1 %v2936_v46  ;;  %v790_v46 = vld [vmem:[%s3631_s25 + $0x1010] sm:$0xff]  ;;  %v2970_v5 = vpack.c.bf16 %v846_v28, %v838_v26  ;;  %v924_v28 = vld [vmem:[%s3631_s25 + $0x1440] sm:$0xff] }
  0x81   : > { %v2958_v56 = vpack.c.bf16 %v798_v49, %v790_v46  ;;  %v876_v49 = vld [vmem:[%s3631_s25 + $0x12c0] sm:$0xff] }
  0x82   : > { %2747 = vmatpush1.bf16.msra.mxu0 %v2746_v53  ;;  %v815_v53 = vld [vmem:[%s3631_s25 + $0x10d8] sm:$0xff] }
  0x83   : > { %2939 = vmatpush1.bf16.msra.mxu1 %v2938_v54  ;;  %2749 = vmatprep.subr.bf16.mxu0 %v2748_v55  ;;  %v2766_v54 = vpack.c.bf16 %v796_v6, %v788_v45  ;;  %v3927_v55 = vld.sshfl [vmem:[%s4619_s0 + $0x8] sm:$0x33 pattern:$0x76325410]  ;;  %v2960_v61 = vpack.c.bf16 %v815_v53, %v807_v52  ;;  %v2974_v6 = vpack.c.bf16 %v862_v40, %v854_v38  ;;  %v878_v52 = vld [vmem:[%s3631_s25 + $0x12d0] sm:$0xff]  ;;  %v940_v40 = vld [vmem:[%s3631_s25 + $0x14c0] sm:$0xff] }
  0x84   : > { %2941 = vmatprep.subr.bf16.mxu1 %v2940_v59  ;;  %v812_v59 = vld [vmem:[%s3631_s25 + $0x10c0] sm:$0xff]  ;;  %v885_v53 = vld [vmem:[%s3631_s25 + $0x1308] sm:$0xff] }
  0x85   : > { %v2770_v7 = vpack.c.bf16 %v812_v59, %v804_v58  ;;  %v2978_v59 = vpack.c.bf16 %v878_v52, %v870_v50  ;;  %v956_v52 = vld [vmem:[%s3631_s25 + $0x1540] sm:$0xff] }
  0x86   : > { %2751 = vmatpush1.bf16.msra.mxu0 %v2750_v1  ;;  %v3937_v1 = vcombine.high %v3927_v55, %v3927_v55 }
  0x87   : > { %2943 = vmatpush1.bf16.msra.mxu1 %v2942_v2  ;;  %2753 = vmatprep.subr.bf16.mxu0 %v2752_v4  ;;  %v823_v2 = vld [vmem:[%s3631_s25 + $0x1118] sm:$0xff] }
  0x88   : > { %2945 = vmatprep.subr.bf16.mxu1 %v2944_v11  ;;  %v831_v4 = vld [vmem:[%s3631_s25 + $0x1158] sm:$0xff]  ;;  %v820_v11 = vld [vmem:[%s3631_s25 + $0x1100] sm:$0xff] }
  0x89   : > { %v2964_v14 = vpack.c.bf16 %v831_v4, %v823_v2  ;;  %v2774_v21 = vpack.c.bf16 %v828_v12, %v820_v11  ;;  %v894_v2 = vld [vmem:[%s3631_s25 + $0x1350] sm:$0xff]  ;;  %v901_v4 = vld [vmem:[%s3631_s25 + $0x1388] sm:$0xff] }
  0x8a   : > { %2755 = vmatpush1.bf16.msra.mxu0 %v2754_v17  ;;  %v845_v17 = vld [vmem:[%s3631_s25 + $0x11c8] sm:$0xff]  ;;  %v2982_v12 = vpack.c.bf16 %v894_v2, %v886_v63  ;;  %v972_v2 = vld [vmem:[%s3631_s25 + $0x15c0] sm:$0xff] }
  0x8b   : > { %2947 = vmatpush1.bf16.msra.mxu1 %v2946_v18  ;;  %2757 = vmatprep.subr.bf16.mxu0 %v2756_v19  ;;  %v839_v18 = vld [vmem:[%s3631_s25 + $0x1198] sm:$0xff]  ;;  %v2776_v23 = vpack.c.bf16 %v845_v17, %v837_v16  ;;  %v902_v16 = vld [vmem:[%s3631_s25 + $0x1390] sm:$0xff] }
  0x8c   : > { %2949 = vmatprep.subr.bf16.mxu1 %v2948_v24  ;;  %v847_v19 = vld [vmem:[%s3631_s25 + $0x11d8] sm:$0xff]  ;;  %v836_v24 = vld [vmem:[%s3631_s25 + $0x1180] sm:$0xff] }
  0x8d   : > { %v2968_v27 = vpack.c.bf16 %v847_v19, %v839_v18  ;;  %v2778_v33 = vpack.c.bf16 %v844_v25, %v836_v24  ;;  %v910_v18 = vld [vmem:[%s3631_s25 + $0x13d0] sm:$0xff]  ;;  %v917_v19 = vld [vmem:[%s3631_s25 + $0x1408] sm:$0xff] }
  0x8e   : > { %2759 = vmatpush1.bf16.msra.mxu0 %v2758_v30  ;;  %v861_v30 = vld [vmem:[%s3631_s25 + $0x1248] sm:$0xff]  ;;  %v2986_v25 = vpack.c.bf16 %v910_v18, %v902_v16  ;;  %v988_v18 = vld [vmem:[%s3631_s25 + $0x1640] sm:$0xff] }
  0x8f   : > { %2951 = vmatpush1.bf16.msra.mxu1 %v2950_v31  ;;  %2761 = vmatprep.subr.bf16.mxu0 %v2760_v32  ;;  %v855_v31 = vld [vmem:[%s3631_s25 + $0x1218] sm:$0xff]  ;;  %v2780_v34 = vpack.c.bf16 %v861_v30, %v853_v29  ;;  %v918_v29 = vld [vmem:[%s3631_s25 + $0x1410] sm:$0xff] }
  0x90   : > { %2953 = vmatprep.subr.bf16.mxu1 %v2952_v35  ;;  %v863_v32 = vld [vmem:[%s3631_s25 + $0x1258] sm:$0xff]  ;;  %v852_v35 = vld [vmem:[%s3631_s25 + $0x1200] sm:$0xff] }
  0x91   : > { %v2972_v39 = vpack.c.bf16 %v863_v32, %v855_v31  ;;  %v2782_v45 = vpack.c.bf16 %v860_v37, %v852_v35  ;;  %v926_v31 = vld [vmem:[%s3631_s25 + $0x1450] sm:$0xff]  ;;  %v933_v32 = vld [vmem:[%s3631_s25 + $0x1488] sm:$0xff] }
  0x92   : > { %2763 = vmatpush1.bf16.msra.mxu0 %v2762_v42  ;;  %v877_v42 = vld [vmem:[%s3631_s25 + $0x12c8] sm:$0xff]  ;;  %v2990_v37 = vpack.c.bf16 %v926_v31, %v918_v29  ;;  %v1004_v31 = vld [vmem:[%s3631_s25 + $0x16c0] sm:$0xff] }
  0x93   : > { %2955 = vmatpush1.bf16.msra.mxu1 %v2954_v43  ;;  %2765 = vmatprep.subr.bf16.mxu0 %v2764_v44  ;;  %v871_v43 = vld [vmem:[%s3631_s25 + $0x1298] sm:$0xff]  ;;  %v2784_v46 = vpack.c.bf16 %v877_v42, %v869_v41  ;;  %v934_v41 = vld [vmem:[%s3631_s25 + $0x1490] sm:$0xff] }
  0x94   : > { %2957 = vmatprep.subr.bf16.mxu1 %v2956_v47  ;;  %v879_v44 = vld [vmem:[%s3631_s25 + $0x12d8] sm:$0xff]  ;;  %v868_v47 = vld [vmem:[%s3631_s25 + $0x1280] sm:$0xff] }
  0x95   : > { %1255 = vmatmul.mubr.f32.vlgmr.msra.gmra.mrb[0].mxu0 %v3784_v36  ;;  %v2976_v51 = vpack.c.bf16 %v879_v44, %v871_v43  ;;  %v2786_v58 = vpack.c.bf16 %v876_v49, %v868_v47  ;;  %v942_v43 = vld [vmem:[%s3631_s25 + $0x14d0] sm:$0xff]  ;;  %v949_v44 = vld [vmem:[%s3631_s25 + $0x1508] sm:$0xff] }
  0x96   : > { %2767 = vmatpush1.bf16.msra.mxu0 %v2766_v54  ;;  %1468 = vmatmul.mubr.f32.vlgmr.msra.gmra.mrb[0].mxu1 %v3784_v36  ;;  %v893_v54 = vld [vmem:[%s3631_s25 + $0x1348] sm:$0xff]  ;;  %v2994_v49 = vpack.c.bf16 %v942_v43, %v934_v41  ;;  %v1020_v43 = vld [vmem:[%s3631_s25 + $0x1740] sm:$0xff] }
  0x97   : > { %2959 = vmatpush1.bf16.msra.mxu1 %v2958_v56  ;;  %2769 = vmatprep.subr.bf16.mxu0 %v2768_v57  ;;  %v887_v56 = vld [vmem:[%s3631_s25 + $0x1318] sm:$0xff]  ;;  %v2788_v60 = vpack.c.bf16 %v893_v54, %v885_v53  ;;  %v950_v53 = vld [vmem:[%s3631_s25 + $0x1510] sm:$0xff] }
  0x98   : > { %2961 = vmatprep.subr.bf16.mxu1 %v2960_v61  ;;  %1325 = vmatprep.mubr.f32.mxu0 %v3937_v1  ;;  %v895_v57 = vld [vmem:[%s3631_s25 + $0x1358] sm:$0xff]  ;;  %v884_v61 = vld [vmem:[%s3631_s25 + $0x1300] sm:$0xff] }
  0x99   : > { %1538 = vmatprep.mubr.f32.mxu1 %v3937_v1  ;;  %v2980_v0 = vpack.c.bf16 %v895_v57, %v887_v56  ;;  %v2790_v11 = vpack.c.bf16 %v892_v62, %v884_v61  ;;  %v958_v56 = vld [vmem:[%s3631_s25 + $0x1550] sm:$0xff]  ;;  %v965_v57 = vld [vmem:[%s3631_s25 + $0x1588] sm:$0xff] }
  0x9a   : > { %2771 = vmatpush1.bf16.msra.mxu0 %v2770_v7  ;;  %v909_v7 = vld [vmem:[%s3631_s25 + $0x13c8] sm:$0xff]  ;;  %v2998_v62 = vpack.c.bf16 %v958_v56, %v950_v53  ;;  %v1036_v56 = vld [vmem:[%s3631_s25 + $0x17c0] sm:$0xff] }
  0x9b   : > { %2963 = vmatpush1.bf16.msra.mxu1 %v2962_v8  ;;  %2773 = vmatprep.subr.bf16.mxu0 %v2772_v9  ;;  %v903_v8 = vld [vmem:[%s3631_s25 + $0x1398] sm:$0xff]  ;;  %v2792_v13 = vpack.c.bf16 %v909_v7, %v901_v4  ;;  %v966_v4 = vld [vmem:[%s3631_s25 + $0x1590] sm:$0xff] }
  0x9c   : > { %2965 = vmatprep.subr.bf16.mxu1 %v2964_v14  ;;  %v911_v9 = vld [vmem:[%s3631_s25 + $0x13d8] sm:$0xff]  ;;  %v900_v14 = vld [vmem:[%s3631_s25 + $0x1380] sm:$0xff] }
  0x9d   : > { %v2984_v17 = vpack.c.bf16 %v911_v9, %v903_v8  ;;  %v2794_v24 = vpack.c.bf16 %v908_v15, %v900_v14  ;;  %v974_v8 = vld [vmem:[%s3631_s25 + $0x15d0] sm:$0xff]  ;;  %v981_v9 = vld [vmem:[%s3631_s25 + $0x1608] sm:$0xff] }
  0x9e   : > { %2775 = vmatpush1.bf16.msra.mxu0 %v2774_v21  ;;  %v925_v21 = vld [vmem:[%s3631_s25 + $0x1448] sm:$0xff]  ;;  %v3002_v15 = vpack.c.bf16 %v974_v8, %v966_v4  ;;  %v288_v8 = vld [vmem:[%s3631_s25 + $0x60] sm:$0xff] }
  0x9f   : > { %2967 = vmatpush1.bf16.msra.mxu1 %v2966_v22  ;;  %2777 = vmatprep.subr.bf16.mxu0 %v2776_v23  ;;  %v919_v22 = vld [vmem:[%s3631_s25 + $0x1418] sm:$0xff]  ;;  %v2796_v26 = vpack.c.bf16 %v925_v21, %v917_v19  ;;  %v982_v19 = vld [vmem:[%s3631_s25 + $0x1610] sm:$0xff] }
  0xa0   : > { %2969 = vmatprep.subr.bf16.mxu1 %v2968_v27  ;;  %v927_v23 = vld [vmem:[%s3631_s25 + $0x1458] sm:$0xff]  ;;  %v916_v27 = vld [vmem:[%s3631_s25 + $0x1400] sm:$0xff] }
  0xa1   : > { %v2988_v30 = vpack.c.bf16 %v927_v23, %v919_v22  ;;  %v2798_v35 = vpack.c.bf16 %v924_v28, %v916_v27  ;;  %v990_v22 = vld [vmem:[%s3631_s25 + $0x1650] sm:$0xff]  ;;  %v997_v23 = vld [vmem:[%s3631_s25 + $0x1688] sm:$0xff] }
  0xa2   : > { %2779 = vmatpush1.bf16.msra.mxu0 %v2778_v33  ;;  %v941_v33 = vld [vmem:[%s3631_s25 + $0x14c8] sm:$0xff]  ;;  %v3006_v28 = vpack.c.bf16 %v990_v22, %v982_v19  ;;  %v304_v22 = vld [vmem:[%s3631_s25 + $0xe0] sm:$0xff] }
  0xa3   : > { %2971 = vmatpush1.bf16.msra.mxu1 %v2970_v5  ;;  %2781 = vmatprep.subr.bf16.mxu0 %v2780_v34  ;;  %v935_v5 = vld [vmem:[%s3631_s25 + $0x1498] sm:$0xff]  ;;  %v2800_v38 = vpack.c.bf16 %v941_v33, %v933_v32  ;;  %v998_v32 = vld [vmem:[%s3631_s25 + $0x1690] sm:$0xff] }
  0xa4   : > { %2973 = vmatprep.subr.bf16.mxu1 %v2972_v39  ;;  %v943_v34 = vld [vmem:[%s3631_s25 + $0x14d8] sm:$0xff]  ;;  %v932_v39 = vld [vmem:[%s3631_s25 + $0x1480] sm:$0xff] }
  0xa5   : > { %v2992_v42 = vpack.c.bf16 %v943_v34, %v935_v5  ;;  %v2802_v47 = vpack.c.bf16 %v940_v40, %v932_v39  ;;  %v1006_v5 = vld [vmem:[%s3631_s25 + $0x16d0] sm:$0xff]  ;;  %v1013_v34 = vld [vmem:[%s3631_s25 + $0x1708] sm:$0xff] }
  0xa6   : > { %2783 = vmatpush1.bf16.msra.mxu0 %v2782_v45  ;;  %v957_v45 = vld [vmem:[%s3631_s25 + $0x1548] sm:$0xff]  ;;  %v3010_v40 = vpack.c.bf16 %v1006_v5, %v998_v32  ;;  %v320_v5 = vld [vmem:[%s3631_s25 + $0x160] sm:$0xff] }
  0xa7   : > { %2975 = vmatpush1.bf16.msra.mxu1 %v2974_v6  ;;  %2785 = vmatprep.subr.bf16.mxu0 %v2784_v46  ;;  %v951_v6 = vld [vmem:[%s3631_s25 + $0x1518] sm:$0xff]  ;;  %v2804_v50 = vpack.c.bf16 %v957_v45, %v949_v44  ;;  %v1014_v44 = vld [vmem:[%s3631_s25 + $0x1710] sm:$0xff] }
  0xa8   : > { %2977 = vmatprep.subr.bf16.mxu1 %v2976_v51  ;;  %v959_v46 = vld [vmem:[%s3631_s25 + $0x1558] sm:$0xff]  ;;  %v948_v51 = vld [vmem:[%s3631_s25 + $0x1500] sm:$0xff] }
  0xa9   : > { %v2996_v54 = vpack.c.bf16 %v959_v46, %v951_v6  ;;  %v2806_v61 = vpack.c.bf16 %v956_v52, %v948_v51  ;;  %v1022_v6 = vld [vmem:[%s3631_s25 + $0x1750] sm:$0xff]  ;;  %v1029_v46 = vld [vmem:[%s3631_s25 + $0x1788] sm:$0xff] }
  0xaa   : > { %2787 = vmatpush1.bf16.msra.mxu0 %v2786_v58  ;;  %v973_v58 = vld [vmem:[%s3631_s25 + $0x15c8] sm:$0xff]  ;;  %v3014_v52 = vpack.c.bf16 %v1022_v6, %v1014_v44  ;;  %v328_v44 = vld [vmem:[%s3631_s25 + $0x1a0] sm:$0xff]  ;;  %v330_v6 = vld [vmem:[%s3631_s25 + $0x1b0] sm:$0xff] }
  0xab   : > { %2979 = vmatpush1.bf16.msra.mxu1 %v2978_v59  ;;  %2789 = vmatprep.subr.bf16.mxu0 %v2788_v60  ;;  %v967_v59 = vld [vmem:[%s3631_s25 + $0x1598] sm:$0xff]  ;;  %v2808_v63 = vpack.c.bf16 %v973_v58, %v965_v57  ;;  %v1030_v57 = vld [vmem:[%s3631_s25 + $0x1790] sm:$0xff] }
  0xac   : > { %2981 = vmatprep.subr.bf16.mxu1 %v2980_v0  ;;  %v975_v60 = vld [vmem:[%s3631_s25 + $0x15d8] sm:$0xff]  ;;  %v964_v0 = vld [vmem:[%s3631_s25 + $0x1580] sm:$0xff] }
  0xad   : > { %v3000_v7 = vpack.c.bf16 %v975_v60, %v967_v59  ;;  %v2810_v14 = vpack.c.bf16 %v972_v2, %v964_v0  ;;  %v1038_v59 = vld [vmem:[%s3631_s25 + $0x17d0] sm:$0xff]  ;;  %v281_v60 = vld [vmem:[%s3631_s25 + $0x28] sm:$0xff] }
  0xae   : > { %2791 = vmatpush1.bf16.msra.mxu0 %v2790_v11  ;;  %v989_v11 = vld [vmem:[%s3631_s25 + $0x1648] sm:$0xff]  ;;  %v3018_v2 = vpack.c.bf16 %v1038_v59, %v1030_v57  ;;  %v352_v57 = vld [vmem:[%s3631_s25 + $0x260] sm:$0xff] }
  0xaf   : > { %2983 = vmatpush1.bf16.msra.mxu1 %v2982_v12  ;;  %2793 = vmatprep.subr.bf16.mxu0 %v2792_v13  ;;  %v983_v12 = vld [vmem:[%s3631_s25 + $0x1618] sm:$0xff]  ;;  %v2812_v16 = vpack.c.bf16 %v989_v11, %v981_v9  ;;  %v282_v9 = vld [vmem:[%s3631_s25 + $0x30] sm:$0xff] }
  0xb0   : > { %2985 = vmatprep.subr.bf16.mxu1 %v2984_v17  ;;  %v991_v13 = vld [vmem:[%s3631_s25 + $0x1658] sm:$0xff]  ;;  %v980_v17 = vld [vmem:[%s3631_s25 + $0x1600] sm:$0xff] }
  0xb1   : > { %v3004_v21 = vpack.c.bf16 %v991_v13, %v983_v12  ;;  %v2814_v27 = vpack.c.bf16 %v988_v18, %v980_v17  ;;  %v290_v12 = vld [vmem:[%s3631_s25 + $0x70] sm:$0xff]  ;;  %v297_v13 = vld [vmem:[%s3631_s25 + $0xa8] sm:$0xff] }
  0xb2   : > { %2795 = vmatpush1.bf16.msra.mxu0 %v2794_v24  ;;  %v1005_v24 = vld [vmem:[%s3631_s25 + $0x16c8] sm:$0xff]  ;;  %v3214_v18 = vpack.c.bf16 %v290_v12, %v282_v9  ;;  %v368_v9 = vld [vmem:[%s3631_s25 + $0x2e0] sm:$0xff] }
  0xb3   : > { %2987 = vmatpush1.bf16.msra.mxu1 %v2986_v25  ;;  %2797 = vmatprep.subr.bf16.mxu0 %v2796_v26  ;;  %v999_v25 = vld [vmem:[%s3631_s25 + $0x1698] sm:$0xff]  ;;  %v2816_v29 = vpack.c.bf16 %v1005_v24, %v997_v23  ;;  %v298_v23 = vld [vmem:[%s3631_s25 + $0xb0] sm:$0xff] }
  0xb4   : > { %2989 = vmatprep.subr.bf16.mxu1 %v2988_v30  ;;  %v1007_v26 = vld [vmem:[%s3631_s25 + $0x16d8] sm:$0xff]  ;;  %v996_v30 = vld [vmem:[%s3631_s25 + $0x1680] sm:$0xff] }
  0xb5   : > { %v3008_v33 = vpack.c.bf16 %v1007_v26, %v999_v25  ;;  %v2818_v39 = vpack.c.bf16 %v1004_v31, %v996_v30  ;;  %v306_v25 = vld [vmem:[%s3631_s25 + $0xf0] sm:$0xff]  ;;  %v313_v26 = vld [vmem:[%s3631_s25 + $0x128] sm:$0xff] }
  0xb6   : > { %2799 = vmatpush1.bf16.msra.mxu0 %v2798_v35  ;;  %v1021_v35 = vld [vmem:[%s3631_s25 + $0x1748] sm:$0xff]  ;;  %v3218_v31 = vpack.c.bf16 %v306_v25, %v298_v23  ;;  %v384_v23 = vld [vmem:[%s3631_s25 + $0x360] sm:$0xff] }
  0xb7   : > { %2991 = vmatpush1.bf16.msra.mxu1 %v2990_v37  ;;  %2801 = vmatprep.subr.bf16.mxu0 %v2800_v38  ;;  %v1015_v37 = vld [vmem:[%s3631_s25 + $0x1718] sm:$0xff]  ;;  %v2820_v41 = vpack.c.bf16 %v1021_v35, %v1013_v34  ;;  %v314_v34 = vld [vmem:[%s3631_s25 + $0x130] sm:$0xff] }
  0xb8   : > { %2993 = vmatprep.subr.bf16.mxu1 %v2992_v42  ;;  %v1023_v38 = vld [vmem:[%s3631_s25 + $0x1758] sm:$0xff]  ;;  %v1012_v42 = vld [vmem:[%s3631_s25 + $0x1700] sm:$0xff] }
  0xb9   : > { %v3012_v45 = vpack.c.bf16 %v1023_v38, %v1015_v37  ;;  %v2822_v51 = vpack.c.bf16 %v1020_v43, %v1012_v42  ;;  %v322_v37 = vld [vmem:[%s3631_s25 + $0x170] sm:$0xff]  ;;  %v329_v38 = vld [vmem:[%s3631_s25 + $0x1a8] sm:$0xff] }
  0xba   : > { %2803 = vmatpush1.bf16.msra.mxu0 %v2802_v47  ;;  %v1037_v47 = vld [vmem:[%s3631_s25 + $0x17c8] sm:$0xff]  ;;  %v3222_v42 = vpack.c.bf16 %v322_v37, %v314_v34  ;;  %v400_v34 = vld [vmem:[%s3631_s25 + $0x3e0] sm:$0xff] }
  0xbb   : > { %2995 = vmatpush1.bf16.msra.mxu1 %v2994_v49  ;;  %2805 = vmatprep.subr.bf16.mxu0 %v2804_v50  ;;  %v1031_v49 = vld [vmem:[%s3631_s25 + $0x1798] sm:$0xff]  ;;  %v2824_v53 = vpack.c.bf16 %v1037_v47, %v1029_v46  ;;  %v338_v47 = vld [vmem:[%s3631_s25 + $0x1f0] sm:$0xff] }
  0xbc   : > { %2997 = vmatprep.subr.bf16.mxu1 %v2996_v54  ;;  %v1039_v50 = vld [vmem:[%s3631_s25 + $0x17d8] sm:$0xff]  ;;  %v1028_v54 = vld [vmem:[%s3631_s25 + $0x1780] sm:$0xff] }
  0xbd   : > { %v3016_v58 = vpack.c.bf16 %v1039_v50, %v1031_v49  ;;  %v2826_v0 = vpack.c.bf16 %v1036_v56, %v1028_v54  ;;  %v345_v49 = vld [vmem:[%s3631_s25 + $0x228] sm:$0xff]  ;;  %v347_v50 = vld [vmem:[%s3631_s25 + $0x238] sm:$0xff]  ;;  %v344_v56 = vld [vmem:[%s3631_s25 + $0x220] sm:$0xff] }
  0xbe   : > { %2807 = vmatpush1.bf16.msra.mxu0 %v2806_v61  ;;  %v289_v61 = vld [vmem:[%s3631_s25 + $0x68] sm:$0xff] }
  0xbf   : > { %2999 = vmatpush1.bf16.msra.mxu1 %v2998_v62  ;;  %2809 = vmatprep.subr.bf16.mxu0 %v2808_v63  ;;  %v283_v62 = vld [vmem:[%s3631_s25 + $0x38] sm:$0xff]  ;;  %v3020_v4 = vpack.c.bf16 %v289_v61, %v281_v60  ;;  %v354_v60 = vld [vmem:[%s3631_s25 + $0x270] sm:$0xff]  ;;  %v361_v61 = vld [vmem:[%s3631_s25 + $0x2a8] sm:$0xff] }
  0xc0   : > { %3001 = vmatprep.subr.bf16.mxu1 %v3000_v7  ;;  %v291_v63 = vld [vmem:[%s3631_s25 + $0x78] sm:$0xff]  ;;  %v280_v7 = vld [vmem:[%s3631_s25 + $0x20] sm:$0xff] }
  0xc1   : > { %v3212_v11 = vpack.c.bf16 %v291_v63, %v283_v62  ;;  %v3022_v17 = vpack.c.bf16 %v288_v8, %v280_v7  ;;  %v369_v62 = vld [vmem:[%s3631_s25 + $0x2e8] sm:$0xff]  ;;  %v363_v63 = vld [vmem:[%s3631_s25 + $0x2b8] sm:$0xff]  ;;  %v360_v8 = vld [vmem:[%s3631_s25 + $0x2a0] sm:$0xff] }
  0xc2   : > { %2811 = vmatpush1.bf16.msra.mxu0 %v2810_v14  ;;  %v305_v14 = vld [vmem:[%s3631_s25 + $0xe8] sm:$0xff]  ;;  %v3040_v7 = vpack.c.bf16 %v369_v62, %v361_v61  ;;  %v434_v61 = vld [vmem:[%s3631_s25 + $0x4f0] sm:$0xff] }
  0xc3   : > { %3003 = vmatpush1.bf16.msra.mxu1 %v3002_v15  ;;  %2813 = vmatprep.subr.bf16.mxu0 %v2812_v16  ;;  %v299_v15 = vld [vmem:[%s3631_s25 + $0xb8] sm:$0xff]  ;;  %v3024_v19 = vpack.c.bf16 %v305_v14, %v297_v13  ;;  %v370_v13 = vld [vmem:[%s3631_s25 + $0x2f0] sm:$0xff]  ;;  %v377_v14 = vld [vmem:[%s3631_s25 + $0x328] sm:$0xff] }
  0xc4   : > { %3005 = vmatprep.subr.bf16.mxu1 %v3004_v21  ;;  %v307_v16 = vld [vmem:[%s3631_s25 + $0xf8] sm:$0xff]  ;;  %v296_v21 = vld [vmem:[%s3631_s25 + $0xa0] sm:$0xff]  ;;  %v441_v62 = vld [vmem:[%s3631_s25 + $0x528] sm:$0xff] }
  0xc5   : > { %v3216_v24 = vpack.c.bf16 %v307_v16, %v299_v15  ;;  %v3026_v30 = vpack.c.bf16 %v304_v22, %v296_v21  ;;  %v385_v15 = vld [vmem:[%s3631_s25 + $0x368] sm:$0xff]  ;;  %v379_v16 = vld [vmem:[%s3631_s25 + $0x338] sm:$0xff]  ;;  %v376_v22 = vld [vmem:[%s3631_s25 + $0x320] sm:$0xff] }
  0xc6   : > { %2815 = vmatpush1.bf16.msra.mxu0 %v2814_v27  ;;  %v321_v27 = vld [vmem:[%s3631_s25 + $0x168] sm:$0xff]  ;;  %v3044_v21 = vpack.c.bf16 %v385_v15, %v377_v14  ;;  %v450_v14 = vld [vmem:[%s3631_s25 + $0x570] sm:$0xff] }
  0xc7   : > { %3007 = vmatpush1.bf16.msra.mxu1 %v3006_v28  ;;  %2817 = vmatprep.subr.bf16.mxu0 %v2816_v29  ;;  %v315_v28 = vld [vmem:[%s3631_s25 + $0x138] sm:$0xff]  ;;  %v3028_v32 = vpack.c.bf16 %v321_v27, %v313_v26  ;;  %v386_v26 = vld [vmem:[%s3631_s25 + $0x370] sm:$0xff]  ;;  %v393_v27 = vld [vmem:[%s3631_s25 + $0x3a8] sm:$0xff] }
  0xc8   : > { %3009 = vmatprep.subr.bf16.mxu1 %v3008_v33  ;;  %v323_v29 = vld [vmem:[%s3631_s25 + $0x178] sm:$0xff]  ;;  %v312_v33 = vld [vmem:[%s3631_s25 + $0x120] sm:$0xff]  ;;  %v457_v15 = vld [vmem:[%s3631_s25 + $0x5a8] sm:$0xff] }
  0xc9   : > { %v3220_v35 = vpack.c.bf16 %v323_v29, %v315_v28  ;;  %v401_v28 = vld [vmem:[%s3631_s25 + $0x3e8] sm:$0xff]  ;;  %v395_v29 = vld [vmem:[%s3631_s25 + $0x3b8] sm:$0xff] }
  0xca   : > { %2819 = vmatpush1.bf16.msra.mxu0 %v2818_v39  ;;  %v337_v39 = vld [vmem:[%s3631_s25 + $0x1e8] sm:$0xff] }
  0xcb   : > { %3011 = vmatpush1.bf16.msra.mxu1 %v3010_v40  ;;  %2821 = vmatprep.subr.bf16.mxu0 %v2820_v41  ;;  %v339_v40 = vld [vmem:[%s3631_s25 + $0x1f8] sm:$0xff]  ;;  %v3030_v41 = vpack.c.bf16 %v320_v5, %v312_v33  ;;  %v3032_v43 = vpack.c.bf16 %v337_v39, %v329_v38  ;;  %v3048_v33 = vpack.c.bf16 %v401_v28, %v393_v27  ;;  %v392_v5 = vld [vmem:[%s3631_s25 + $0x3a0] sm:$0xff]  ;;  %v402_v38 = vld [vmem:[%s3631_s25 + $0x3f0] sm:$0xff] }
  0xcc   : > { %3013 = vmatprep.subr.bf16.mxu1 %v3012_v45  ;;  %v336_v45 = vld [vmem:[%s3631_s25 + $0x1e0] sm:$0xff]  ;;  %v409_v39 = vld [vmem:[%s3631_s25 + $0x428] sm:$0xff]  ;;  %v466_v27 = vld [vmem:[%s3631_s25 + $0x5f0] sm:$0xff] }
  0xcd   : > { %v473_v28 = vld [vmem:[%s3631_s25 + $0x628] sm:$0xff] }
  0xce   : > { %2823 = vmatpush1.bf16.msra.mxu0 %v2822_v51  ;;  %v355_v51 = vld [vmem:[%s3631_s25 + $0x278] sm:$0xff] }
  0xcf   : > { %3015 = vmatpush1.bf16.msra.mxu1 %v3014_v52  ;;  %2825 = vmatprep.subr.bf16.mxu0 %v2824_v53  ;;  %v3034_v52 = vpack.c.bf16 %v336_v45, %v328_v44  ;;  %v3226_v53 = vpack.c.bf16 %v338_v47, %v330_v6  ;;  %v3228_v59 = vpack.c.bf16 %v355_v51, %v347_v50  ;;  %v408_v45 = vld [vmem:[%s3631_s25 + $0x420] sm:$0xff]  ;;  %v433_v50 = vld [vmem:[%s3631_s25 + $0x4e8] sm:$0xff]  ;;  %v427_v51 = vld [vmem:[%s3631_s25 + $0x4b8] sm:$0xff] }
  0xd0   : > { %3017 = vmatprep.subr.bf16.mxu1 %v3016_v58  ;;  %v346_v58 = vld [vmem:[%s3631_s25 + $0x230] sm:$0xff]  ;;  %v416_v6 = vld [vmem:[%s3631_s25 + $0x460] sm:$0xff] }
  0xd2   : > { %2827 = vmatpush1.bf16.msra.mxu0 %v2826_v0  ;;  %v371_v0 = vld [vmem:[%s3631_s25 + $0x2f8] sm:$0xff] }
  0xd3   : > { %3019 = vmatpush1.bf16.msra.mxu1 %v3018_v2  ;;  %3021 = vmatprep.subr.bf16.mxu0 %v3020_v4  ;;  %v3038_v2 = vpack.c.bf16 %v352_v57, %v344_v56  ;;  %v3230_v4 = vpack.c.bf16 %v354_v60, %v346_v58  ;;  %v3232_v12 = vpack.c.bf16 %v371_v0, %v363_v63  ;;  %v424_v57 = vld [vmem:[%s3631_s25 + $0x4a0] sm:$0xff]  ;;  %v449_v63 = vld [vmem:[%s3631_s25 + $0x568] sm:$0xff]  ;;  %v443_v0 = vld [vmem:[%s3631_s25 + $0x538] sm:$0xff] }
  0xd4   : > { %3213 = vmatprep.subr.bf16.mxu1 %v3212_v11  ;;  %v362_v11 = vld [vmem:[%s3631_s25 + $0x2b0] sm:$0xff]  ;;  %v432_v58 = vld [vmem:[%s3631_s25 + $0x4e0] sm:$0xff] }
  0xd5   : > { %1326 = vmatmul.mubr.f32.vlgmr.msra.gmra.mrb[0].mxu0 %v3927_v55 }
  0xd6   : > { %1539 = vmatmul.mubr.f32.vlgmr.msra.gmra.mrb[0].mxu1 %v3927_v55  ;;  %3023 = vmatpush1.bf16.msra.mxu0 %v3022_v17  ;;  %v331_v55 = vld [vmem:[%s3631_s25 + $0x1b8] sm:$0xff] }
  0xd7   : > { %3215 = vmatpush1.bf16.msra.mxu1 %v3214_v18  ;;  %3025 = vmatprep.subr.bf16.mxu0 %v3024_v19  ;;  %v3224_v46 = vpack.c.bf16 %v339_v40, %v331_v55  ;;  %v387_v17 = vld [vmem:[%s3631_s25 + $0x378] sm:$0xff]  ;;  %v3042_v18 = vpack.c.bf16 %v368_v9, %v360_v8  ;;  %v3234_v19 = vpack.c.bf16 %v370_v13, %v362_v11  ;;  %v417_v55 = vld [vmem:[%s3631_s25 + $0x468] sm:$0xff]  ;;  %v440_v9 = vld [vmem:[%s3631_s25 + $0x520] sm:$0xff] }
  0xd8   : > { %3217 = vmatprep.subr.bf16.mxu1 %v3216_v24  ;;  %1609 = vmatprep.mubr.f32.mxu0 %v3648_v20  ;;  %v378_v24 = vld [vmem:[%s3631_s25 + $0x330] sm:$0xff]  ;;  %v3236_v25 = vpack.c.bf16 %v387_v17, %v379_v16  ;;  %v411_v40 = vld [vmem:[%s3631_s25 + $0x438] sm:$0xff]  ;;  %v3052_v44 = vpack.c.bf16 %v417_v55, %v409_v39  ;;  %v3060_v8 = vpack.c.bf16 %v449_v63, %v441_v62  ;;  %v448_v11 = vld [vmem:[%s3631_s25 + $0x560] sm:$0xff] }
  0xd9   : > { %1822 = vmatprep.mubr.f32.mxu1 %v3648_v20  ;;  %v353_v20 = vld [vmem:[%s3631_s25 + $0x268] sm:$0xff]  ;;  %v459_v17 = vld [vmem:[%s3631_s25 + $0x5b8] sm:$0xff]  ;;  %v482_v39 = vld [vmem:[%s3631_s25 + $0x670] sm:$0xff] }
  0xda   : > { %3027 = vmatpush1.bf16.msra.mxu0 %v3026_v30  ;;  %v3036_v54 = vpack.c.bf16 %v353_v20, %v345_v49  ;;  %v403_v30 = vld [vmem:[%s3631_s25 + $0x3f8] sm:$0xff]  ;;  %v418_v49 = vld [vmem:[%s3631_s25 + $0x470] sm:$0xff]  ;;  %v425_v20 = vld [vmem:[%s3631_s25 + $0x4a8] sm:$0xff] }
  0xdb   : > { %3219 = vmatpush1.bf16.msra.mxu1 %v3218_v31  ;;  %3029 = vmatprep.subr.bf16.mxu0 %v3028_v32  ;;  %v3046_v31 = vpack.c.bf16 %v384_v23, %v376_v22  ;;  %v3238_v32 = vpack.c.bf16 %v386_v26, %v378_v24  ;;  %v3240_v37 = vpack.c.bf16 %v403_v30, %v395_v29  ;;  %v465_v16 = vld [vmem:[%s3631_s25 + $0x5e8] sm:$0xff]  ;;  %v456_v23 = vld [vmem:[%s3631_s25 + $0x5a0] sm:$0xff]  ;;  %v475_v30 = vld [vmem:[%s3631_s25 + $0x638] sm:$0xff] }
  0xdc   : > { %3221 = vmatprep.subr.bf16.mxu1 %v3220_v35  ;;  %v394_v35 = vld [vmem:[%s3631_s25 + $0x3b0] sm:$0xff]  ;;  %v3056_v56 = vpack.c.bf16 %v433_v50, %v425_v20  ;;  %v3064_v22 = vpack.c.bf16 %v465_v16, %v457_v15  ;;  %v464_v24 = vld [vmem:[%s3631_s25 + $0x5e0] sm:$0xff]  ;;  %v481_v29 = vld [vmem:[%s3631_s25 + $0x668] sm:$0xff] }
  0xdd   : > { %v489_v55 = vld [vmem:[%s3631_s25 + $0x6a8] sm:$0xff]  ;;  %v498_v20 = vld [vmem:[%s3631_s25 + $0x6f0] sm:$0xff] }
  0xde   : > { %3031 = vmatpush1.bf16.msra.mxu0 %v3030_v41  ;;  %v419_v41 = vld [vmem:[%s3631_s25 + $0x478] sm:$0xff]  ;;  %v505_v50 = vld [vmem:[%s3631_s25 + $0x728] sm:$0xff]  ;;  %v514_v62 = vld [vmem:[%s3631_s25 + $0x770] sm:$0xff] }
  0xdf   : > { %3223 = vmatpush1.bf16.msra.mxu1 %v3222_v42  ;;  %3033 = vmatprep.subr.bf16.mxu0 %v3032_v43  ;;  %v3050_v42 = vpack.c.bf16 %v400_v34, %v392_v5  ;;  %v3242_v43 = vpack.c.bf16 %v402_v38, %v394_v35  ;;  %v3244_v47 = vpack.c.bf16 %v419_v41, %v411_v40  ;;  %v472_v34 = vld [vmem:[%s3631_s25 + $0x620] sm:$0xff]  ;;  %v497_v40 = vld [vmem:[%s3631_s25 + $0x6e8] sm:$0xff]  ;;  %v491_v41 = vld [vmem:[%s3631_s25 + $0x6b8] sm:$0xff] }
  0xe0   : > { %3225 = vmatprep.subr.bf16.mxu1 %v3224_v46  ;;  %v410_v46 = vld [vmem:[%s3631_s25 + $0x430] sm:$0xff]  ;;  %v3068_v5 = vpack.c.bf16 %v481_v29, %v473_v28  ;;  %v480_v35 = vld [vmem:[%s3631_s25 + $0x660] sm:$0xff]  ;;  %v521_v63 = vld [vmem:[%s3631_s25 + $0x7a8] sm:$0xff] }
  0xe1   : > { %v530_v15 = vld [vmem:[%s3631_s25 + $0x7f0] sm:$0xff]  ;;  %v537_v16 = vld [vmem:[%s3631_s25 + $0x828] sm:$0xff] }
  0xe2   : > { %3035 = vmatpush1.bf16.msra.mxu0 %v3034_v52  ;;  %v435_v52 = vld [vmem:[%s3631_s25 + $0x4f8] sm:$0xff]  ;;  %v546_v28 = vld [vmem:[%s3631_s25 + $0x870] sm:$0xff]  ;;  %v553_v29 = vld [vmem:[%s3631_s25 + $0x8a8] sm:$0xff] }
  0xe3   : > { %3227 = vmatpush1.bf16.msra.mxu1 %v3226_v53  ;;  %3037 = vmatprep.subr.bf16.mxu0 %v3036_v54  ;;  %v3054_v53 = vpack.c.bf16 %v416_v6, %v408_v45  ;;  %v3246_v54 = vpack.c.bf16 %v418_v49, %v410_v46  ;;  %v3248_v60 = vpack.c.bf16 %v435_v52, %v427_v51  ;;  %v488_v6 = vld [vmem:[%s3631_s25 + $0x6a0] sm:$0xff]  ;;  %v513_v51 = vld [vmem:[%s3631_s25 + $0x768] sm:$0xff]  ;;  %v507_v52 = vld [vmem:[%s3631_s25 + $0x738] sm:$0xff] }
  0xe4   : > { %3229 = vmatprep.subr.bf16.mxu1 %v3228_v59  ;;  %v426_v59 = vld [vmem:[%s3631_s25 + $0x4b0] sm:$0xff]  ;;  %v3072_v45 = vpack.c.bf16 %v497_v40, %v489_v55  ;;  %v496_v46 = vld [vmem:[%s3631_s25 + $0x6e0] sm:$0xff]  ;;  %v569_v40 = vld [vmem:[%s3631_s25 + $0x928] sm:$0xff] }
  0xe5   : > { %v562_v55 = vld [vmem:[%s3631_s25 + $0x8f0] sm:$0xff] }
  0xe6   : > { %3039 = vmatpush1.bf16.msra.mxu0 %v3038_v2  ;;  %v451_v2 = vld [vmem:[%s3631_s25 + $0x578] sm:$0xff] }
  0xe7   : > { %3231 = vmatpush1.bf16.msra.mxu1 %v3230_v4  ;;  %3041 = vmatprep.subr.bf16.mxu0 %v3040_v7  ;;  %v3058_v4 = vpack.c.bf16 %v432_v58, %v424_v57  ;;  %v3250_v7 = vpack.c.bf16 %v434_v61, %v426_v59  ;;  %v3252_v13 = vpack.c.bf16 %v451_v2, %v443_v0  ;;  %v504_v58 = vld [vmem:[%s3631_s25 + $0x720] sm:$0xff]  ;;  %v529_v0 = vld [vmem:[%s3631_s25 + $0x7e8] sm:$0xff]  ;;  %v523_v2 = vld [vmem:[%s3631_s25 + $0x7b8] sm:$0xff] }
  0xe8   : > { %3233 = vmatprep.subr.bf16.mxu1 %v3232_v12  ;;  %v442_v12 = vld [vmem:[%s3631_s25 + $0x530] sm:$0xff]  ;;  %v3076_v57 = vpack.c.bf16 %v513_v51, %v505_v50  ;;  %v512_v59 = vld [vmem:[%s3631_s25 + $0x760] sm:$0xff]  ;;  %v585_v51 = vld [vmem:[%s3631_s25 + $0x9a8] sm:$0xff] }
  0xe9   : > { %v578_v50 = vld [vmem:[%s3631_s25 + $0x970] sm:$0xff] }
  0xea   : > { %3043 = vmatpush1.bf16.msra.mxu0 %v3042_v18  ;;  %v467_v18 = vld [vmem:[%s3631_s25 + $0x5f8] sm:$0xff] }
  0xeb   : > { %3235 = vmatpush1.bf16.msra.mxu1 %v3234_v19  ;;  %3045 = vmatprep.subr.bf16.mxu0 %v3044_v21  ;;  %v3062_v19 = vpack.c.bf16 %v448_v11, %v440_v9  ;;  %v3254_v21 = vpack.c.bf16 %v450_v14, %v442_v12  ;;  %v3256_v26 = vpack.c.bf16 %v467_v18, %v459_v17  ;;  %v520_v11 = vld [vmem:[%s3631_s25 + $0x7a0] sm:$0xff]  ;;  %v545_v17 = vld [vmem:[%s3631_s25 + $0x868] sm:$0xff]  ;;  %v539_v18 = vld [vmem:[%s3631_s25 + $0x838] sm:$0xff] }
  0xec   : > { %3237 = vmatprep.subr.bf16.mxu1 %v3236_v25  ;;  %v458_v25 = vld [vmem:[%s3631_s25 + $0x5b0] sm:$0xff]  ;;  %v3080_v9 = vpack.c.bf16 %v529_v0, %v521_v63  ;;  %v528_v12 = vld [vmem:[%s3631_s25 + $0x7e0] sm:$0xff]  ;;  %v601_v63 = vld [vmem:[%s3631_s25 + $0xa28] sm:$0xff] }
  0xed   : > { %v603_v0 = vld [vmem:[%s3631_s25 + $0xa38] sm:$0xff] }
  0xee   : > { %3047 = vmatpush1.bf16.msra.mxu0 %v3046_v31  ;;  %v483_v31 = vld [vmem:[%s3631_s25 + $0x678] sm:$0xff] }
  0xef   : > { %3239 = vmatpush1.bf16.msra.mxu1 %v3238_v32  ;;  %3049 = vmatprep.subr.bf16.mxu0 %v3048_v33  ;;  %v3066_v32 = vpack.c.bf16 %v464_v24, %v456_v23  ;;  %v3258_v33 = vpack.c.bf16 %v466_v27, %v458_v25  ;;  %v3260_v38 = vpack.c.bf16 %v483_v31, %v475_v30  ;;  %v536_v24 = vld [vmem:[%s3631_s25 + $0x820] sm:$0xff]  ;;  %v561_v30 = vld [vmem:[%s3631_s25 + $0x8e8] sm:$0xff]  ;;  %v555_v31 = vld [vmem:[%s3631_s25 + $0x8b8] sm:$0xff] }
  0xf0   : > { %3241 = vmatprep.subr.bf16.mxu1 %v3240_v37  ;;  %v474_v37 = vld [vmem:[%s3631_s25 + $0x630] sm:$0xff]  ;;  %v3084_v23 = vpack.c.bf16 %v545_v17, %v537_v16  ;;  %v544_v25 = vld [vmem:[%s3631_s25 + $0x860] sm:$0xff]  ;;  %v625_v16 = vld [vmem:[%s3631_s25 + $0xae8] sm:$0xff] }
  0xf1   : > { %v619_v17 = vld [vmem:[%s3631_s25 + $0xab8] sm:$0xff] }
  0xf2   : > { %3051 = vmatpush1.bf16.msra.mxu0 %v3050_v42  ;;  %v499_v42 = vld [vmem:[%s3631_s25 + $0x6f8] sm:$0xff] }
  0xf3   : > { %3243 = vmatpush1.bf16.msra.mxu1 %v3242_v43  ;;  %3053 = vmatprep.subr.bf16.mxu0 %v3052_v44  ;;  %v3070_v43 = vpack.c.bf16 %v480_v35, %v472_v34  ;;  %v3262_v44 = vpack.c.bf16 %v482_v39, %v474_v37  ;;  %v3264_v49 = vpack.c.bf16 %v499_v42, %v491_v41  ;;  %v552_v35 = vld [vmem:[%s3631_s25 + $0x8a0] sm:$0xff]  ;;  %v577_v41 = vld [vmem:[%s3631_s25 + $0x968] sm:$0xff]  ;;  %v571_v42 = vld [vmem:[%s3631_s25 + $0x938] sm:$0xff] }
  0xf4   : > { %3245 = vmatprep.subr.bf16.mxu1 %v3244_v47  ;;  %v490_v47 = vld [vmem:[%s3631_s25 + $0x6b0] sm:$0xff]  ;;  %v3088_v34 = vpack.c.bf16 %v561_v30, %v553_v29  ;;  %v560_v37 = vld [vmem:[%s3631_s25 + $0x8e0] sm:$0xff]  ;;  %v641_v29 = vld [vmem:[%s3631_s25 + $0xb68] sm:$0xff] }
  0xf5   : > { %v635_v30 = vld [vmem:[%s3631_s25 + $0xb38] sm:$0xff] }
  0xf6   : > { %3055 = vmatpush1.bf16.msra.mxu0 %v3054_v53  ;;  %v515_v53 = vld [vmem:[%s3631_s25 + $0x778] sm:$0xff] }
  0xf7   : > { %3247 = vmatpush1.bf16.msra.mxu1 %v3246_v54  ;;  %3057 = vmatprep.subr.bf16.mxu0 %v3056_v56  ;;  %v3074_v54 = vpack.c.bf16 %v496_v46, %v488_v6  ;;  %v3266_v56 = vpack.c.bf16 %v498_v20, %v490_v47  ;;  %v3268_v61 = vpack.c.bf16 %v515_v53, %v507_v52  ;;  %v568_v46 = vld [vmem:[%s3631_s25 + $0x920] sm:$0xff]  ;;  %v593_v52 = vld [vmem:[%s3631_s25 + $0x9e8] sm:$0xff]  ;;  %v595_v53 = vld [vmem:[%s3631_s25 + $0x9f8] sm:$0xff] }
  0xf8   : > { %3249 = vmatprep.subr.bf16.mxu1 %v3248_v60  ;;  %v506_v60 = vld [vmem:[%s3631_s25 + $0x730] sm:$0xff]  ;;  %v3092_v6 = vpack.c.bf16 %v577_v41, %v569_v40  ;;  %v576_v47 = vld [vmem:[%s3631_s25 + $0x960] sm:$0xff]  ;;  %v657_v40 = vld [vmem:[%s3631_s25 + $0xbe8] sm:$0xff] }
  0xf9   : > { %v651_v41 = vld [vmem:[%s3631_s25 + $0xbb8] sm:$0xff] }
  0xfa   : > { %3059 = vmatpush1.bf16.msra.mxu0 %v3058_v4  ;;  %v531_v4 = vld [vmem:[%s3631_s25 + $0x7f8] sm:$0xff] }
  0xfb   : > { %3251 = vmatpush1.bf16.msra.mxu1 %v3250_v7  ;;  %3061 = vmatprep.subr.bf16.mxu0 %v3060_v8  ;;  %v3078_v7 = vpack.c.bf16 %v512_v59, %v504_v58  ;;  %v3270_v8 = vpack.c.bf16 %v514_v62, %v506_v60  ;;  %v3272_v14 = vpack.c.bf16 %v531_v4, %v523_v2  ;;  %v584_v58 = vld [vmem:[%s3631_s25 + $0x9a0] sm:$0xff]  ;;  %v586_v60 = vld [vmem:[%s3631_s25 + $0x9b0] sm:$0xff]  ;;  %v611_v2 = vld [vmem:[%s3631_s25 + $0xa78] sm:$0xff] }
  0xfc   : > { %3253 = vmatprep.subr.bf16.mxu1 %v3252_v13  ;;  %v522_v13 = vld [vmem:[%s3631_s25 + $0x7b0] sm:$0xff]  ;;  %v592_v59 = vld [vmem:[%s3631_s25 + $0x9e0] sm:$0xff] }
  0xfd   : > { %v594_v62 = vld [vmem:[%s3631_s25 + $0x9f0] sm:$0xff]  ;;  %v3098_v4 = vpack.c.bf16 %v592_v59, %v584_v58  ;;  %v672_v58 = vld [vmem:[%s3631_s25 + $0xc60] sm:$0xff] }
  0xfe   : > { %3063 = vmatpush1.bf16.msra.mxu0 %v3062_v19  ;;  %v547_v19 = vld [vmem:[%s3631_s25 + $0x878] sm:$0xff]  ;;  %v666_v59 = vld [vmem:[%s3631_s25 + $0xc30] sm:$0xff] }
  0xff   : > { %3255 = vmatpush1.bf16.msra.mxu1 %v3254_v21  ;;  %3065 = vmatprep.subr.bf16.mxu0 %v3064_v22  ;;  %v3082_v21 = vpack.c.bf16 %v528_v12, %v520_v11  ;;  %v3274_v22 = vpack.c.bf16 %v530_v15, %v522_v13  ;;  %v3276_v27 = vpack.c.bf16 %v547_v19, %v539_v18  ;;  %v608_v11 = vld [vmem:[%s3631_s25 + $0xa60] sm:$0xff]  ;;  %v602_v12 = vld [vmem:[%s3631_s25 + $0xa30] sm:$0xff]  ;;  %v617_v15 = vld [vmem:[%s3631_s25 + $0xaa8] sm:$0xff] }
 0x100   : > { %3257 = vmatprep.subr.bf16.mxu1 %v3256_v26  ;;  %v538_v26 = vld [vmem:[%s3631_s25 + $0x830] sm:$0xff]  ;;  %v3292_v13 = vpack.c.bf16 %v611_v2, %v603_v0  ;;  %v627_v18 = vld [vmem:[%s3631_s25 + $0xaf8] sm:$0xff] }
 0x101   : > { %v691_v0 = vld [vmem:[%s3631_s25 + $0xcf8] sm:$0xff] }
 0x102   : > { %3067 = vmatpush1.bf16.msra.mxu0 %v3066_v32  ;;  %v563_v32 = vld [vmem:[%s3631_s25 + $0x8f8] sm:$0xff] }
 0x103   : > { %3259 = vmatpush1.bf16.msra.mxu1 %v3258_v33  ;;  %3069 = vmatprep.subr.bf16.mxu0 %v3068_v5  ;;  %v3086_v33 = vpack.c.bf16 %v544_v25, %v536_v24  ;;  %v3278_v5 = vpack.c.bf16 %v546_v28, %v538_v26  ;;  %v3280_v39 = vpack.c.bf16 %v563_v32, %v555_v31  ;;  %v624_v24 = vld [vmem:[%s3631_s25 + $0xae0] sm:$0xff]  ;;  %v618_v25 = vld [vmem:[%s3631_s25 + $0xab0] sm:$0xff]  ;;  %v633_v28 = vld [vmem:[%s3631_s25 + $0xb28] sm:$0xff] }
 0x104   : > { %3261 = vmatprep.subr.bf16.mxu1 %v3260_v38  ;;  %v554_v38 = vld [vmem:[%s3631_s25 + $0x8b0] sm:$0xff]  ;;  %v3296_v26 = vpack.c.bf16 %v627_v18, %v619_v17  ;;  %v643_v31 = vld [vmem:[%s3631_s25 + $0xb78] sm:$0xff] }
 0x105   : > { %v707_v17 = vld [vmem:[%s3631_s25 + $0xd78] sm:$0xff] }
 0x106   : > { %3071 = vmatpush1.bf16.msra.mxu0 %v3070_v43  ;;  %v579_v43 = vld [vmem:[%s3631_s25 + $0x978] sm:$0xff] }
 0x107   : > { %3263 = vmatpush1.bf16.msra.mxu1 %v3262_v44  ;;  %3073 = vmatprep.subr.bf16.mxu0 %v3072_v45  ;;  %v3090_v44 = vpack.c.bf16 %v560_v37, %v552_v35  ;;  %v3282_v45 = vpack.c.bf16 %v562_v55, %v554_v38  ;;  %v3284_v20 = vpack.c.bf16 %v579_v43, %v571_v42  ;;  %v640_v35 = vld [vmem:[%s3631_s25 + $0xb60] sm:$0xff]  ;;  %v634_v37 = vld [vmem:[%s3631_s25 + $0xb30] sm:$0xff]  ;;  %v649_v55 = vld [vmem:[%s3631_s25 + $0xba8] sm:$0xff] }
 0x108   : > { %3265 = vmatprep.subr.bf16.mxu1 %v3264_v49  ;;  %v570_v49 = vld [vmem:[%s3631_s25 + $0x930] sm:$0xff]  ;;  %v3300_v38 = vpack.c.bf16 %v643_v31, %v635_v30  ;;  %v659_v42 = vld [vmem:[%s3631_s25 + $0xbf8] sm:$0xff] }
 0x109   : > { %v723_v30 = vld [vmem:[%s3631_s25 + $0xdf8] sm:$0xff] }
 0x10a   : > { %3075 = vmatpush1.bf16.msra.mxu0 %v3074_v54  ;;  %v3094_v54 = vpack.c.bf16 %v576_v47, %v568_v46  ;;  %v656_v46 = vld [vmem:[%s3631_s25 + $0xbe0] sm:$0xff]  ;;  %v650_v47 = vld [vmem:[%s3631_s25 + $0xbb0] sm:$0xff] }
 0x10b   : > { %3267 = vmatpush1.bf16.msra.mxu1 %v3266_v56  ;;  %3077 = vmatprep.subr.bf16.mxu0 %v3076_v57  ;;  %v3286_v56 = vpack.c.bf16 %v578_v50, %v570_v49  ;;  %v3096_v57 = vpack.c.bf16 %v593_v52, %v585_v51  ;;  %v3304_v49 = vpack.c.bf16 %v659_v42, %v651_v41  ;;  %v665_v50 = vld [vmem:[%s3631_s25 + $0xc28] sm:$0xff]  ;;  %v667_v52 = vld [vmem:[%s3631_s25 + $0xc38] sm:$0xff] }
 0x10c   : > { %3269 = vmatprep.subr.bf16.mxu1 %v3268_v61  ;;  %v673_v51 = vld [vmem:[%s3631_s25 + $0xc68] sm:$0xff]  ;;  %v739_v41 = vld [vmem:[%s3631_s25 + $0xe78] sm:$0xff] }
 0x10e   : > { %3079 = vmatpush1.bf16.msra.mxu0 %v3078_v7  ;;  %v3290_v7 = vpack.c.bf16 %v594_v62, %v586_v60  ;;  %v681_v62 = vld [vmem:[%s3631_s25 + $0xca8] sm:$0xff] }
 0x10f   : > { %3271 = vmatpush1.bf16.msra.mxu1 %v3270_v8  ;;  %3081 = vmatprep.subr.bf16.mxu0 %v3080_v9  ;;  %v600_v9 = vld [vmem:[%s3631_s25 + $0xa20] sm:$0xff] }
 0x110   : > { %3273 = vmatprep.subr.bf16.mxu1 %v3272_v14  ;;  %v610_v14 = vld [vmem:[%s3631_s25 + $0xa70] sm:$0xff]  ;;  %v3102_v19 = vpack.c.bf16 %v608_v11, %v600_v9  ;;  %v688_v9 = vld [vmem:[%s3631_s25 + $0xce0] sm:$0xff] }
 0x111   : > { %v682_v11 = vld [vmem:[%s3631_s25 + $0xcb0] sm:$0xff] }
 0x112   : > { %3083 = vmatpush1.bf16.msra.mxu0 %v3082_v21  ;;  %v3294_v21 = vpack.c.bf16 %v610_v14, %v602_v12  ;;  %v697_v14 = vld [vmem:[%s3631_s25 + $0xd28] sm:$0xff] }
 0x113   : > { %3275 = vmatpush1.bf16.msra.mxu1 %v3274_v22  ;;  %3085 = vmatprep.subr.bf16.mxu0 %v3084_v23  ;;  %v3104_v22 = vpack.c.bf16 %v625_v16, %v617_v15  ;;  %v616_v23 = vld [vmem:[%s3631_s25 + $0xaa0] sm:$0xff]  ;;  %v705_v15 = vld [vmem:[%s3631_s25 + $0xd68] sm:$0xff]  ;;  %v699_v16 = vld [vmem:[%s3631_s25 + $0xd38] sm:$0xff] }
 0x114   : > { %3277 = vmatprep.subr.bf16.mxu1 %v3276_v27  ;;  %v626_v27 = vld [vmem:[%s3631_s25 + $0xaf0] sm:$0xff]  ;;  %v3106_v32 = vpack.c.bf16 %v624_v24, %v616_v23  ;;  %v704_v23 = vld [vmem:[%s3631_s25 + $0xd60] sm:$0xff] }
 0x115   : > { %1610 = vmatmul.mubr.f32.vlgmr.msra.gmra.mrb[2].mxu0 %v3638_v10  ;;  %v698_v24 = vld [vmem:[%s3631_s25 + $0xd30] sm:$0xff] }
 0x116   : > { %3087 = vmatpush1.bf16.msra.mxu0 %v3086_v33  ;;  %1823 = vmatmul.mubr.f32.vlgmr.msra.gmra.mrb[2].mxu1 %v3638_v10  ;;  %v587_v10 = vld [vmem:[%s3631_s25 + $0x9b8] sm:$0xff]  ;;  %v3298_v33 = vpack.c.bf16 %v626_v27, %v618_v25  ;;  %v3316_v25 = vpack.c.bf16 %v707_v17, %v699_v16  ;;  %v713_v27 = vld [vmem:[%s3631_s25 + $0xda8] sm:$0xff] }
 0x117   : > { %3279 = vmatpush1.bf16.msra.mxu1 %v3278_v5  ;;  %3089 = vmatprep.subr.bf16.mxu0 %v3088_v34  ;;  %v3288_v61 = vpack.c.bf16 %v595_v53, %v587_v10  ;;  %v3108_v5 = vpack.c.bf16 %v641_v29, %v633_v28  ;;  %v632_v34 = vld [vmem:[%s3631_s25 + $0xb20] sm:$0xff]  ;;  %v675_v10 = vld [vmem:[%s3631_s25 + $0xc78] sm:$0xff]  ;;  %v721_v28 = vld [vmem:[%s3631_s25 + $0xde8] sm:$0xff] }
 0x118   : > { %3281 = vmatprep.subr.bf16.mxu1 %v3280_v39  ;;  %1680 = vmatprep.mubr.f32.mxu0 %v3796_v48  ;;  %v642_v39 = vld [vmem:[%s3631_s25 + $0xb70] sm:$0xff]  ;;  %v3110_v43 = vpack.c.bf16 %v640_v35, %v632_v34  ;;  %v3308_v60 = vpack.c.bf16 %v675_v10, %v667_v52  ;;  %v715_v29 = vld [vmem:[%s3631_s25 + $0xdb8] sm:$0xff]  ;;  %v720_v34 = vld [vmem:[%s3631_s25 + $0xde0] sm:$0xff] }
 0x119   : > { %1893 = vmatprep.mubr.f32.mxu1 %v3796_v48  ;;  %v609_v48 = vld [vmem:[%s3631_s25 + $0xa68] sm:$0xff]  ;;  %v714_v35 = vld [vmem:[%s3631_s25 + $0xdb0] sm:$0xff]  ;;  %v755_v52 = vld [vmem:[%s3631_s25 + $0xef8] sm:$0xff] }
 0x11a   : > { %3091 = vmatpush1.bf16.msra.mxu0 %v3090_v44  ;;  %v3100_v8 = vpack.c.bf16 %v609_v48, %v601_v63  ;;  %v3302_v44 = vpack.c.bf16 %v642_v39, %v634_v37  ;;  %v689_v63 = vld [vmem:[%s3631_s25 + $0xce8] sm:$0xff]  ;;  %v683_v48 = vld [vmem:[%s3631_s25 + $0xcb8] sm:$0xff]  ;;  %v3320_v37 = vpack.c.bf16 %v723_v30, %v715_v29 }
 0x11b   : > { %3283 = vmatpush1.bf16.msra.mxu1 %v3282_v45  ;;  %3093 = vmatprep.subr.bf16.mxu0 %v3092_v6  ;;  %v3112_v45 = vpack.c.bf16 %v657_v40, %v649_v55  ;;  %v648_v6 = vld [vmem:[%s3631_s25 + $0xba0] sm:$0xff]  ;;  %v3312_v12 = vpack.c.bf16 %v691_v0, %v683_v48  ;;  %v729_v39 = vld [vmem:[%s3631_s25 + $0xe28] sm:$0xff]  ;;  %v731_v40 = vld [vmem:[%s3631_s25 + $0xe38] sm:$0xff] }
 0x11c   : > { %3285 = vmatprep.subr.bf16.mxu1 %v3284_v20  ;;  %v658_v20 = vld [vmem:[%s3631_s25 + $0xbf0] sm:$0xff]  ;;  %v3114_v53 = vpack.c.bf16 %v656_v46, %v648_v6  ;;  %v737_v55 = vld [vmem:[%s3631_s25 + $0xe68] sm:$0xff]  ;;  %v736_v6 = vld [vmem:[%s3631_s25 + $0xe60] sm:$0xff] }
 0x11d   : > { %v730_v46 = vld [vmem:[%s3631_s25 + $0xe30] sm:$0xff]  ;;  %v771_v48 = vld [vmem:[%s3631_s25 + $0xf78] sm:$0xff] }
 0x11e   : > { %3095 = vmatpush1.bf16.msra.mxu0 %v3094_v54  ;;  %v3306_v54 = vpack.c.bf16 %v658_v20, %v650_v47  ;;  %v3324_v47 = vpack.c.bf16 %v739_v41, %v731_v40  ;;  %v745_v20 = vld [vmem:[%s3631_s25 + $0xea8] sm:$0xff]  ;;  %v787_v16 = vld [vmem:[%s3631_s25 + $0xff8] sm:$0xff] }
 0x11f   : > { %3287 = vmatpush1.bf16.msra.mxu1 %v3286_v56  ;;  %3097 = vmatprep.subr.bf16.mxu0 %v3096_v57  ;;  %v3116_v56 = vpack.c.bf16 %v673_v51, %v665_v50  ;;  %v664_v57 = vld [vmem:[%s3631_s25 + $0xc20] sm:$0xff]  ;;  %v753_v50 = vld [vmem:[%s3631_s25 + $0xee8] sm:$0xff]  ;;  %v747_v51 = vld [vmem:[%s3631_s25 + $0xeb8] sm:$0xff] }
 0x120   : > { %3289 = vmatprep.subr.bf16.mxu1 %v3288_v61  ;;  %v674_v61 = vld [vmem:[%s3631_s25 + $0xc70] sm:$0xff]  ;;  %v3118_v2 = vpack.c.bf16 %v672_v58, %v664_v57  ;;  %v752_v57 = vld [vmem:[%s3631_s25 + $0xee0] sm:$0xff]  ;;  %v803_v29 = vld [vmem:[%s3631_s25 + $0x1078] sm:$0xff] }
 0x121   : > { %v746_v58 = vld [vmem:[%s3631_s25 + $0xeb0] sm:$0xff]  ;;  %v819_v40 = vld [vmem:[%s3631_s25 + $0x10f8] sm:$0xff] }
 0x122   : > { %3099 = vmatpush1.bf16.msra.mxu0 %v3098_v4  ;;  %v3310_v4 = vpack.c.bf16 %v674_v61, %v666_v59  ;;  %v3328_v59 = vpack.c.bf16 %v755_v52, %v747_v51  ;;  %v761_v61 = vld [vmem:[%s3631_s25 + $0xf28] sm:$0xff]  ;;  %v835_v51 = vld [vmem:[%s3631_s25 + $0x1178] sm:$0xff] }
 0x123   : > { %3291 = vmatpush1.bf16.msra.mxu1 %v3290_v7  ;;  %3101 = vmatprep.subr.bf16.mxu0 %v3100_v8  ;;  %v3120_v7 = vpack.c.bf16 %v689_v63, %v681_v62  ;;  %v680_v8 = vld [vmem:[%s3631_s25 + $0xca0] sm:$0xff]  ;;  %v769_v62 = vld [vmem:[%s3631_s25 + $0xf68] sm:$0xff]  ;;  %v763_v63 = vld [vmem:[%s3631_s25 + $0xf38] sm:$0xff] }
 0x124   : > { %3293 = vmatprep.subr.bf16.mxu1 %v3292_v13  ;;  %v690_v13 = vld [vmem:[%s3631_s25 + $0xcf0] sm:$0xff]  ;;  %v3122_v18 = vpack.c.bf16 %v688_v9, %v680_v8  ;;  %v768_v8 = vld [vmem:[%s3631_s25 + $0xf60] sm:$0xff] }
 0x125   : > { %v762_v9 = vld [vmem:[%s3631_s25 + $0xf30] sm:$0xff] }
 0x126   : > { %3103 = vmatpush1.bf16.msra.mxu0 %v3102_v19  ;;  %v3314_v19 = vpack.c.bf16 %v690_v13, %v682_v11  ;;  %v3332_v11 = vpack.c.bf16 %v771_v48, %v763_v63  ;;  %v777_v13 = vld [vmem:[%s3631_s25 + $0xfa8] sm:$0xff] }
 0x127   : > { %3295 = vmatpush1.bf16.msra.mxu1 %v3294_v21  ;;  %3105 = vmatprep.subr.bf16.mxu0 %v3104_v22  ;;  %v3124_v21 = vpack.c.bf16 %v705_v15, %v697_v14  ;;  %v696_v22 = vld [vmem:[%s3631_s25 + $0xd20] sm:$0xff]  ;;  %v785_v14 = vld [vmem:[%s3631_s25 + $0xfe8] sm:$0xff]  ;;  %v779_v15 = vld [vmem:[%s3631_s25 + $0xfb8] sm:$0xff] }
 0x128   : > { %3297 = vmatprep.subr.bf16.mxu1 %v3296_v26  ;;  %v706_v26 = vld [vmem:[%s3631_s25 + $0xd70] sm:$0xff]  ;;  %v3126_v31 = vpack.c.bf16 %v704_v23, %v696_v22  ;;  %v784_v22 = vld [vmem:[%s3631_s25 + $0xfe0] sm:$0xff] }
 0x129   : > { %v778_v23 = vld [vmem:[%s3631_s25 + $0xfb0] sm:$0xff] }
 0x12a   : > { %3107 = vmatpush1.bf16.msra.mxu0 %v3106_v32  ;;  %v3318_v32 = vpack.c.bf16 %v706_v26, %v698_v24  ;;  %v3336_v24 = vpack.c.bf16 %v787_v16, %v779_v15  ;;  %v793_v26 = vld [vmem:[%s3631_s25 + $0x1028] sm:$0xff] }
 0x12b   : > { %3299 = vmatpush1.bf16.msra.mxu1 %v3298_v33  ;;  %3109 = vmatprep.subr.bf16.mxu0 %v3108_v5  ;;  %v3128_v33 = vpack.c.bf16 %v721_v28, %v713_v27  ;;  %v712_v5 = vld [vmem:[%s3631_s25 + $0xda0] sm:$0xff]  ;;  %v801_v27 = vld [vmem:[%s3631_s25 + $0x1068] sm:$0xff]  ;;  %v795_v28 = vld [vmem:[%s3631_s25 + $0x1038] sm:$0xff] }
 0x12c   : > { %3301 = vmatprep.subr.bf16.mxu1 %v3300_v38  ;;  %v722_v38 = vld [vmem:[%s3631_s25 + $0xdf0] sm:$0xff]  ;;  %v3130_v42 = vpack.c.bf16 %v720_v34, %v712_v5  ;;  %v800_v5 = vld [vmem:[%s3631_s25 + $0x1060] sm:$0xff] }
 0x12d   : > { %v794_v34 = vld [vmem:[%s3631_s25 + $0x1030] sm:$0xff] }
 0x12e   : > { %3111 = vmatpush1.bf16.msra.mxu0 %v3110_v43  ;;  %v3322_v43 = vpack.c.bf16 %v722_v38, %v714_v35  ;;  %v3340_v35 = vpack.c.bf16 %v803_v29, %v795_v28  ;;  %v809_v38 = vld [vmem:[%s3631_s25 + $0x10a8] sm:$0xff] }
 0x12f   : > { %3303 = vmatpush1.bf16.msra.mxu1 %v3302_v44  ;;  %3113 = vmatprep.subr.bf16.mxu0 %v3112_v45  ;;  %v3132_v44 = vpack.c.bf16 %v737_v55, %v729_v39  ;;  %v728_v45 = vld [vmem:[%s3631_s25 + $0xe20] sm:$0xff]  ;;  %v817_v39 = vld [vmem:[%s3631_s25 + $0x10e8] sm:$0xff]  ;;  %v811_v55 = vld [vmem:[%s3631_s25 + $0x10b8] sm:$0xff] }
 0x130   : > { %3305 = vmatprep.subr.bf16.mxu1 %v3304_v49  ;;  %v738_v49 = vld [vmem:[%s3631_s25 + $0xe70] sm:$0xff]  ;;  %v3134_v10 = vpack.c.bf16 %v736_v6, %v728_v45  ;;  %v816_v45 = vld [vmem:[%s3631_s25 + $0x10e0] sm:$0xff] }
 0x131   : > { %v810_v6 = vld [vmem:[%s3631_s25 + $0x10b0] sm:$0xff] }
 0x132   : > { %3115 = vmatpush1.bf16.msra.mxu0 %v3114_v53  ;;  %v3326_v53 = vpack.c.bf16 %v738_v49, %v730_v46  ;;  %v3344_v46 = vpack.c.bf16 %v819_v40, %v811_v55  ;;  %v825_v49 = vld [vmem:[%s3631_s25 + $0x1128] sm:$0xff] }
 0x133   : > { %3307 = vmatpush1.bf16.msra.mxu1 %v3306_v54  ;;  %3117 = vmatprep.subr.bf16.mxu0 %v3116_v56  ;;  %v3136_v54 = vpack.c.bf16 %v753_v50, %v745_v20  ;;  %v744_v56 = vld [vmem:[%s3631_s25 + $0xea0] sm:$0xff]  ;;  %v833_v20 = vld [vmem:[%s3631_s25 + $0x1168] sm:$0xff]  ;;  %v827_v50 = vld [vmem:[%s3631_s25 + $0x1138] sm:$0xff] }
 0x134   : > { %3309 = vmatprep.subr.bf16.mxu1 %v3308_v60  ;;  %v754_v60 = vld [vmem:[%s3631_s25 + $0xef0] sm:$0xff]  ;;  %v3138_v0 = vpack.c.bf16 %v752_v57, %v744_v56  ;;  %v832_v56 = vld [vmem:[%s3631_s25 + $0x1160] sm:$0xff] }
 0x135   : > { %v826_v57 = vld [vmem:[%s3631_s25 + $0x1130] sm:$0xff] }
 0x136   : > { %3119 = vmatpush1.bf16.msra.mxu0 %v3118_v2  ;;  %v3330_v2 = vpack.c.bf16 %v754_v60, %v746_v58  ;;  %v3348_v58 = vpack.c.bf16 %v835_v51, %v827_v50  ;;  %v841_v60 = vld [vmem:[%s3631_s25 + $0x11a8] sm:$0xff] }
 0x137   : > { %3311 = vmatpush1.bf16.msra.mxu1 %v3310_v4  ;;  %3121 = vmatprep.subr.bf16.mxu0 %v3120_v7  ;;  %v3140_v4 = vpack.c.bf16 %v769_v62, %v761_v61  ;;  %v760_v7 = vld [vmem:[%s3631_s25 + $0xf20] sm:$0xff]  ;;  %v849_v61 = vld [vmem:[%s3631_s25 + $0x11e8] sm:$0xff]  ;;  %v851_v62 = vld [vmem:[%s3631_s25 + $0x11f8] sm:$0xff] }
 0x138   : > { %3313 = vmatprep.subr.bf16.mxu1 %v3312_v12  ;;  %v770_v12 = vld [vmem:[%s3631_s25 + $0xf70] sm:$0xff]  ;;  %v3142_v17 = vpack.c.bf16 %v768_v8, %v760_v7 }
 0x139   : > { %v842_v7 = vld [vmem:[%s3631_s25 + $0x11b0] sm:$0xff] }
 0x13a   : > { %3123 = vmatpush1.bf16.msra.mxu0 %v3122_v18  ;;  %v3334_v18 = vpack.c.bf16 %v770_v12, %v762_v9  ;;  %v850_v9 = vld [vmem:[%s3631_s25 + $0x11f0] sm:$0xff]  ;;  %v859_v12 = vld [vmem:[%s3631_s25 + $0x1238] sm:$0xff] }
 0x13b   : > { %3315 = vmatpush1.bf16.msra.mxu1 %v3314_v19  ;;  %3125 = vmatprep.subr.bf16.mxu0 %v3124_v21  ;;  %v3144_v19 = vpack.c.bf16 %v785_v14, %v777_v13  ;;  %v776_v21 = vld [vmem:[%s3631_s25 + $0xfa0] sm:$0xff]  ;;  %v867_v13 = vld [vmem:[%s3631_s25 + $0x1278] sm:$0xff]  ;;  %v3354_v15 = vpack.c.bf16 %v850_v9, %v842_v7  ;;  %v937_v7 = vld [vmem:[%s3631_s25 + $0x14a8] sm:$0xff] }
 0x13c   : > { %3317 = vmatprep.subr.bf16.mxu1 %v3316_v25  ;;  %v786_v25 = vld [vmem:[%s3631_s25 + $0xff0] sm:$0xff]  ;;  %v3146_v30 = vpack.c.bf16 %v784_v22, %v776_v21  ;;  %v3356_v21 = vpack.c.bf16 %v867_v13, %v859_v12  ;;  %v939_v9 = vld [vmem:[%s3631_s25 + $0x14b8] sm:$0xff] }
 0x13d   : > { %v866_v22 = vld [vmem:[%s3631_s25 + $0x1270] sm:$0xff] }
 0x13e   : > { %3127 = vmatpush1.bf16.msra.mxu0 %v3126_v31  ;;  %v3338_v31 = vpack.c.bf16 %v786_v25, %v778_v23  ;;  %v873_v23 = vld [vmem:[%s3631_s25 + $0x12a8] sm:$0xff]  ;;  %v875_v25 = vld [vmem:[%s3631_s25 + $0x12b8] sm:$0xff] }
 0x13f   : > { %3319 = vmatpush1.bf16.msra.mxu1 %v3318_v32  ;;  %3129 = vmatprep.subr.bf16.mxu0 %v3128_v33  ;;  %v3148_v32 = vpack.c.bf16 %v801_v27, %v793_v26  ;;  %v792_v33 = vld [vmem:[%s3631_s25 + $0x1020] sm:$0xff]  ;;  %v883_v26 = vld [vmem:[%s3631_s25 + $0x12f8] sm:$0xff] }
 0x140   : > { %3321 = vmatprep.subr.bf16.mxu1 %v3320_v37  ;;  %v802_v37 = vld [vmem:[%s3631_s25 + $0x1070] sm:$0xff]  ;;  %v3150_v41 = vpack.c.bf16 %v800_v5, %v792_v33  ;;  %v3360_v33 = vpack.c.bf16 %v883_v26, %v875_v25 }
 0x141   : > { %v882_v5 = vld [vmem:[%s3631_s25 + $0x12f0] sm:$0xff] }
 0x142   : > { %3131 = vmatpush1.bf16.msra.mxu0 %v3130_v42  ;;  %v3342_v42 = vpack.c.bf16 %v802_v37, %v794_v34  ;;  %v889_v34 = vld [vmem:[%s3631_s25 + $0x1328] sm:$0xff]  ;;  %v891_v37 = vld [vmem:[%s3631_s25 + $0x1338] sm:$0xff] }
 0x143   : > { %3323 = vmatpush1.bf16.msra.mxu1 %v3322_v43  ;;  %3133 = vmatprep.subr.bf16.mxu0 %v3132_v44  ;;  %v3152_v43 = vpack.c.bf16 %v817_v39, %v809_v38  ;;  %v808_v44 = vld [vmem:[%s3631_s25 + $0x10a0] sm:$0xff]  ;;  %v899_v38 = vld [vmem:[%s3631_s25 + $0x1378] sm:$0xff] }
 0x144   : > { %3325 = vmatprep.subr.bf16.mxu1 %v3324_v47  ;;  %v818_v47 = vld [vmem:[%s3631_s25 + $0x10f0] sm:$0xff]  ;;  %v3154_v52 = vpack.c.bf16 %v816_v45, %v808_v44  ;;  %v3364_v44 = vpack.c.bf16 %v899_v38, %v891_v37 }
 0x145   : > { %v898_v45 = vld [vmem:[%s3631_s25 + $0x1370] sm:$0xff] }
 0x146   : > { %3135 = vmatpush1.bf16.msra.mxu0 %v3134_v10  ;;  %v3346_v10 = vpack.c.bf16 %v818_v47, %v810_v6  ;;  %v905_v6 = vld [vmem:[%s3631_s25 + $0x13a8] sm:$0xff]  ;;  %v907_v47 = vld [vmem:[%s3631_s25 + $0x13b8] sm:$0xff] }
 0x147   : > { %3327 = vmatpush1.bf16.msra.mxu1 %v3326_v53  ;;  %3137 = vmatprep.subr.bf16.mxu0 %v3136_v54  ;;  %v3156_v53 = vpack.c.bf16 %v833_v20, %v825_v49  ;;  %v824_v54 = vld [vmem:[%s3631_s25 + $0x1120] sm:$0xff]  ;;  %v915_v49 = vld [vmem:[%s3631_s25 + $0x13f8] sm:$0xff] }
 0x148   : > { %3329 = vmatprep.subr.bf16.mxu1 %v3328_v59  ;;  %v834_v59 = vld [vmem:[%s3631_s25 + $0x1170] sm:$0xff]  ;;  %v3158_v63 = vpack.c.bf16 %v832_v56, %v824_v54  ;;  %v3368_v54 = vpack.c.bf16 %v915_v49, %v907_v47 }
 0x149   : > { %v3350_v48 = vpack.c.bf16 %v834_v59, %v826_v57  ;;  %v914_v56 = vld [vmem:[%s3631_s25 + $0x13f0] sm:$0xff]  ;;  %v921_v57 = vld [vmem:[%s3631_s25 + $0x1428] sm:$0xff]  ;;  %v923_v59 = vld [vmem:[%s3631_s25 + $0x1438] sm:$0xff] }
 0x14a   : > { %3139 = vmatpush1.bf16.msra.mxu0 %v3138_v0  ;;  %v3160_v0 = vpack.c.bf16 %v849_v61, %v841_v60  ;;  %v931_v60 = vld [vmem:[%s3631_s25 + $0x1478] sm:$0xff] }
 0x14b   : > { %3331 = vmatpush1.bf16.msra.mxu1 %v3330_v2  ;;  %3141 = vmatprep.subr.bf16.mxu0 %v3140_v4  ;;  %v840_v2 = vld [vmem:[%s3631_s25 + $0x11a0] sm:$0xff] }
 0x14c   : > { %3333 = vmatprep.subr.bf16.mxu1 %v3332_v11  ;;  %v848_v4 = vld [vmem:[%s3631_s25 + $0x11e0] sm:$0xff]  ;;  %v857_v11 = vld [vmem:[%s3631_s25 + $0x1228] sm:$0xff] }
 0x14d   : > { %v3162_v14 = vpack.c.bf16 %v848_v4, %v840_v2  ;;  %v3372_v2 = vpack.c.bf16 %v931_v60, %v923_v59  ;;  %v930_v4 = vld [vmem:[%s3631_s25 + $0x1470] sm:$0xff] }
 0x14e   : > { %3143 = vmatpush1.bf16.msra.mxu0 %v3142_v17  ;;  %v856_v17 = vld [vmem:[%s3631_s25 + $0x1220] sm:$0xff] }
 0x14f   : > { %3335 = vmatpush1.bf16.msra.mxu1 %v3334_v18  ;;  %3145 = vmatprep.subr.bf16.mxu0 %v3144_v19  ;;  %v864_v18 = vld [vmem:[%s3631_s25 + $0x1260] sm:$0xff]  ;;  %v858_v19 = vld [vmem:[%s3631_s25 + $0x1230] sm:$0xff] }
 0x150   : > { %3337 = vmatprep.subr.bf16.mxu1 %v3336_v24  ;;  %v881_v24 = vld [vmem:[%s3631_s25 + $0x12e8] sm:$0xff]  ;;  %v3166_v27 = vpack.c.bf16 %v864_v18, %v856_v17  ;;  %v3358_v28 = vpack.c.bf16 %v866_v22, %v858_v19  ;;  %v946_v18 = vld [vmem:[%s3631_s25 + $0x14f0] sm:$0xff]  ;;  %v955_v22 = vld [vmem:[%s3631_s25 + $0x1538] sm:$0xff] }
 0x151   : > { %v3168_v29 = vpack.c.bf16 %v881_v24, %v873_v23  ;;  %v953_v19 = vld [vmem:[%s3631_s25 + $0x1528] sm:$0xff]  ;;  %v963_v23 = vld [vmem:[%s3631_s25 + $0x1578] sm:$0xff] }
 0x152   : > { %3147 = vmatpush1.bf16.msra.mxu0 %v3146_v30  ;;  %v872_v30 = vld [vmem:[%s3631_s25 + $0x12a0] sm:$0xff] }
 0x153   : > { %3339 = vmatpush1.bf16.msra.mxu1 %v3338_v31  ;;  %3149 = vmatprep.subr.bf16.mxu0 %v3148_v32  ;;  %v880_v31 = vld [vmem:[%s3631_s25 + $0x12e0] sm:$0xff]  ;;  %v874_v32 = vld [vmem:[%s3631_s25 + $0x12b0] sm:$0xff] }
 0x154   : > { %3341 = vmatprep.subr.bf16.mxu1 %v3340_v35  ;;  %v897_v35 = vld [vmem:[%s3631_s25 + $0x1368] sm:$0xff]  ;;  %v3170_v39 = vpack.c.bf16 %v880_v31, %v872_v30  ;;  %v3362_v55 = vpack.c.bf16 %v882_v5, %v874_v32  ;;  %v3380_v30 = vpack.c.bf16 %v963_v23, %v955_v22  ;;  %v962_v31 = vld [vmem:[%s3631_s25 + $0x1570] sm:$0xff]  ;;  %v971_v5 = vld [vmem:[%s3631_s25 + $0x15b8] sm:$0xff] }
 0x155   : > { %1681 = vmatmul.mubr.f32.vlgmr.msra.gmra.mrb[2].mxu0 %v3784_v36  ;;  %v3172_v40 = vpack.c.bf16 %v897_v35, %v889_v34  ;;  %v969_v32 = vld [vmem:[%s3631_s25 + $0x15a8] sm:$0xff]  ;;  %v979_v34 = vld [vmem:[%s3631_s25 + $0x15f8] sm:$0xff] }
 0x156   : > { %3151 = vmatpush1.bf16.msra.mxu0 %v3150_v41  ;;  %1894 = vmatmul.mubr.f32.vlgmr.msra.gmra.mrb[2].mxu1 %v3784_v36  ;;  %v843_v36 = vld [vmem:[%s3631_s25 + $0x11b8] sm:$0xff]  ;;  %v888_v41 = vld [vmem:[%s3631_s25 + $0x1320] sm:$0xff] }
 0x157   : > { %3343 = vmatpush1.bf16.msra.mxu1 %v3342_v42  ;;  %3153 = vmatprep.subr.bf16.mxu0 %v3152_v43  ;;  %v3352_v8 = vpack.c.bf16 %v851_v62, %v843_v36  ;;  %v896_v42 = vld [vmem:[%s3631_s25 + $0x1360] sm:$0xff]  ;;  %v890_v43 = vld [vmem:[%s3631_s25 + $0x1330] sm:$0xff] }
 0x158   : > { %3345 = vmatprep.subr.bf16.mxu1 %v3344_v46  ;;  %1751 = vmatprep.mubr.f32.mxu0 %v3937_v1  ;;  %v913_v46 = vld [vmem:[%s3631_s25 + $0x13e8] sm:$0xff]  ;;  %v3174_v20 = vpack.c.bf16 %v896_v42, %v888_v41  ;;  %v3366_v50 = vpack.c.bf16 %v898_v45, %v890_v43  ;;  %v3384_v41 = vpack.c.bf16 %v979_v34, %v971_v5  ;;  %v978_v42 = vld [vmem:[%s3631_s25 + $0x15f0] sm:$0xff]  ;;  %v987_v45 = vld [vmem:[%s3631_s25 + $0x1638] sm:$0xff] }
 0x159   : > { %1964 = vmatprep.mubr.f32.mxu1 %v3937_v1  ;;  %v865_v1 = vld [vmem:[%s3631_s25 + $0x1268] sm:$0xff]  ;;  %v3176_v51 = vpack.c.bf16 %v913_v46, %v905_v6  ;;  %v995_v6 = vld [vmem:[%s3631_s25 + $0x1678] sm:$0xff] }
 0x15a   : > { %3155 = vmatpush1.bf16.msra.mxu0 %v3154_v52  ;;  %v3164_v16 = vpack.c.bf16 %v865_v1, %v857_v11  ;;  %v904_v52 = vld [vmem:[%s3631_s25 + $0x13a0] sm:$0xff]  ;;  %v947_v11 = vld [vmem:[%s3631_s25 + $0x14f8] sm:$0xff]  ;;  %v985_v43 = vld [vmem:[%s3631_s25 + $0x1628] sm:$0xff] }
 0x15b   : > { %3347 = vmatpush1.bf16.msra.mxu1 %v3346_v10  ;;  %3157 = vmatprep.subr.bf16.mxu0 %v3156_v53  ;;  %v912_v10 = vld [vmem:[%s3631_s25 + $0x13e0] sm:$0xff]  ;;  %v906_v53 = vld [vmem:[%s3631_s25 + $0x13b0] sm:$0xff]  ;;  %v3376_v17 = vpack.c.bf16 %v947_v11, %v939_v9 }
 0x15c   : > { %3349 = vmatprep.subr.bf16.mxu1 %v3348_v58  ;;  %v929_v58 = vld [vmem:[%s3631_s25 + $0x1468] sm:$0xff]  ;;  %v3178_v61 = vpack.c.bf16 %v912_v10, %v904_v52  ;;  %v3370_v36 = vpack.c.bf16 %v914_v56, %v906_v53  ;;  %v3388_v52 = vpack.c.bf16 %v995_v6, %v987_v45  ;;  %v994_v10 = vld [vmem:[%s3631_s25 + $0x1670] sm:$0xff]  ;;  %v1003_v56 = vld [vmem:[%s3631_s25 + $0x16b8] sm:$0xff] }
 0x15d   : > { %v3180_v62 = vpack.c.bf16 %v929_v58, %v921_v57  ;;  %v1001_v53 = vld [vmem:[%s3631_s25 + $0x16a8] sm:$0xff]  ;;  %v1011_v57 = vld [vmem:[%s3631_s25 + $0x16f8] sm:$0xff] }
 0x15e   : > { %3159 = vmatpush1.bf16.msra.mxu0 %v3158_v63  ;;  %v920_v63 = vld [vmem:[%s3631_s25 + $0x1420] sm:$0xff] }
 0x15f   : > { %3351 = vmatpush1.bf16.msra.mxu1 %v3350_v48  ;;  %3161 = vmatprep.subr.bf16.mxu0 %v3160_v0  ;;  %v928_v48 = vld [vmem:[%s3631_s25 + $0x1460] sm:$0xff]  ;;  %v922_v0 = vld [vmem:[%s3631_s25 + $0x1430] sm:$0xff] }
 0x160   : > { %3353 = vmatprep.subr.bf16.mxu1 %v3352_v8  ;;  %v945_v8 = vld [vmem:[%s3631_s25 + $0x14e8] sm:$0xff]  ;;  %v3182_v1 = vpack.c.bf16 %v928_v48, %v920_v63  ;;  %v3374_v12 = vpack.c.bf16 %v930_v4, %v922_v0  ;;  %v3392_v63 = vpack.c.bf16 %v1011_v57, %v1003_v56  ;;  %v1010_v48 = vld [vmem:[%s3631_s25 + $0x16f0] sm:$0xff]  ;;  %v1019_v4 = vld [vmem:[%s3631_s25 + $0x1738] sm:$0xff] }
 0x161   : > { %v3184_v13 = vpack.c.bf16 %v945_v8, %v937_v7  ;;  %v1017_v0 = vld [vmem:[%s3631_s25 + $0x1728] sm:$0xff]  ;;  %v1027_v7 = vld [vmem:[%s3631_s25 + $0x1778] sm:$0xff] }
 0x162   : > { %3163 = vmatpush1.bf16.msra.mxu0 %v3162_v14  ;;  %v936_v14 = vld [vmem:[%s3631_s25 + $0x14a0] sm:$0xff] }
 0x163   : > { %3355 = vmatpush1.bf16.msra.mxu1 %v3354_v15  ;;  %3165 = vmatprep.subr.bf16.mxu0 %v3164_v16  ;;  %v944_v15 = vld [vmem:[%s3631_s25 + $0x14e0] sm:$0xff]  ;;  %v938_v16 = vld [vmem:[%s3631_s25 + $0x14b0] sm:$0xff] }
 0x164   : > { %3357 = vmatprep.subr.bf16.mxu1 %v3356_v21  ;;  %v961_v21 = vld [vmem:[%s3631_s25 + $0x1568] sm:$0xff]  ;;  %v3186_v24 = vpack.c.bf16 %v944_v15, %v936_v14  ;;  %v3378_v25 = vpack.c.bf16 %v946_v18, %v938_v16  ;;  %v3396_v14 = vpack.c.bf16 %v1027_v7, %v1019_v4  ;;  %v1026_v15 = vld [vmem:[%s3631_s25 + $0x1770] sm:$0xff]  ;;  %v1035_v18 = vld [vmem:[%s3631_s25 + $0x17b8] sm:$0xff] }
 0x165   : > { %v3188_v26 = vpack.c.bf16 %v961_v21, %v953_v19  ;;  %v1033_v16 = vld [vmem:[%s3631_s25 + $0x17a8] sm:$0xff]  ;;  %v1043_v19 = vld [vmem:[%s3631_s25 + $0x17f8] sm:$0xff] }
 0x166   : > { %3167 = vmatpush1.bf16.msra.mxu0 %v3166_v27  ;;  %v952_v27 = vld [vmem:[%s3631_s25 + $0x1520] sm:$0xff] }
 0x167   : > { %3359 = vmatpush1.bf16.msra.mxu1 %v3358_v28  ;;  %3169 = vmatprep.subr.bf16.mxu0 %v3168_v29  ;;  %v960_v28 = vld [vmem:[%s3631_s25 + $0x1560] sm:$0xff]  ;;  %v954_v29 = vld [vmem:[%s3631_s25 + $0x1530] sm:$0xff] }
 0x168   : > { %3361 = vmatprep.subr.bf16.mxu1 %v3360_v33  ;;  %v977_v33 = vld [vmem:[%s3631_s25 + $0x15e8] sm:$0xff]  ;;  %v3190_v35 = vpack.c.bf16 %v960_v28, %v952_v27  ;;  %v3382_v37 = vpack.c.bf16 %v962_v31, %v954_v29  ;;  %v3400_v27 = vpack.c.bf16 %v1043_v19, %v1035_v18  ;;  %v1042_v28 = vld [vmem:[%s3631_s25 + $0x17f0] sm:$0xff]  ;;  %v1995_v29 = vld [vmem:[%s4449_s6 + $0x80] sm:$0xff] }
 0x169   : > { %v3192_v38 = vpack.c.bf16 %v977_v33, %v969_v32  ;;  %v2027_v31 = vld [vmem:[%s4449_s6 + $0x180] sm:$0xff]  ;;  %v2028_v32 = vld [vmem:[%s4449_s6 + $0x188] sm:$0xff] }
 0x16a   : > { %3171 = vmatpush1.bf16.msra.mxu0 %v3170_v39  ;;  %v968_v39 = vld [vmem:[%s3631_s25 + $0x15a0] sm:$0xff] }
 0x16b   : > { %3363 = vmatpush1.bf16.msra.mxu1 %v3362_v55  ;;  %3173 = vmatprep.subr.bf16.mxu0 %v3172_v40  ;;  %v976_v55 = vld [vmem:[%s3631_s25 + $0x15e0] sm:$0xff]  ;;  %v970_v40 = vld [vmem:[%s3631_s25 + $0x15b0] sm:$0xff] }
 0x16c   : > { %3365 = vmatprep.subr.bf16.mxu1 %v3364_v44  ;;  %v993_v44 = vld [vmem:[%s3631_s25 + $0x1668] sm:$0xff]  ;;  %v3194_v46 = vpack.c.bf16 %v976_v55, %v968_v39  ;;  %v3386_v47 = vpack.c.bf16 %v978_v42, %v970_v40  ;;  %v3436_v39 = vpack.c.bf16 %v2028_v32, %v2027_v31  ;;  %v1997_v40 = vld [vmem:[%s4449_s6 + $0x90] sm:$0xff]  ;;  %v4506_v32 = vld [vmem:[%s261_s12] sm:$0xff] }
 0x16d   : > { %v3196_v49 = vpack.c.bf16 %v993_v44, %v985_v43  ;;  %v2012_v55 = vld [vmem:[%s4449_s6 + $0x108] sm:$0xff]  ;;  %v2029_v42 = vld [vmem:[%s4449_s6 + $0x190] sm:$0xff]  ;;  %v2030_v43 = vld [vmem:[%s4449_s6 + $0x198] sm:$0xff] }
 0x16e   : > { %3175 = vmatpush1.bf16.msra.mxu0 %v3174_v20  ;;  %v984_v20 = vld [vmem:[%s3631_s25 + $0x1620] sm:$0xff] }
 0x16f   : > { %3367 = vmatpush1.bf16.msra.mxu1 %v3366_v50  ;;  %3177 = vmatprep.subr.bf16.mxu0 %v3176_v51  ;;  %v992_v50 = vld [vmem:[%s3631_s25 + $0x1660] sm:$0xff]  ;;  %v986_v51 = vld [vmem:[%s3631_s25 + $0x1630] sm:$0xff] }
 0x170   : > { %3369 = vmatprep.subr.bf16.mxu1 %v3368_v54  ;;  %v1009_v54 = vld [vmem:[%s3631_s25 + $0x16e8] sm:$0xff]  ;;  %v3198_v58 = vpack.c.bf16 %v992_v50, %v984_v20  ;;  %v3390_v59 = vpack.c.bf16 %v994_v10, %v986_v51  ;;  %v3440_v20 = vpack.c.bf16 %v2030_v43, %v2029_v42  ;;  %v2014_v50 = vld [vmem:[%s4449_s6 + $0x118] sm:$0xff]  ;;  %v1999_v51 = vld [vmem:[%s4449_s6 + $0xa0] sm:$0xff] }
 0x171   : > { %v3200_v60 = vpack.c.bf16 %v1009_v54, %v1001_v53  ;;  %v3567_v10 = vld.sshfl [vmem:[%s4619_s0 + $0x8] sm:$0x33 pattern:$0x76325410]  ;;  %v2031_v53 = vld [vmem:[%s4449_s6 + $0x1a0] sm:$0xff] }
 0x172   : > { %3179 = vmatpush1.bf16.msra.mxu0 %v3178_v61  ;;  %v1000_v61 = vld [vmem:[%s3631_s25 + $0x16a0] sm:$0xff]  ;;  %v2032_v54 = vld [vmem:[%s4449_s6 + $0x1a8] sm:$0xff] }
 0x173   : > { %3371 = vmatpush1.bf16.msra.mxu1 %v3370_v36  ;;  %3181 = vmatprep.subr.bf16.mxu0 %v3180_v62  ;;  %v1008_v36 = vld [vmem:[%s3631_s25 + $0x16e0] sm:$0xff]  ;;  %v1002_v62 = vld [vmem:[%s3631_s25 + $0x16b0] sm:$0xff]  ;;  %v2008_v42 = vld [vmem:[%s4449_s6 + $0xe8] sm:$0xff] }
 0x174   : > { %3373 = vmatprep.subr.bf16.mxu1 %v3372_v2  ;;  %v1025_v2 = vld [vmem:[%s3631_s25 + $0x1768] sm:$0xff]  ;;  %v3202_v8 = vpack.c.bf16 %v1008_v36, %v1000_v61  ;;  %v3394_v9 = vpack.c.bf16 %v1010_v48, %v1002_v62  ;;  %v2015_v61 = vld [vmem:[%s4449_s6 + $0x120] sm:$0xff]  ;;  %v3444_v36 = vpack.c.bf16 %v2032_v54, %v2031_v53  ;;  %v2002_v48 = vld [vmem:[%s4449_s6 + $0xb8] sm:$0xff] }
 0x175   : > { %v3204_v11 = vpack.c.bf16 %v1025_v2, %v1017_v0  ;;  %v2016_v62 = vld [vmem:[%s4449_s6 + $0x128] sm:$0xff]  ;;  %v2033_v0 = vld [vmem:[%s4449_s6 + $0x1b0] sm:$0xff]  ;;  %v2034_v2 = vld [vmem:[%s4449_s6 + $0x1b8] sm:$0xff] }
 0x176   : > { %3183 = vmatpush1.bf16.msra.mxu0 %v3182_v1  ;;  %v1016_v1 = vld [vmem:[%s3631_s25 + $0x1720] sm:$0xff]  ;;  %v3446_v7 = vpack.c.bf16 %v2016_v62, %v2015_v61  ;;  %v2041_v61 = vld [vmem:[%s4449_s6 + $0x1f0] sm:$0xff] }
 0x177   : > { %3375 = vmatpush1.bf16.msra.mxu1 %v3374_v12  ;;  %3185 = vmatprep.subr.bf16.mxu0 %v3184_v13  ;;  %v1024_v12 = vld [vmem:[%s3631_s25 + $0x1760] sm:$0xff]  ;;  %v1018_v13 = vld [vmem:[%s3631_s25 + $0x1730] sm:$0xff] }
 0x178   : > { %3377 = vmatprep.subr.bf16.mxu1 %v3376_v17  ;;  %v1041_v17 = vld [vmem:[%s3631_s25 + $0x17e8] sm:$0xff]  ;;  %v3206_v21 = vpack.c.bf16 %v1024_v12, %v1016_v1  ;;  %v3398_v22 = vpack.c.bf16 %v1026_v15, %v1018_v13  ;;  %v2017_v1 = vld [vmem:[%s4449_s6 + $0x130] sm:$0xff]  ;;  %v3448_v12 = vpack.c.bf16 %v2034_v2, %v2033_v0  ;;  %v2018_v13 = vld [vmem:[%s4449_s6 + $0x138] sm:$0xff] }
 0x179   : > { %v3208_v23 = vpack.c.bf16 %v1041_v17, %v1033_v16  ;;  %v2004_v15 = vld [vmem:[%s4449_s6 + $0xc8] sm:$0xff]  ;;  %v2035_v16 = vld [vmem:[%s4449_s6 + $0x1c0] sm:$0xff]  ;;  %v3450_v19 = vpack.c.bf16 %v2018_v13, %v2017_v1 }
 0x17a   : > { %3187 = vmatpush1.bf16.msra.mxu0 %v3186_v24  ;;  %v1032_v24 = vld [vmem:[%s3631_s25 + $0x17a0] sm:$0xff]  ;;  %v2036_v17 = vld [vmem:[%s4449_s6 + $0x1c8] sm:$0xff] }
 0x17b   : > { %3379 = vmatpush1.bf16.msra.mxu1 %v3378_v25  ;;  %3189 = vmatprep.subr.bf16.mxu0 %v3188_v26  ;;  %v1040_v25 = vld [vmem:[%s3631_s25 + $0x17e0] sm:$0xff]  ;;  %v1034_v26 = vld [vmem:[%s3631_s25 + $0x17b0] sm:$0xff] }
 0x17c   : > { %3381 = vmatprep.subr.bf16.mxu1 %v3380_v30  ;;  %v1996_v30 = vld [vmem:[%s4449_s6 + $0x88] sm:$0xff]  ;;  %v3210_v33 = vpack.c.bf16 %v1040_v25, %v1032_v24  ;;  %v3402_v5 = vpack.c.bf16 %v1042_v28, %v1034_v26  ;;  %v2019_v24 = vld [vmem:[%s4449_s6 + $0x140] sm:$0xff]  ;;  %v3452_v25 = vpack.c.bf16 %v2036_v17, %v2035_v16  ;;  %v2006_v28 = vld [vmem:[%s4449_s6 + $0xd8] sm:$0xff] }
 0x17d   : > { %v3404_v34 = vpack.c.bf16 %v1996_v30, %v1995_v29  ;;  %v2020_v26 = vld [vmem:[%s4449_s6 + $0x148] sm:$0xff]  ;;  %v2037_v29 = vld [vmem:[%s4449_s6 + $0x1d0] sm:$0xff]  ;;  %v2038_v30 = vld [vmem:[%s4449_s6 + $0x1d8] sm:$0xff] }
 0x17e   : > { %3191 = vmatpush1.bf16.msra.mxu0 %v3190_v35  ;;  %v1979_v35 = vld [vmem:[%s4449_s6] sm:$0xff]  ;;  %v2060_v16 = vld [vmem:[%s4449_s6 + $0x288] sm:$0xff] }
 0x17f   : > { %3383 = vmatpush1.bf16.msra.mxu1 %v3382_v37  ;;  %3193 = vmatprep.subr.bf16.mxu0 %v3192_v38  ;;  %v1980_v37 = vld [vmem:[%s4449_s6 + $0x8] sm:$0xff]  ;;  %v2011_v38 = vld [vmem:[%s4449_s6 + $0x100] sm:$0xff] }
 0x180   : > { %3385 = vmatprep.subr.bf16.mxu1 %v3384_v41  ;;  %v1998_v41 = vld [vmem:[%s4449_s6 + $0x98] sm:$0xff]  ;;  %v3406_v44 = vpack.c.bf16 %v1980_v37, %v1979_v35  ;;  %v3438_v45 = vpack.c.bf16 %v2012_v55, %v2011_v38  ;;  %v1989_v37 = vld [vmem:[%s4449_s6 + $0x50] sm:$0xff]  ;;  %v3456_v55 = vpack.c.bf16 %v2038_v30, %v2037_v29  ;;  %v2039_v43 = vld [vmem:[%s4449_s6 + $0x1e0] sm:$0xff] }
 0x181   : > { %v3408_v6 = vpack.c.bf16 %v1998_v41, %v1997_v40  ;;  %v1990_v38 = vld [vmem:[%s4449_s6 + $0x58] sm:$0xff]  ;;  %v2007_v41 = vld [vmem:[%s4449_s6 + $0xe0] sm:$0xff]  ;;  %v2076_v30 = vld [vmem:[%s4449_s6 + $0x308] sm:$0xff] }
 0x182   : > { %3195 = vmatpush1.bf16.msra.mxu0 %v3194_v46  ;;  %v1981_v46 = vld [vmem:[%s4449_s6 + $0x10] sm:$0xff]  ;;  %v2022_v40 = vld [vmem:[%s4449_s6 + $0x158] sm:$0xff]  ;;  %v2023_v54 = vld [vmem:[%s4449_s6 + $0x160] sm:$0xff] }
 0x183   : > { %3387 = vmatpush1.bf16.msra.mxu1 %v3386_v47  ;;  %3197 = vmatprep.subr.bf16.mxu0 %v3196_v49  ;;  %v1982_v47 = vld [vmem:[%s4449_s6 + $0x18] sm:$0xff]  ;;  %v2013_v49 = vld [vmem:[%s4449_s6 + $0x110] sm:$0xff] }
 0x184   : > { %3389 = vmatprep.subr.bf16.mxu1 %v3388_v52  ;;  %v2000_v52 = vld [vmem:[%s4449_s6 + $0xa8] sm:$0xff]  ;;  %v3410_v56 = vpack.c.bf16 %v1982_v47, %v1981_v46  ;;  %v3442_v57 = vpack.c.bf16 %v2014_v50, %v2013_v49  ;;  %v1048_v46 = vsub.s32 0, %v3617_v3  ;;  %v1991_v50 = vld [vmem:[%s4449_s6 + $0x60] sm:$0xff] }
 0x186   : > { %3199 = vmatpush1.bf16.msra.mxu0 %v3198_v58  ;;  %v3412_v58 = vpack.c.bf16 %v2000_v52, %v1999_v51  ;;  %v1992_v51 = vld [vmem:[%s4449_s6 + $0x68] sm:$0xff]  ;;  %v1049_v0 = vrot.slane %v4506_v32, %v1048_v46  ;;  %v2095_v46 = vld [vmem:[%s4449_s6 + $0x3a0] sm:$0xff] }
 0x187   : > { %3391 = vmatpush1.bf16.msra.mxu1 %v3390_v59  ;;  %3201 = vmatprep.subr.bf16.mxu0 %v3200_v60  ;;  %v1983_v59 = vld [vmem:[%s4449_s6 + $0x20] sm:$0xff]  ;;  %v1984_v60 = vld [vmem:[%s4449_s6 + $0x28] sm:$0xff] }
 0x188   : > { %3393 = vmatprep.subr.bf16.mxu1 %v3392_v63  ;;  %v2001_v63 = vld [vmem:[%s4449_s6 + $0xb0] sm:$0xff]  ;;  %v3414_v4 = vpack.c.bf16 %v1984_v60, %v1983_v59  ;;  %v2010_v60 = vld [vmem:[%s4449_s6 + $0xf8] sm:$0xff] }
 0x18a   : > { %3203 = vmatpush1.bf16.msra.mxu0 %v3202_v8  ;;  %v3416_v8 = vpack.c.bf16 %v2002_v48, %v2001_v63  ;;  %v3430_v48 = vpack.c.bf16 %v1992_v51, %v1991_v50  ;;  %v2047_v51 = vld [vmem:[%s4449_s6 + $0x220] sm:$0xff] }
 0x18b   : > { %3395 = vmatpush1.bf16.msra.mxu1 %v3394_v9  ;;  %3205 = vmatprep.subr.bf16.mxu0 %v3204_v11  ;;  %v1985_v9 = vld [vmem:[%s4449_s6 + $0x30] sm:$0xff]  ;;  %v1986_v11 = vld [vmem:[%s4449_s6 + $0x38] sm:$0xff] }
 0x18c   : > { %3397 = vmatprep.subr.bf16.mxu1 %v3396_v14  ;;  %v2003_v14 = vld [vmem:[%s4449_s6 + $0xc0] sm:$0xff]  ;;  %v3418_v18 = vpack.c.bf16 %v1986_v11, %v1985_v9  ;;  %v2025_v9 = vld [vmem:[%s4449_s6 + $0x170] sm:$0xff] }
 0x18e   : > { %3207 = vmatpush1.bf16.msra.mxu0 %v3206_v21  ;;  %v3420_v21 = vpack.c.bf16 %v2004_v15, %v2003_v14  ;;  %v2026_v14 = vld [vmem:[%s4449_s6 + $0x178] sm:$0xff]  ;;  %v2059_v15 = vld [vmem:[%s4449_s6 + $0x280] sm:$0xff] }
 0x18f   : > { %3399 = vmatpush1.bf16.msra.mxu1 %v3398_v22  ;;  %3209 = vmatprep.subr.bf16.mxu0 %v3208_v23  ;;  %v1987_v22 = vld [vmem:[%s4449_s6 + $0x40] sm:$0xff]  ;;  %v1988_v23 = vld [vmem:[%s4449_s6 + $0x48] sm:$0xff] }
 0x190   : > { %3401 = vmatprep.subr.bf16.mxu1 %v3400_v27  ;;  %v2005_v27 = vld [vmem:[%s4449_s6 + $0xd0] sm:$0xff]  ;;  %v3422_v31 = vpack.c.bf16 %v1988_v23, %v1987_v22  ;;  %v3466_v23 = vpack.c.bf16 %v2026_v14, %v2025_v9  ;;  %v2100_v9 = vld [vmem:[%s4449_s6 + $0x3c8] sm:$0xff] }
 0x191   : > { %v3424_v35 = vpack.c.bf16 %v2006_v28, %v2005_v27  ;;  %v2075_v27 = vld [vmem:[%s4449_s6 + $0x300] sm:$0xff]  ;;  %v2052_v14 = vld [vmem:[%s4449_s6 + $0x248] sm:$0xff] }
 0x192   : > { %3211 = vmatpush1.bf16.msra.mxu0 %v3210_v33  ;;  %v1052_v33 = vsub.s32 1, %v3617_v3 }
 0x193   : > { %3403 = vmatpush1.bf16.msra.mxu1 %v3402_v5  ;;  %3405 = vmatprep.subr.bf16.mxu0 %v3404_v34  ;;  %v3454_v5 = vpack.c.bf16 %v2020_v26, %v2019_v24  ;;  %v1060_v34 = vsub.s32 3, %v3617_v3  ;;  %v3468_v24 = vpack.c.bf16 %v2060_v16, %v2059_v15  ;;  %v2044_v26 = vld [vmem:[%s4449_s6 + $0x208] sm:$0xff]  ;;  %v2083_v15 = vld [vmem:[%s4449_s6 + $0x340] sm:$0xff] }
 0x194   : > { %3437 = vmatprep.subr.bf16.mxu1 %v3436_v39  ;;  %v2021_v39 = vld [vmem:[%s4449_s6 + $0x150] sm:$0xff] }
 0x195   : > { %1752 = vmatmul.mubr.f32.vlgmr.msra.gmra.mrb[2].mxu0 %v3567_v10  ;;  %v1061_v47 = vrot.slane %v4506_v32, %v1060_v34  ;;  %v3458_v49 = vpack.c.bf16 %v2022_v40, %v2021_v39  ;;  %v2094_v34 = vld [vmem:[%s4449_s6 + $0x398] sm:$0xff] }
 0x196   : > { %1965 = vmatmul.mubr.f32.vlgmr.msra.gmra.mrb[2].mxu1 %v3567_v10  ;;  %3407 = vmatpush3.bf16.msra.mxu0 %v3406_v44  ;;  %v2040_v44 = vld [vmem:[%s4449_s6 + $0x1e8] sm:$0xff]  ;;  %v1056_v10 = vsub.s32 2, %v3617_v3  ;;  %v2046_v40 = vld [vmem:[%s4449_s6 + $0x218] sm:$0xff] }
 0x197   : > { %3439 = vmatpush3.bf16.msra.mxu1 %v3438_v45  ;;  %3409 = vmatprep.subr.bf16.mxu0 %v3408_v6  ;;  %v1053_v45 = vrot.slane %v4506_v32, %v1052_v33  ;;  %v3426_v6 = vpack.c.bf16 %v1990_v38, %v1989_v37  ;;  %v3460_v53 = vpack.c.bf16 %v2040_v44, %v2039_v43  ;;  %v2062_v33 = vld [vmem:[%s4449_s6 + $0x298] sm:$0xff] }
 0x198   : > { %3441 = vmatprep.subr.bf16.mxu1 %v3440_v20  ;;  %v3428_v20 = vpack.c.bf16 %v2008_v42, %v2007_v41  ;;  %v1057_v11 = vrot.slane %v4506_v32, %v1056_v10  ;;  %v3502_v38 = vpack.c.bf16 %v2076_v30, %v2075_v27  ;;  %v2077_v41 = vld [vmem:[%s4449_s6 + $0x310] sm:$0xff]  ;;  %v2078_v44 = vld [vmem:[%s4449_s6 + $0x318] sm:$0xff]  ;;  %v2079_v10 = vld [vmem:[%s4449_s6 + $0x320] sm:$0xff] }
 0x199   : > { %v2054_v27 = vld [vmem:[%s4449_s6 + $0x258] sm:$0xff] }
 0x19a   : > { %3411 = vmatpush3.bf16.msra.mxu0 %v3410_v56  ;;  %v2024_v56 = vld [vmem:[%s4449_s6 + $0x168] sm:$0xff]  ;;  %v2086_v30 = vld [vmem:[%s4449_s6 + $0x358] sm:$0xff] }
 0x19b   : > { %3443 = vmatpush3.bf16.msra.mxu1 %v3442_v57  ;;  %3413 = vmatprep.subr.bf16.mxu0 %v3412_v58  ;;  %v2009_v57 = vld [vmem:[%s4449_s6 + $0xf0] sm:$0xff] }
 0x19c   : > { %3445 = vmatprep.subr.bf16.mxu1 %v3444_v36  ;;  %v2042_v36 = vld [vmem:[%s4449_s6 + $0x1f8] sm:$0xff] }
 0x19d   : > { %v3464_v13 = vpack.c.bf16 %v2042_v36, %v2041_v61 }
 0x19e   : > { %3415 = vmatpush3.bf16.msra.mxu0 %v3414_v4  ;;  %v3462_v4 = vpack.c.bf16 %v2024_v56, %v2023_v54  ;;  %v2080_v54 = vld [vmem:[%s4449_s6 + $0x328] sm:$0xff]  ;;  %v2065_v56 = vld [vmem:[%s4449_s6 + $0x2b0] sm:$0xff] }
 0x19f   : > { %3447 = vmatpush3.bf16.msra.mxu1 %v3446_v7  ;;  %3417 = vmatprep.subr.bf16.mxu0 %v3416_v8  ;;  %v1993_v7 = vld [vmem:[%s4449_s6 + $0x70] sm:$0xff]  ;;  %v1994_v8 = vld [vmem:[%s4449_s6 + $0x78] sm:$0xff]  ;;  %v3510_v61 = vpack.c.bf16 %v2080_v54, %v2079_v10 }
 0x1a0   : > { %3449 = vmatprep.subr.bf16.mxu1 %v3448_v12  ;;  %v3432_v12 = vpack.c.bf16 %v2010_v60, %v2009_v57  ;;  %v2066_v57 = vld [vmem:[%s4449_s6 + $0x2b8] sm:$0xff]  ;;  %v2089_v10 = vld [vmem:[%s4449_s6 + $0x370] sm:$0xff] }
 0x1a1   : > { %v3480_v36 = vpack.c.bf16 %v2066_v57, %v2065_v56  ;;  %v1064_v56 = vsub.s32 4, %v3617_v3  ;;  %v1072_v57 = vsub.s32 6, %v3617_v3 }
 0x1a2   : > { %3419 = vmatpush3.bf16.msra.mxu0 %v3418_v18  ;;  %v2091_v18 = vld [vmem:[%s4449_s6 + $0x380] sm:$0xff] }
 0x1a3   : > { %3451 = vmatpush3.bf16.msra.mxu1 %v3450_v19  ;;  %3421 = vmatprep.subr.bf16.mxu0 %v3420_v21  ;;  %v2092_v19 = vld [vmem:[%s4449_s6 + $0x388] sm:$0xff]  ;;  %v3434_v21 = vpack.c.bf16 %v1994_v8, %v1993_v7  ;;  %v2099_v8 = vld [vmem:[%s4449_s6 + $0x3c0] sm:$0xff] }
 0x1a4   : > { %3453 = vmatprep.subr.bf16.mxu1 %v3452_v25  ;;  %v2043_v25 = vld [vmem:[%s4449_s6 + $0x200] sm:$0xff]  ;;  %v3500_v29 = vpack.c.bf16 %v2092_v19, %v2091_v18  ;;  %v2068_v7 = vld [vmem:[%s4449_s6 + $0x2c8] sm:$0xff]  ;;  %v3516_v16 = vpack.c.bf16 %v2100_v9, %v2099_v8  ;;  %v2069_v18 = vld [vmem:[%s4449_s6 + $0x2d0] sm:$0xff] }
 0x1a5   : > { %v2070_v19 = vld [vmem:[%s4449_s6 + $0x2d8] sm:$0xff] }
 0x1a6   : > { %3423 = vmatpush3.bf16.msra.mxu0 %v3422_v31  ;;  %v2061_v31 = vld [vmem:[%s4449_s6 + $0x290] sm:$0xff] }
 0x1a7   : > { %3455 = vmatpush3.bf16.msra.mxu1 %v3454_v5  ;;  %3425 = vmatprep.subr.bf16.mxu0 %v3424_v35  ;;  %v2093_v5 = vld [vmem:[%s4449_s6 + $0x390] sm:$0xff]  ;;  %v3470_v35 = vpack.c.bf16 %v2044_v26, %v2043_v25  ;;  %v3472_v39 = vpack.c.bf16 %v2062_v33, %v2061_v31  ;;  %v3488_v25 = vpack.c.bf16 %v2070_v19, %v2069_v18  ;;  %v2071_v31 = vld [vmem:[%s4449_s6 + $0x2e0] sm:$0xff]  ;;  %v2072_v33 = vld [vmem:[%s4449_s6 + $0x2e8] sm:$0xff] }
 0x1a8   : > { %v1327_v52 = vpop.f32.mrb[0].mxu0  ;;  %3457 = vmatprep.subr.bf16.mxu1 %v3456_v55  ;;  %v2045_v55 = vld [vmem:[%s4449_s6 + $0x210] sm:$0xff]  ;;  %v3504_v43 = vpack.c.bf16 %v2094_v34, %v2093_v5  ;;  %v2103_v5 = vld [vmem:[%s4449_s6 + $0x3e0] sm:$0xff]  ;;  %v2104_v34 = vld [vmem:[%s4449_s6 + $0x3e8] sm:$0xff] }
 0x1a9   : > { %v1540_v58 = vpop.f32.mrb[0].mxu1  ;;  %v1329_v59 = vpop.f32.mrb[1].mxu0  ;;  %v3532_v22 = vadd.f32 %v1327_v52, %v1049_v0  ;;  %v2048_v52 = vld [vmem:[%s4449_s6 + $0x228] sm:$0xff]  ;;  %v2053_v26 = vld [vmem:[%s4449_s6 + $0x250] sm:$0xff] }
 0x1aa   : > { %v3533_v62 = vadd.f32 %v1329_v59, %v1053_v45  ;;  %v1542_v63 = vpop.f32.mrb[1].mxu1  ;;  %3427 = vmatpush3.bf16.msra.mxu0 %v3426_v6  ;;  %v3534_v28 = vadd.f32 %v1540_v58, %v1057_v11  ;;  %v2063_v45 = vld [vmem:[%s4449_s6 + $0x2a0] sm:$0xff]  ;;  %v2064_v6 = vld [vmem:[%s4449_s6 + $0x2a8] sm:$0xff]  ;;  %v2097_v58 = vld [vmem:[%s4449_s6 + $0x3b0] sm:$0xff]  ;;  %v3478_v60 = vpack.c.bf16 %v2048_v52, %v2047_v51 }
 0x1ab   : > { %v3535_v2 = vadd.f32 %v1542_v63, %v1061_v47  ;;  %3459 = vmatpush3.bf16.msra.mxu1 %v3458_v49  ;;  %3429 = vmatprep.subr.bf16.mxu0 %v3428_v20  ;;  %v1971_v37 = vmax.f32 %v3532_v22, 0.0  ;;  %v2096_v47 = vld [vmem:[%s4449_s6 + $0x3a8] sm:$0xff]  ;;  %v3474_v49 = vpack.c.bf16 %v2046_v40, %v2045_v55  ;;  %v3506_v20 = vpack.c.bf16 %v2078_v44, %v2077_v41  ;;  %v2098_v59 = vld [vmem:[%s4449_s6 + $0x3b8] sm:$0xff]  ;;  %v2055_v55 = vld [vmem:[%s4449_s6 + $0x260] sm:$0xff] }
 0x1ac   : > { %v1972_v1 = vmax.f32 %v3533_v62, 0.0  ;;  %3461 = vmatprep.subr.bf16.mxu1 %v3460_v53  ;;  %v1973_v42 = vmax.f32 %v3534_v28, 0.0  ;;  %v3476_v50 = vpack.c.bf16 %v2064_v6, %v2063_v45  ;;  %v3508_v53 = vpack.c.bf16 %v2096_v47, %v2095_v46  ;;  %v2049_v62 = vld [vmem:[%s4449_s6 + $0x230] sm:$0xff]  ;;  %v2050_v63 = vld [vmem:[%s4449_s6 + $0x238] sm:$0xff]  ;;  %v2056_v40 = vld [vmem:[%s4449_s6 + $0x268] sm:$0xff] }
 0x1ad   : > { %v1974_v17 = vmax.f32 %v3535_v2, 0.0  ;;  %v3512_v0 = vpack.c.bf16 %v2098_v59, %v2097_v58  ;;  %v2082_v2 = vld [vmem:[%s4449_s6 + $0x338] sm:$0xff]  ;;  %v3482_v11 = vpack.c.bf16 %v2050_v63, %v2049_v62  ;;  %v2085_v28 = vld [vmem:[%s4449_s6 + $0x350] sm:$0xff]  ;;  %v2087_v41 = vld [vmem:[%s4449_s6 + $0x360] sm:$0xff]  ;;  %v1068_v58 = vsub.s32 5, %v3617_v3 }
 0x1ae   : > { %3431 = vmatpush3.bf16.msra.mxu0 %v3430_v48  ;;  %2178 = vmatprep.mubr.f32.mxu0 %v1972_v1  ;;  %v2081_v48 = vld [vmem:[%s4449_s6 + $0x330] sm:$0xff]  ;;  %v2102_v22 = vld [vmem:[%s4449_s6 + $0x3d8] sm:$0xff]  ;;  %v1076_v59 = vsub.s32 7, %v3617_v3 }
 0x1af   : > { %3463 = vmatpush3.bf16.msra.mxu1 %v3462_v4  ;;  %2248 = vmatprep.mubr.f32.mxu1 %v1974_v17  ;;  %v2067_v4 = vld [vmem:[%s4449_s6 + $0x2c0] sm:$0xff]  ;;  %v3514_v1 = vpack.c.bf16 %v2082_v2, %v2081_v48  ;;  %v2084_v17 = vld [vmem:[%s4449_s6 + $0x348] sm:$0xff]  ;;  %v2073_v45 = vld [vmem:[%s4449_s6 + $0x2f0] sm:$0xff] }
 0x1b0   : > { %3433 = vmatprep.subr.bf16.mxu0 %v3432_v12  ;;  %3465 = vmatprep.subr.bf16.mxu1 %v3464_v13  ;;  %v3484_v12 = vpack.c.bf16 %v2068_v7, %v2067_v4  ;;  %v2051_v13 = vld [vmem:[%s4449_s6 + $0x240] sm:$0xff]  ;;  %v2074_v6 = vld [vmem:[%s4449_s6 + $0x2f8] sm:$0xff]  ;;  %v2105_v46 = vld [vmem:[%s4449_s6 + $0x3f0] sm:$0xff]  ;;  %v1077_v62 = vrot.slane %v4506_v32, %v1076_v59 }
 0x1b1   : > { %v3496_v47 = vpack.c.bf16 %v2074_v6, %v2073_v45 }
 0x1b2   : > { %3435 = vmatpush3.bf16.msra.mxu0 %v3434_v21  ;;  %v2101_v21 = vld [vmem:[%s4449_s6 + $0x3d0] sm:$0xff] }
 0x1b3   : > { %3467 = vmatpush3.bf16.msra.mxu1 %v3466_v23  ;;  %3469 = vmatprep.subr.bf16.mxu0 %v3468_v24  ;;  %v3486_v23 = vpack.c.bf16 %v2052_v14, %v2051_v13  ;;  %v3518_v24 = vpack.c.bf16 %v2084_v17, %v2083_v15  ;;  %v2492_v14 = vld [vmem:[%s269_s15] ss:$0 sm:$0xff] }
 0x1b4   : > { %3501 = vmatprep.subr.bf16.mxu1 %v3500_v29  ;;  %v3520_v29 = vpack.c.bf16 %v2102_v22, %v2101_v21 }
 0x1b5   : > { %2179 = vmatmul.mubr.f32.vlgmr.msra.gmra.mrb[4].mxu0 %v1971_v37  ;;  %v3522_v37 = vpack.c.bf16 %v2086_v30, %v2085_v28 }
 0x1b6   : > { %2249 = vmatmul.mubr.f32.vlgmr.msra.gmra.mrb[4].mxu1 %v1973_v42  ;;  %3471 = vmatpush3.bf16.msra.mxu0 %v3470_v35  ;;  %v3490_v35 = vpack.c.bf16 %v2054_v27, %v2053_v26  ;;  %v3494_v42 = vpack.c.bf16 %v2056_v40, %v2055_v55 }
 0x1b7   : > { %3503 = vmatpush3.bf16.msra.mxu1 %v3502_v38  ;;  %3473 = vmatprep.subr.bf16.mxu0 %v3472_v39  ;;  %v3492_v38 = vpack.c.bf16 %v2072_v33, %v2071_v31  ;;  %v3524_v39 = vpack.c.bf16 %v2104_v34, %v2103_v5 }
 0x1b8   : > { %3505 = vmatprep.subr.bf16.mxu1 %v3504_v43  ;;  %v2088_v43 = vld [vmem:[%s4449_s6 + $0x368] sm:$0xff] }
 0x1b9   : > { %v3526_v44 = vpack.c.bf16 %v2088_v43, %v2087_v41 }
 0x1ba   : > { %3475 = vmatpush3.bf16.msra.mxu0 %v3474_v49  ;;  %v2106_v49 = vld [vmem:[%s4449_s6 + $0x3f8] sm:$0xff] }
 0x1bb   : > { %3507 = vmatpush3.bf16.msra.mxu1 %v3506_v20  ;;  %3477 = vmatprep.subr.bf16.mxu0 %v3476_v50  ;;  %v2057_v20 = vld [vmem:[%s4449_s6 + $0x270] sm:$0xff]  ;;  %v2058_v50 = vld [vmem:[%s4449_s6 + $0x278] sm:$0xff]  ;;  %v3528_v51 = vpack.c.bf16 %v2106_v49, %v2105_v46 }
 0x1bc   : > { %3509 = vmatprep.subr.bf16.mxu1 %v3508_v53  ;;  %v3498_v52 = vpack.c.bf16 %v2058_v50, %v2057_v20  ;;  %v2090_v53 = vld [vmem:[%s4449_s6 + $0x378] sm:$0xff] }
 0x1bd   : > { %v3530_v54 = vpack.c.bf16 %v2090_v53, %v2089_v10 }
 0x1be   : > { %3479 = vmatpush3.bf16.msra.mxu0 %v3478_v60  ;;  %v1065_v60 = vrot.slane %v4506_v32, %v1064_v56 }
 0x1bf   : > { %3511 = vmatpush3.bf16.msra.mxu1 %v3510_v61  ;;  %3481 = vmatprep.subr.bf16.mxu0 %v3480_v36  ;;  %v1073_v61 = vrot.slane %v4506_v32, %v1072_v57  ;;  %v1069_v36 = vrot.slane %v4506_v32, %v1068_v58 }
 0x1c0   : > { %3513 = vmatprep.subr.bf16.mxu1 %v3512_v0 }
 0x1c2   : > { %3483 = vmatpush3.bf16.msra.mxu0 %v3482_v11 }
 0x1c3   : > { %3515 = vmatpush3.bf16.msra.mxu1 %v3514_v1  ;;  %3485 = vmatprep.subr.bf16.mxu0 %v3484_v12 }
 0x1c4   : > { %3517 = vmatprep.subr.bf16.mxu1 %v3516_v16 }
 0x1c6   : > { %3487 = vmatpush3.bf16.msra.mxu0 %v3486_v23 }
 0x1c7   : > { %3519 = vmatpush3.bf16.msra.mxu1 %v3518_v24  ;;  %3489 = vmatprep.subr.bf16.mxu0 %v3488_v25 }
 0x1c8   : > { %3521 = vmatprep.subr.bf16.mxu1 %v3520_v29 }
 0x1ca   : > { %3491 = vmatpush3.bf16.msra.mxu0 %v3490_v35 }
 0x1cb   : > { %3523 = vmatpush3.bf16.msra.mxu1 %v3522_v37  ;;  %3493 = vmatprep.subr.bf16.mxu0 %v3492_v38 }
 0x1cc   : > { %3525 = vmatprep.subr.bf16.mxu1 %v3524_v39 }
 0x1ce   : > { %3495 = vmatpush3.bf16.msra.mxu0 %v3494_v42 }
 0x1cf   : > { %3527 = vmatpush3.bf16.msra.mxu1 %v3526_v44  ;;  %3497 = vmatprep.subr.bf16.mxu0 %v3496_v47 }
 0x1d0   : > { %3529 = vmatprep.subr.bf16.mxu1 %v3528_v51 }
 0x1d2   : > { %3499 = vmatpush3.bf16.msra.mxu0 %v3498_v52 }
 0x1d3   : > { %3531 = vmatpush3.bf16.msra.mxu1 %v3530_v54 }
 0x268   : > { %v1753_v63 = vpop.f32.mrb[2].mxu0 }
 0x269   : > { %v3536_v48 = vadd.f32 %v1753_v63, %v1065_v60  ;;  %v1966_v0 = vpop.f32.mrb[2].mxu1  ;;  %v1755_v2 = vpop.f32.mrb[3].mxu0 }
 0x26a   : > { %v3538_v4 = vadd.f32 %v1966_v0, %v1073_v61  ;;  %v3537_v7 = vadd.f32 %v1755_v2, %v1069_v36  ;;  %v1968_v8 = vpop.f32.mrb[3].mxu1 }
 0x26b   : > { %v3539_v9 = vadd.f32 %v1968_v8, %v1077_v62  ;;  %v1975_v1 = vmax.f32 %v3536_v48, 0.0 }
 0x26c   : > { %v1976_v11 = vmax.f32 %v3537_v7, 0.0  ;;  %v1977_v12 = vmax.f32 %v3538_v4, 0.0 }
 0x26d   : > { %v1978_v3 = vmax.f32 %v3539_v9, 0.0 }
 0x26e   : > { %2318 = vmatprep.mubr.f32.mxu0 %v1976_v11 }
 0x26f   : > { %2388 = vmatprep.mubr.f32.mxu1 %v1978_v3  ;;  %2319 = vmatmul.mubr.f32.vlgmr.msra.gmra.mrb[6].mxu0 %v1975_v1 }
 0x270   : > { %2389 = vmatmul.mubr.f32.vlgmr.msra.gmra.mrb[6].mxu1 %v1977_v12 }
 0x288   : > { %v2528_v32 = vpop.f32.mrb[4].mxu0 }
 0x289   : > { %v2563_v13 = vpop.f32.mrb[4].mxu1  ;;  %v2529_v15 = vpop.f32.mrb[5].mxu0 }
 0x28a   : > { %v2530_v16 = vadd.f32 %v2529_v15, %v2528_v32  ;;  %v2564_v17 = vpop.f32.mrb[5].mxu1 }
 0x28b   : > { %v2565_v18 = vadd.f32 %v2564_v17, %v2563_v13 }
 0x28c   : > { %v2181_v19 = vadd.f32 %v2530_v16, %v2492_v14 }
 0x28e   : > { %v2251_v21 = vadd.f32 %v2565_v18, %v2181_v19 }
 0x342   : > { %v2598_v22 = vpop.f32.mrb[6].mxu0 }
 0x343   : > { %v2633_v23 = vpop.f32.mrb[6].mxu1  ;;  %v2599_v24 = vpop.f32.mrb[7].mxu0 }
 0x344   : > { %v2600_v25 = vadd.f32 %v2599_v24, %v2598_v22  ;;  %v2634_v26 = vpop.f32.mrb[7].mxu1 }
 0x345   : > { %v2635_v27 = vadd.f32 %v2634_v26, %v2633_v23 }
 0x346   : > { %v2321_v28 = vadd.f32 %v2600_v25, %v2251_v21 }
 0x348   : > { %v2391_v29 = vadd.f32 %v2635_v27, %v2321_v28 }
 0x34a   : > { %2394 = vst [vmem:[%s273_s21] sm:$0x3] %v2391_v29 }
 0x34b PF: > { %s15_s18 = sadd.s32 1, %s3574_s18  }
 0x34c   : > { %p12_p4 = scmp.ge.s32.totalorder %s15_s18, 5  }
 0x34e   :  { %14 = sbr.rel (!%p12_p4) target bundleno = 1 (0x1), region = 79 }

</bundles_post_ra>
